<compile_context>
chip_gen: v5e
topology: v5e:2x2
jax: 0.10.0
libtpu: 0.0.40
codegen_flags: <defaults>
</compile_context>

<pallas_src>
import functools

import jax
import jax.numpy as jnp
from jax.experimental import pallas as pl
from jax.experimental.pallas import tpu as pltpu


def _device_defaults():
    """Per-generation VMEM step budget, scoped-VMEM limit, even-grid preference."""
    kind = ""
    try:
        kind = jax.devices()[0].device_kind.lower()
    except Exception:  # pragma: no cover - defensive
        pass
    if "v7" in kind:
        # v7x: 64 MiB physical VMEM per TensorCore, 2 TCs -> prefer even grids.
        return 16 << 20, 48 << 20, True
    if "v5" in kind or "v6" in kind:
        # v5e / v6e: 128 MiB physical VMEM, single TensorCore.
        return 40 << 20, 96 << 20, False
    # Unknown device: stay conservative.
    return 16 << 20, 32 << 20, False


_STEP_BUDGET, _VMEM_LIMIT, _PREFER_EVEN_GRID = _device_defaults()


def _uiqi_kernel(cstk_ref, rblk_ref, x1_ref, x2_ref, out_ref):
    Cs = cstk_ref[...]                          # (3, W, 3*Wo) column operators
    R = rblk_ref[...]                           # (B*Ho, B*H) block-diag row operator
    x1 = x1_ref[...].astype(jnp.float32)        # (B, H, W)
    x2 = x2_ref[...].astype(jnp.float32)

    B, H, W = x1.shape
    Wo = Cs.shape[2] // 3

    x1_2d = x1.reshape(B * H, W)
    x2_2d = x2.reshape(B * H, W)
    x12_2d = x1_2d * x2_2d

    # Fused column pass: the three operators place the filtered img1 / img2 /
    # img1*img2 into disjoint lane ranges of the same (B*H, 3*Wo) slab, so the
    # single block-diagonal row matmul below handles all three signals and all
    # B channels at once.
    tc = (jnp.dot(x1_2d, Cs[0], preferred_element_type=jnp.float32)
          + jnp.dot(x2_2d, Cs[1], preferred_element_type=jnp.float32)
          + jnp.dot(x12_2d, Cs[2], preferred_element_type=jnp.float32))

    r = jnp.dot(R, tc, preferred_element_type=jnp.float32)      # (B*Ho, 3*Wo)

    mu1 = r[:, 0:Wo]
    mu2 = r[:, Wo:2 * Wo]
    t12 = r[:, 2 * Wo:3 * Wo]

    mu1_sq = mu1 * mu1
    mu2_sq = mu2 * mu2
    mu1_mu2 = mu1 * mu2
    # Reproducing the reference exactly: avg_conv(img) - mu**2 (not img**2).
    sigma1_sq = mu1 - mu1_sq
    sigma2_sq = mu2 - mu2_sq
    sigma12 = t12 - mu1_mu2

    s = sigma1_sq + sigma2_sq
    m = mu1_sq + mu2_sq
    eps = jnp.float32(1e-8)

    # Clamp denominators that the selects below never use, so the approximate
    # reciprocal never produces Inf/NaN intermediates.
    m_safe = jnp.where(m > eps, m, jnp.float32(1.0))
    s_safe = jnp.where(s > eps, s, jnp.float32(1.0))

    def nr_recip(x):
        # EUP approximate reciprocal + two Newton steps -> ~1-2 ulp in f32.
        rr = pl.reciprocal(x, approx=True)
        rr = rr * (2.0 - x * rr)
        rr = rr * (2.0 - x * rr)
        return rr

    inv_m = nr_recip(m_safe)
    inv_s = nr_recip(s_safe)
    num_m = 2.0 * mu1_mu2 * inv_m
    num_s = 2.0 * sigma12 * inv_s

    q = jnp.ones_like(s)
    q = jnp.where((s < eps) & (m > eps), num_m, q)
    q = jnp.where((s > eps) & (m < eps), num_s, q)
    q = jnp.where((s > eps) & (m > eps), num_m * num_s, q)

    # In-kernel reduction to a per-step scalar; lane-dense (8, 128) store.
    out_ref[0] = jnp.broadcast_to(jnp.sum(q), (8, 128)).astype(jnp.float32)


def _circular_box_matrix(n, k, p):
    """(n_out, n) count matrix for a size-k box filter with circular pad p,
    scaled by 1/k. Row i sums input indices (i + d - p) mod n, d in [0, k)."""
    no = n + 2 * p - k + 1
    i = jnp.arange(no)[:, None]
    d = jnp.arange(k)[None, :]
    src = (i + d - p) % n                                            # (no, k)
    counts = jax.nn.one_hot(src, n, dtype=jnp.float32).sum(axis=1)   # (no, n)
    return counts / jnp.float32(k)


def _choose_channel_block(NC, H, W, Ho, Wo, itemsize, budget, prefer_even_grid):
    """Pick channels-per-step B and grid size G under the per-step VMEM budget.

    Accounts for double-buffered inputs (real itemsize), double-buffered
    operators, the double-buffered output block and the f32 intermediates.
    """
    def step_bytes(b):
        io = 2 * 2 * b * H * W * itemsize                         # x1, x2 (dbl-buf)
        ops = 2 * 4 * (9 * W * Wo + (b * Ho) * (b * H))            # Cstk + R (dbl-buf)
        out = 2 * 4 * 8 * 128                                      # output block
        tmp = 4 * (3 * b * H * W + 3 * b * H * Wo + 13 * b * Ho * Wo)
        return io + ops + out + tmp

    if step_bytes(NC) <= budget:
        return NC, 1
    g = 2
    while g < NC and step_bytes(-(-NC // g)) > budget:
        g += 1
    b = -(-NC // g)
    g = -(-NC // b)                      # trim steps that would be all padding
    if prefer_even_grid and g > 1 and g % 2 == 1:
        g += 1
        b = -(-NC // g)
    return b, g


@functools.partial(jax.jit, static_argnames=("block_size",))
def uiqi_pallas(img1, img2, block_size=4):
    N, C, H, W = img1.shape
    K = block_size
    p = K // 2
    Ho = H + 2 * p - K + 1   # = H + 1 for even K
    Wo = W + 2 * p - K + 1
    NC = N * C

    # Keep bf16 inputs in their native dtype (cast in-kernel); otherwise f32.
    in_dtype = img1.dtype if img1.dtype in (jnp.float32, jnp.bfloat16) else jnp.float32
    itemsize = jnp.dtype(in_dtype).itemsize
    x1 = img1.reshape(NC, H, W).astype(in_dtype)
    x2 = img2.reshape(NC, H, W).astype(in_dtype)

    B, G = _choose_channel_block(NC, H, W, Ho, Wo, itemsize,
                                 _STEP_BUDGET, _PREFER_EVEN_GRID)
    NCp = B * G
    if NCp != NC:
        pad = ((0, NCp - NC), (0, 0), (0, 0))
        x1 = jnp.pad(x1, pad)
        x2 = jnp.pad(x2, pad)

    # Filter operators (built once in the wrapper; constant index_map, so they
    # are DMA'd a single time regardless of G).
    A_r = _circular_box_matrix(H, K, p)                # (Ho, H)
    A_cT = _circular_box_matrix(W, K, p).T             # (W, Wo)
    # Three column operators writing disjoint lane ranges of the 3*Wo slab.
    Cstk = jnp.zeros((3, W, 3 * Wo), jnp.float32)
    Cstk = Cstk.at[0, :, 0:Wo].set(A_cT)
    Cstk = Cstk.at[1, :, Wo:2 * Wo].set(A_cT)
    Cstk = Cstk.at[2, :, 2 * Wo:3 * Wo].set(A_cT)
    # Block-diagonal per-channel row operator (size capped by the B chooser).
    R_blk = jnp.kron(jnp.eye(B, dtype=jnp.float32), A_r)   # (B*Ho, B*H)

    sums = pl.pallas_call(
        _uiqi_kernel,
        out_shape=jax.ShapeDtypeStruct((G, 8, 128), jnp.float32),
        grid_spec=pltpu.PrefetchScalarGridSpec(
            num_scalar_prefetch=0,
            grid=(G,),
            in_specs=[
                pl.BlockSpec((3, W, 3 * Wo), lambda g: (0, 0, 0)),
                pl.BlockSpec((B * Ho, B * H), lambda g: (0, 0)),
                pl.BlockSpec((B, H, W), lambda g: (g, 0, 0)),
                pl.BlockSpec((B, H, W), lambda g: (g, 0, 0)),
            ],
            out_specs=pl.BlockSpec((1, 8, 128), lambda g: (g, 0, 0)),
        ),
        compiler_params=pltpu.CompilerParams(
            dimension_semantics=("parallel",),
            vmem_limit_bytes=_VMEM_LIMIT,
        ),
    )(Cstk, R_blk, x1, x2)

    total = sums[:, 0, 0].sum()
    if NCp != NC:
        # Zero-padded channels yield q == 1 everywhere (exactly); remove them.
        total = total - jnp.float32((NCp - NC) * Ho * Wo)
    return total / jnp.float32(NC * Ho * Wo)


def uiqi_ref(img1, img2, block_size=4):
    """Pure-JAX reference (independent circular-pad depthwise conv)."""
    N, C, H, W = img1.shape
    K = block_size
    p = K // 2
    kern = jnp.ones((C, 1, K, K), jnp.float32) / jnp.float32(K * K)

    def conv(x):
        xp = jnp.pad(x, ((0, 0), (0, 0), (p, p), (p, p)), mode='wrap')
        return jax.lax.conv_general_dilated(
            xp, kern, (1, 1), 'VALID', feature_group_count=C,
            dimension_numbers=('NCHW', 'OIHW', 'NCHW'))

    mu1 = conv(img1)
    mu2 = conv(img2)
    mu1_sq, mu2_sq, mu1_mu2 = mu1 ** 2, mu2 ** 2, mu1 * mu2
    sigma1_sq = conv(img1) - mu1_sq
    sigma2_sq = conv(img2) - mu2_sq
    sigma12 = conv(img1 * img2) - mu1_mu2
    s = sigma1_sq + sigma2_sq
    m = mu1_sq + mu2_sq
    q = jnp.ones_like(s)
    q = jnp.where((s < 1e-8) & (m > 1e-8), 2 * mu1_mu2 / m, q)
    q = jnp.where((s > 1e-8) & (m < 1e-8), 2 * sigma12 / s, q)
    q = jnp.where((s > 1e-8) & (m > 1e-8),
                  2 * mu1_mu2 * (2 * sigma12) / (m * s), q)
    return jnp.mean(q)


if __name__ == "__main__":
    # Small shapes consistent with the module: band_ms=5 channels, block_size=4.
    N, C, H, W = 2, 5, 16, 16
    BLOCK_SIZE = 4

    key = jax.random.PRNGKey(0)
    k1, k2 = jax.random.split(key)
    img1 = jax.random.uniform(k1, (N, C, H, W), dtype=jnp.float32)
    img2 = jax.random.uniform(k2, (N, C, H, W), dtype=jnp.float32)

    out = jax.block_until_ready(uiqi_pallas(img1, img2, block_size=BLOCK_SIZE))
    ref = jax.block_until_ready(uiqi_ref(img1, img2, block_size=BLOCK_SIZE))
    assert jnp.allclose(out, ref, rtol=1e-4, atol=1e-5), (out, ref)

    print("KERNEL_OK")
</pallas_src>

<mosaic_0001>
module attributes {stable_mosaic.version = 11 : i64} {
  func.func @_uiqi_kernel(%arg0: i32, %arg1: memref<3x16x51xf32, #tpu.memory_space<vmem>>, %arg2: memref<170x160xf32, #tpu.memory_space<vmem>>, %arg3: memref<10x16x16xf32, #tpu.memory_space<vmem>>, %arg4: memref<10x16x16xf32, #tpu.memory_space<vmem>>, %arg5: memref<1x8x128xf32, #tpu.memory_space<vmem>>) attributes {dimension_semantics = [#tpu.dimension_semantics<parallel>], iteration_bounds = array<i64: 1>, scalar_prefetch = 0 : i64, scratch_operands = 0 : i64, tpu.core_type = #tpu.core_type<tc>, window_params = [{pipeline_mode = #tpu.pipeline_mode<synchronous>, transform_indices = @transform_0, window_bounds = array<i64: 3, 16, 51>}, {pipeline_mode = #tpu.pipeline_mode<synchronous>, transform_indices = @transform_1, window_bounds = array<i64: 170, 160>}, {transform_indices = @transform_2, window_bounds = array<i64: 10, 16, 16>}, {transform_indices = @transform_3, window_bounds = array<i64: 10, 16, 16>}, {transform_indices = @transform_4, window_bounds = array<i64: 1, 8, 128>}]} {
    %c0 = arith.constant 0 : index
    %c0_0 = arith.constant 0 : index
    %c0_1 = arith.constant 0 : index
    %0 = vector.load %arg1[%c0, %c0_0, %c0_1] : memref<3x16x51xf32, #tpu.memory_space<vmem>>, vector<3x16x51xf32>
    %c0_2 = arith.constant 0 : index
    %c0_3 = arith.constant 0 : index
    %1 = vector.load %arg2[%c0_2, %c0_3] : memref<170x160xf32, #tpu.memory_space<vmem>>, vector<170x160xf32>
    %c0_4 = arith.constant 0 : index
    %c0_5 = arith.constant 0 : index
    %c0_6 = arith.constant 0 : index
    %2 = vector.load %arg3[%c0_4, %c0_5, %c0_6] : memref<10x16x16xf32, #tpu.memory_space<vmem>>, vector<10x16x16xf32>
    %c0_7 = arith.constant 0 : index
    %c0_8 = arith.constant 0 : index
    %c0_9 = arith.constant 0 : index
    %3 = vector.load %arg4[%c0_7, %c0_8, %c0_9] : memref<10x16x16xf32, #tpu.memory_space<vmem>>, vector<10x16x16xf32>
    %4 = vector.shape_cast %2 : vector<10x16x16xf32> to vector<160x16xf32>
    %5 = vector.shape_cast %3 : vector<10x16x16xf32> to vector<160x16xf32>
    %6 = arith.mulf %4, %5 : vector<160x16xf32>
    %7 = vector.extract_strided_slice %0 {offsets = [0, 0, 0], sizes = [1, 16, 51], strides = [1, 1, 1]} : vector<3x16x51xf32> to vector<1x16x51xf32>
    %8 = vector.shape_cast %7 : vector<1x16x51xf32> to vector<16x51xf32>
    %cst = arith.constant dense<0.000000e+00> : vector<160x51xf32>
    %9 = tpu.matmul %4, %8, %cst {dimension_numbers = #tpu.dot_dimension_numbers<[1], [0], [0], [1], [0, 0, 1, 1], [], []>} : vector<160x16xf32>, vector<16x51xf32>, vector<160x51xf32> -> vector<160x51xf32>
    %10 = vector.extract_strided_slice %0 {offsets = [1, 0, 0], sizes = [1, 16, 51], strides = [1, 1, 1]} : vector<3x16x51xf32> to vector<1x16x51xf32>
    %11 = vector.shape_cast %10 : vector<1x16x51xf32> to vector<16x51xf32>
    %cst_10 = arith.constant dense<0.000000e+00> : vector<160x51xf32>
    %12 = tpu.matmul %5, %11, %cst_10 {dimension_numbers = #tpu.dot_dimension_numbers<[1], [0], [0], [1], [0, 0, 1, 1], [], []>} : vector<160x16xf32>, vector<16x51xf32>, vector<160x51xf32> -> vector<160x51xf32>
    %13 = arith.addf %9, %12 : vector<160x51xf32>
    %14 = vector.extract_strided_slice %0 {offsets = [2, 0, 0], sizes = [1, 16, 51], strides = [1, 1, 1]} : vector<3x16x51xf32> to vector<1x16x51xf32>
    %15 = vector.shape_cast %14 : vector<1x16x51xf32> to vector<16x51xf32>
    %cst_11 = arith.constant dense<0.000000e+00> : vector<160x51xf32>
    %16 = tpu.matmul %6, %15, %cst_11 {dimension_numbers = #tpu.dot_dimension_numbers<[1], [0], [0], [1], [0, 0, 1, 1], [], []>} : vector<160x16xf32>, vector<16x51xf32>, vector<160x51xf32> -> vector<160x51xf32>
    %17 = arith.addf %13, %16 : vector<160x51xf32>
    %cst_12 = arith.constant dense<0.000000e+00> : vector<170x51xf32>
    %18 = tpu.matmul %1, %17, %cst_12 {dimension_numbers = #tpu.dot_dimension_numbers<[1], [0], [0], [1], [0, 0, 1, 1], [], []>} : vector<170x160xf32>, vector<160x51xf32>, vector<170x51xf32> -> vector<170x51xf32>
    %19 = vector.extract_strided_slice %18 {offsets = [0, 0], sizes = [170, 17], strides = [1, 1]} : vector<170x51xf32> to vector<170x17xf32>
    %20 = vector.extract_strided_slice %18 {offsets = [0, 17], sizes = [170, 17], strides = [1, 1]} : vector<170x51xf32> to vector<170x17xf32>
    %21 = vector.extract_strided_slice %18 {offsets = [0, 34], sizes = [170, 17], strides = [1, 1]} : vector<170x51xf32> to vector<170x17xf32>
    %22 = arith.mulf %19, %19 : vector<170x17xf32>
    %23 = arith.mulf %20, %20 : vector<170x17xf32>
    %24 = arith.mulf %19, %20 : vector<170x17xf32>
    %25 = arith.subf %19, %22 : vector<170x17xf32>
    %26 = arith.subf %20, %23 : vector<170x17xf32>
    %27 = arith.subf %21, %24 : vector<170x17xf32>
    %28 = arith.addf %25, %26 : vector<170x17xf32>
    %29 = arith.addf %22, %23 : vector<170x17xf32>
    %cst_13 = arith.constant 9.99999993E-9 : f32
    %30 = vector.broadcast %cst_13 : f32 to vector<170x17xf32>
    %31 = arith.cmpf ogt, %29, %30 : vector<170x17xf32>
    %cst_14 = arith.constant 1.000000e+00 : f32
    %32 = vector.broadcast %cst_14 : f32 to vector<170x17xf32>
    %33 = arith.select %31, %29, %32 : vector<170x17xi1>, vector<170x17xf32>
    %cst_15 = arith.constant 9.99999993E-9 : f32
    %34 = vector.broadcast %cst_15 : f32 to vector<170x17xf32>
    %35 = arith.cmpf ogt, %28, %34 : vector<170x17xf32>
    %cst_16 = arith.constant 1.000000e+00 : f32
    %36 = vector.broadcast %cst_16 : f32 to vector<170x17xf32>
    %37 = arith.select %35, %28, %36 : vector<170x17xi1>, vector<170x17xf32>
    %38 = tpu.reciprocal %33 {approx = true} : vector<170x17xf32> -> vector<170x17xf32>
    %39 = arith.mulf %33, %38 : vector<170x17xf32>
    %cst_17 = arith.constant 2.000000e+00 : f32
    %40 = vector.broadcast %cst_17 : f32 to vector<170x17xf32>
    %41 = arith.subf %40, %39 : vector<170x17xf32>
    %42 = arith.mulf %38, %41 : vector<170x17xf32>
    %43 = arith.mulf %33, %42 : vector<170x17xf32>
    %cst_18 = arith.constant 2.000000e+00 : f32
    %44 = vector.broadcast %cst_18 : f32 to vector<170x17xf32>
    %45 = arith.subf %44, %43 : vector<170x17xf32>
    %46 = arith.mulf %42, %45 : vector<170x17xf32>
    %47 = tpu.reciprocal %37 {approx = true} : vector<170x17xf32> -> vector<170x17xf32>
    %48 = arith.mulf %37, %47 : vector<170x17xf32>
    %cst_19 = arith.constant 2.000000e+00 : f32
    %49 = vector.broadcast %cst_19 : f32 to vector<170x17xf32>
    %50 = arith.subf %49, %48 : vector<170x17xf32>
    %51 = arith.mulf %47, %50 : vector<170x17xf32>
    %52 = arith.mulf %37, %51 : vector<170x17xf32>
    %cst_20 = arith.constant 2.000000e+00 : f32
    %53 = vector.broadcast %cst_20 : f32 to vector<170x17xf32>
    %54 = arith.subf %53, %52 : vector<170x17xf32>
    %55 = arith.mulf %51, %54 : vector<170x17xf32>
    %cst_21 = arith.constant 2.000000e+00 : f32
    %56 = vector.broadcast %cst_21 : f32 to vector<170x17xf32>
    %57 = arith.mulf %56, %24 : vector<170x17xf32>
    %58 = arith.mulf %57, %46 : vector<170x17xf32>
    %cst_22 = arith.constant 2.000000e+00 : f32
    %59 = vector.broadcast %cst_22 : f32 to vector<170x17xf32>
    %60 = arith.mulf %59, %27 : vector<170x17xf32>
    %61 = arith.mulf %60, %55 : vector<170x17xf32>
    %cst_23 = arith.constant 1.000000e+00 : f32
    %62 = vector.broadcast %cst_23 : f32 to vector<170x17xf32>
    %cst_24 = arith.constant 9.99999993E-9 : f32
    %63 = vector.broadcast %cst_24 : f32 to vector<170x17xf32>
    %64 = arith.cmpf olt, %28, %63 : vector<170x17xf32>
    %cst_25 = arith.constant 9.99999993E-9 : f32
    %65 = vector.broadcast %cst_25 : f32 to vector<170x17xf32>
    %66 = arith.cmpf ogt, %29, %65 : vector<170x17xf32>
    %67 = arith.andi %64, %66 : vector<170x17xi1>
    %68 = arith.select %67, %58, %62 : vector<170x17xi1>, vector<170x17xf32>
    %cst_26 = arith.constant 9.99999993E-9 : f32
    %69 = vector.broadcast %cst_26 : f32 to vector<170x17xf32>
    %70 = arith.cmpf ogt, %28, %69 : vector<170x17xf32>
    %cst_27 = arith.constant 9.99999993E-9 : f32
    %71 = vector.broadcast %cst_27 : f32 to vector<170x17xf32>
    %72 = arith.cmpf olt, %29, %71 : vector<170x17xf32>
    %73 = arith.andi %70, %72 : vector<170x17xi1>
    %74 = arith.select %73, %61, %68 : vector<170x17xi1>, vector<170x17xf32>
    %cst_28 = arith.constant 9.99999993E-9 : f32
    %75 = vector.broadcast %cst_28 : f32 to vector<170x17xf32>
    %76 = arith.cmpf ogt, %28, %75 : vector<170x17xf32>
    %cst_29 = arith.constant 9.99999993E-9 : f32
    %77 = vector.broadcast %cst_29 : f32 to vector<170x17xf32>
    %78 = arith.cmpf ogt, %29, %77 : vector<170x17xf32>
    %79 = arith.andi %76, %78 : vector<170x17xi1>
    %80 = arith.mulf %58, %61 : vector<170x17xf32>
    %81 = arith.select %79, %80, %74 : vector<170x17xi1>, vector<170x17xf32>
    %82 = vector.shape_cast %81 : vector<170x17xf32> to vector<1x170x17xf32>
    %cst_30 = arith.constant dense<0.000000e+00> : vector<1xf32>
    %83 = vector.multi_reduction <add>, %82, %cst_30 [1, 2] : vector<1x170x17xf32> to vector<1xf32>
    %84 = vector.shape_cast %83 : vector<1xf32> to vector<1x1x1xf32>
    %85 = vector.extract %84[0, 0, 0] : f32 from vector<1x1x1xf32>
    %86 = vector.broadcast %85 : f32 to vector<8x128xf32>
    %c0_31 = arith.constant 0 : index
    %c0_32 = arith.constant 0 : index
    %c0_33 = arith.constant 0 : index
    %87 = vector.load %arg5[%c0_31, %c0_32, %c0_33] : memref<1x8x128xf32, #tpu.memory_space<vmem>>, vector<1x8x128xf32>
    %88 = vector.shape_cast %87 : vector<1x8x128xf32> to vector<8x128xf32>
    %89 = vector.shape_cast %86 : vector<8x128xf32> to vector<1x8x128xf32>
    tpu.vector_store %arg5[%c0_31, %c0_32, %c0_33], %89 {strides = array<i32>} : memref<1x8x128xf32, #tpu.memory_space<vmem>>, vector<1x8x128xf32>,
    return
  }
  func.func @transform_0(%arg0: i32) -> (i32, i32, i32) {
    %c0_i32 = arith.constant 0 : i32
    %c0_i32_0 = arith.constant 0 : i32
    %c0_i32_1 = arith.constant 0 : i32
    %c0_i32_2 = arith.constant 0 : i32
    return %c0_i32, %c0_i32_0, %c0_i32_1 : i32, i32, i32
  }
  func.func @transform_1(%arg0: i32) -> (i32, i32) {
    %c0_i32 = arith.constant 0 : i32
    %c0_i32_0 = arith.constant 0 : i32
    %c0_i32_1 = arith.constant 0 : i32
    return %c0_i32, %c0_i32_0 : i32, i32
  }
  func.func @transform_2(%arg0: i32) -> (i32, i32, i32) {
    %c0_i32 = arith.constant 0 : i32
    %c0_i32_0 = arith.constant 0 : i32
    %c0_i32_1 = arith.constant 0 : i32
    return %arg0, %c0_i32, %c0_i32_0 : i32, i32, i32
  }
  func.func @transform_3(%arg0: i32) -> (i32, i32, i32) {
    %c0_i32 = arith.constant 0 : i32
    %c0_i32_0 = arith.constant 0 : i32
    %c0_i32_1 = arith.constant 0 : i32
    return %arg0, %c0_i32, %c0_i32_0 : i32, i32, i32
  }
  func.func @transform_4(%arg0: i32) -> (i32, i32, i32) {
    %c0_i32 = arith.constant 0 : i32
    %c0_i32_0 = arith.constant 0 : i32
    %c0_i32_1 = arith.constant 0 : i32
    return %arg0, %c0_i32, %c0_i32_0 : i32, i32, i32
  }
}

</mosaic_0001>

<bundles_post_ra>
// kernel: uiqi_pallas.1
= control target key start
LH: loop header
LB: loop body
LE: loop exit
PB: predicated region body
PF: predicated region fallthrough
CT: control target
= control target key end

     0   :  { %vm127_vm0 = vcmask 130048   ;;  %vm559_vm1 = vcmask 261120   ;;  %s2373_s9 = smov 111   ;;  %s2375_s25 = smov 94   ;;  %s4475_s0 = inlined_call_operand.vmem [shape: f32[3,16,51], index: 0, kind: input, shape index: {}]   ;;  %s4476_s3 = inlined_call_operand.vmem [shape: f32[10,16,16], index: 3, kind: input, shape index: {}]   ;;  %s4477_s2 = inlined_call_operand.vmem [shape: f32[10,16,16], index: 2, kind: input, shape index: {}]   ;;  %s4478_s1 = inlined_call_operand.vmem [shape: f32[170,160], index: 1, kind: input, shape index: {}]   ;;  %s4479_s4 = inlined_call_operand.vmem [shape: f32[1,8,128], index: 4, kind: output, shape index: {}]  }
   0x1   :  { %v20_v0 = vld [vmem:[%s4475_s0 + $0x18] sm:$0xff]  ;;  %v19_v1 = vld [vmem:[%s4475_s0 + $0x10] sm:$0xff]  ;;  %v2410_v2 = vld [vmem:[%s4476_s3 + $0x28] sm:$0xff] }
   0x2   :  { %2276 = vmatpush.msra.mxu1 %v20_v0  ;;  %2277 = vmatpush.msra.mxu2 %v20_v0  ;;  %v2415_v3 = vld [vmem:[%s4476_s3 + $0x60] sm:$0xff]  ;;  %v22_v4 = vld [vmem:[%s4475_s0 + $0x28] sm:$0xff]  ;;  %v2427_v5 = vld [vmem:[%s4476_s3 + $0x30] sm:$0xff] }
   0x3   :  { %202 = vmatpush.msra.mxu0 %v20_v0  ;;  %v2432_v6 = vld [vmem:[%s4476_s3 + $0x68] sm:$0xff]  ;;  %v2444_v8 = vld [vmem:[%s4476_s3 + $0x38] sm:$0xff]  ;;  %v2449_v9 = vld [vmem:[%s4476_s3 + $0x70] sm:$0xff] }
   0x4   :  { %2278 = vmatpush.msra.mxu1 %v19_v1  ;;  %2279 = vmatpush.msra.mxu2 %v19_v1  ;;  %v18_v7 = vld [vmem:[%s4475_s0 + $0x8] sm:$0xff]  ;;  %v17_v10 = vld [vmem:[%s4475_s0] sm:$0xff]  ;;  %v2466_v12 = vld [vmem:[%s4476_s3 + $0x78] sm:$0xff] }
   0x5   :  { %2199 = vmatmul.msk.f32.vlgmr.msra.gmra.mxu1 %vm127_vm0, %v2410_v2  ;;  %2206 = vmatmul.msk.f32.vlgmr.msra.gmra.mxu2 %vm127_vm0, %v2415_v3  ;;  %v2461_v11 = vld [vmem:[%s4476_s3 + $0x40] sm:$0xff]  ;;  %v2482_v15 = vld [vmem:[%s4476_s3 + $0x48] sm:$0xff]  ;;  %v2500_v18 = vld [vmem:[%s4476_s3 + $0x50] sm:$0xff] }
   0x6   :  { %476 = vmatpush.msrb.mxu2 %v22_v4  ;;  %203 = vmatpush.msra.mxu0 %v19_v1  ;;  %v87_v13 = vld [vmem:[%s4476_s3] sm:$0xff]  ;;  %v88_v17 = vld [vmem:[%s4476_s3 + $0x8] sm:$0xff]  ;;  %v89_v20 = vld [vmem:[%s4476_s3 + $0x10] sm:$0xff] }
   0x7   :  { %339 = vmatpush.msrb.mxu1 %v18_v7  ;;  %v21_v14 = vld [vmem:[%s4475_s0 + $0x20] sm:$0xff]  ;;  %2194 = vmatmul.msk.f32.vlgmr.msra.gmra.mxu0 %vm127_vm0, %v87_v13  ;;  %v2505_v19 = vld [vmem:[%s4476_s3 + $0x88] sm:$0xff]  ;;  %v2518_v21 = vld [vmem:[%s4476_s3 + $0x58] sm:$0xff] }
   0x8   :  { %477 = vmatpush.msrb.mxu2 %v21_v14  ;;  %v2487_v16 = vld [vmem:[%s4476_s3 + $0x80] sm:$0xff]  ;;  %v2523_v22 = vld [vmem:[%s4476_s3 + $0x90] sm:$0xff]  ;;  %v90_v23 = vld [vmem:[%s4476_s3 + $0x18] sm:$0xff] }
   0x9   :  { %340 = vmatpush.msrb.mxu1 %v17_v10  ;;  %v2536_v24 = vld [vmem:[%s4476_s3 + $0x98] sm:$0xff]  ;;  %v67_v25 = vld [vmem:[%s4477_s2] sm:$0xff]  ;;  %v68_v28 = vld [vmem:[%s4477_s2 + $0x8] sm:$0xff] }
   0xa   :  { %v91_v26 = vld [vmem:[%s4476_s3 + $0x20] sm:$0xff]  ;;  %v107_v27 = vmul.f32 %v87_v13, %v67_v25  ;;  %v108_v29 = vmul.f32 %v88_v17, %v68_v28  ;;  %v69_v30 = vld [vmem:[%s4477_s2 + $0x10] sm:$0xff]  ;;  %v70_v32 = vld [vmem:[%s4477_s2 + $0x18] sm:$0xff] }
   0xb   :  { %v109_v31 = vmul.f32 %v89_v20, %v69_v30  ;;  %v110_v33 = vmul.f32 %v90_v23, %v70_v32  ;;  %v71_v34 = vld [vmem:[%s4477_s2 + $0x20] sm:$0xff]  ;;  %v72_v36 = vld [vmem:[%s4477_s2 + $0x28] sm:$0xff]  ;;  %v73_v38 = vld [vmem:[%s4477_s2 + $0x30] sm:$0xff] }
   0xc   :  { %v111_v35 = vmul.f32 %v91_v26, %v71_v34  ;;  %v112_v37 = vmul.f32 %v2410_v2, %v72_v36  ;;  %v113_v39 = vmul.f32 %v2427_v5, %v73_v38  ;;  %v74_v40 = vld [vmem:[%s4477_s2 + $0x38] sm:$0xff]  ;;  %v75_v42 = vld [vmem:[%s4477_s2 + $0x40] sm:$0xff]  ;;  %v76_v45 = vld [vmem:[%s4477_s2 + $0x48] sm:$0xff] }
   0xd   :  { %2200 = vmatmul.msk.f32.gmra.mxu1 %vm127_vm0, %v2427_v5  ;;  %2207 = vmatmul.msk.f32.gmra.mxu2 %vm127_vm0, %v2432_v6  ;;  %v114_v41 = vmul.f32 %v2444_v8, %v74_v40  ;;  %v115_v43 = vmul.f32 %v2461_v11, %v75_v42  ;;  %v116_v47 = vmul.f32 %v2482_v15, %v76_v45  ;;  %v77_v49 = vld [vmem:[%s4477_s2 + $0x50] sm:$0xff]  ;;  %v78_v53 = vld [vmem:[%s4477_s2 + $0x58] sm:$0xff]  ;;  %v79_v57 = vld [vmem:[%s4477_s2 + $0x60] sm:$0xff] }
   0xe   :  { %v117_v51 = vmul.f32 %v2500_v18, %v77_v49  ;;  %v118_v55 = vmul.f32 %v2518_v21, %v78_v53  ;;  %v119_v59 = vmul.f32 %v2415_v3, %v79_v57  ;;  %v80_v61 = vld [vmem:[%s4477_s2 + $0x68] sm:$0xff]  ;;  %v81_v1 = vld [vmem:[%s4477_s2 + $0x70] sm:$0xff]  ;;  %v82_v5 = vld [vmem:[%s4477_s2 + $0x78] sm:$0xff] }
   0xf   :  { %2195 = vmatmul.msk.f32.gmra.mxu0 %vm127_vm0, %v88_v17  ;;  %v120_v63 = vmul.f32 %v2432_v6, %v80_v61  ;;  %v121_v3 = vmul.f32 %v2449_v9, %v81_v1  ;;  %v122_v7 = vmul.f32 %v2466_v12, %v82_v5  ;;  %v83_v10 = vld [vmem:[%s4477_s2 + $0x80] sm:$0xff]  ;;  %v84_v14 = vld [vmem:[%s4477_s2 + $0x88] sm:$0xff] }
  0x10   :  { %v123_v13 = vmul.f32 %v2487_v16, %v83_v10 }
  0x15   :  { %2201 = vmatmul.msk.f32.gmra.mxu1 %vm127_vm0, %v2444_v8  ;;  %2208 = vmatmul.msk.f32.gmra.mxu2 %vm127_vm0, %v2449_v9 }
  0x17   :  { %2196 = vmatmul.msk.f32.gmra.mxu0 %vm127_vm0, %v89_v20  ;;  %v124_v20 = vmul.f32 %v2505_v19, %v84_v14 }
  0x1d   :  { %2202 = vmatmul.msk.f32.gmra.mxu1 %vm127_vm0, %v2461_v11  ;;  %2209 = vmatmul.msk.f32.gmra.mxu2 %vm127_vm0, %v2466_v12 }
  0x1f   :  { %2197 = vmatmul.msk.f32.gmra.mxu0 %vm127_vm0, %v90_v23 }
  0x25   :  { %2203 = vmatmul.msk.f32.gmra.mxu1 %vm127_vm0, %v2482_v15  ;;  %2210 = vmatmul.msk.f32.gmra.mxu2 %vm127_vm0, %v2487_v16  ;;  %v85_v16 = vld [vmem:[%s4477_s2 + $0x90] sm:$0xff] }
  0x27   :  { %2198 = vmatmul.msk.f32.gmra.mxu0 %vm127_vm0, %v91_v26 }
  0x2d   :  { %2204 = vmatmul.msk.f32.gmra.mxu1 %vm127_vm0, %v2500_v18  ;;  %2211 = vmatmul.msk.f32.gmra.mxu2 %vm127_vm0, %v2505_v19  ;;  %v86_v19 = vld [vmem:[%s4477_s2 + $0x98] sm:$0xff] }
  0x35   :  { %2205 = vmatmul.msk.f32.gmra.mxu1 %vm127_vm0, %v2518_v21  ;;  %2212 = vmatmul.msk.f32.gmra.mxu2 %vm127_vm0, %v2523_v22 }
  0x3d   :  { %2213 = vmatmul.msk.f32.gmra.mxu2 %vm127_vm0, %v2536_v24  ;;  %2214 = vmatmul.msk.f32.vlgmr.msrb.gmra.mxu1 %vm127_vm0, %v67_v25 }
  0x45   :  { %2215 = vmatmul.msk.f32.gmra.mxu1 %vm127_vm0, %v68_v28  ;;  %2234 = vmatmul.msk.f32.vlgmr.msrb.gmra.mxu2 %vm127_vm0, %v107_v27  ;;  %v125_v28 = vmul.f32 %v2523_v22, %v85_v16 }
  0x4d   :  { %2216 = vmatmul.msk.f32.gmra.mxu1 %vm127_vm0, %v69_v30  ;;  %2235 = vmatmul.msk.f32.gmra.mxu2 %vm127_vm0, %v108_v29 }
  0x55   :  { %2217 = vmatmul.msk.f32.gmra.mxu1 %vm127_vm0, %v70_v32  ;;  %2236 = vmatmul.msk.f32.gmra.mxu2 %vm127_vm0, %v109_v31 }
  0x5d   :  { %2218 = vmatmul.msk.f32.gmra.mxu1 %vm127_vm0, %v71_v34  ;;  %2237 = vmatmul.msk.f32.gmra.mxu2 %vm127_vm0, %v110_v33  ;;  %v126_v34 = vmul.f32 %v2536_v24, %v86_v19 }
  0x65   :  { %2219 = vmatmul.msk.f32.gmra.mxu1 %vm127_vm0, %v72_v36  ;;  %2238 = vmatmul.msk.f32.gmra.mxu2 %vm127_vm0, %v111_v35 }
  0x6d   :  { %2220 = vmatmul.msk.f32.gmra.mxu1 %vm127_vm0, %v73_v38  ;;  %2239 = vmatmul.msk.f32.gmra.mxu2 %vm127_vm0, %v112_v37 }
  0x75   :  { %2221 = vmatmul.msk.f32.gmra.mxu1 %vm127_vm0, %v74_v40  ;;  %2240 = vmatmul.msk.f32.gmra.mxu2 %vm127_vm0, %v113_v39 }
  0x7d   :  { %2222 = vmatmul.msk.f32.gmra.mxu1 %vm127_vm0, %v75_v42  ;;  %2241 = vmatmul.msk.f32.gmra.mxu2 %vm127_vm0, %v114_v41 }
  0x82   :  { %v2592_v44 = vpop.f32.mrf.mxu1 }
  0x84   :  { %v205_v9 = vpop.f32.mrf.mxu0 }
  0x85   :  { %2223 = vmatmul.msk.f32.gmra.mxu1 %vm127_vm0, %v76_v45  ;;  %2242 = vmatmul.msk.f32.gmra.mxu2 %vm127_vm0, %v115_v43 }
  0x88   :  { %v2599_v46 = vpop.f32.mrf.mxu2 }
  0x8a   :  { %v2602_v48 = vpop.f32.mrf.mxu1 }
  0x8c   :  { %v208_v12 = vpop.f32.mrf.mxu0 }
  0x8d   :  { %2224 = vmatmul.msk.f32.gmra.mxu1 %vm127_vm0, %v77_v49  ;;  %2243 = vmatmul.msk.f32.gmra.mxu2 %vm127_vm0, %v116_v47 }
  0x90   :  { %v2609_v50 = vpop.f32.mrf.mxu2 }
  0x92   :  { %v2612_v52 = vpop.f32.mrf.mxu1 }
  0x94   :  { %v211_v26 = vpop.f32.mrf.mxu0 }
  0x95   :  { %2225 = vmatmul.msk.f32.gmra.mxu1 %vm127_vm0, %v78_v53  ;;  %2244 = vmatmul.msk.f32.gmra.mxu2 %vm127_vm0, %v117_v51 }
  0x98   :  { %v2619_v54 = vpop.f32.mrf.mxu2 }
  0x9a   :  { %v2622_v56 = vpop.f32.mrf.mxu1 }
  0x9c   :  { %v214_v33 = vpop.f32.mrf.mxu0 }
  0x9d   :  { %2226 = vmatmul.msk.f32.gmra.mxu1 %vm127_vm0, %v79_v57  ;;  %2245 = vmatmul.msk.f32.gmra.mxu2 %vm127_vm0, %v118_v55 }
  0xa0   :  { %v2629_v58 = vpop.f32.mrf.mxu2 }
  0xa2   :  { %v2632_v60 = vpop.f32.mrf.mxu1 }
  0xa4   :  { %v217_v40 = vpop.f32.mrf.mxu0 }
  0xa5   :  { %2227 = vmatmul.msk.f32.gmra.mxu1 %vm127_vm0, %v80_v61  ;;  %2246 = vmatmul.msk.f32.gmra.mxu2 %vm127_vm0, %v119_v59 }
  0xa8   :  { %v2639_v62 = vpop.f32.mrf.mxu2 }
  0xaa   :  { %v2642_v0 = vpop.f32.mrf.mxu1 }
  0xad   :  { %2228 = vmatmul.msk.f32.gmra.mxu1 %vm127_vm0, %v81_v1  ;;  %2247 = vmatmul.msk.f32.gmra.mxu2 %vm127_vm0, %v120_v63 }
  0xb0   :  { %v2649_v2 = vpop.f32.mrf.mxu2 }
  0xb2   :  { %v2652_v4 = vpop.f32.mrf.mxu1 }
  0xb5   :  { %2229 = vmatmul.msk.f32.gmra.mxu1 %vm127_vm0, %v82_v5  ;;  %2248 = vmatmul.msk.f32.gmra.mxu2 %vm127_vm0, %v121_v3 }
  0xb8   :  { %v2659_v6 = vpop.f32.mrf.mxu2 }
  0xba   :  { %v342_v8 = vpop.f32.mrf.mxu1 }
  0xbb   :  { %v343_v17 = vadd.f32 %v342_v8, %v205_v9 }
  0xbd   :  { %2230 = vmatmul.msk.f32.gmra.mxu1 %vm127_vm0, %v83_v10  ;;  %2249 = vmatmul.msk.f32.gmra.mxu2 %vm127_vm0, %v122_v7 }
  0xc0   :  { %v2667_v11 = vpop.f32.mrf.mxu2 }
  0xc2   :  { %v345_v15 = vpop.f32.mrf.mxu1 }
  0xc3   :  { %v346_v25 = vadd.f32 %v345_v15, %v208_v12 }
  0xc5   :  { %2231 = vmatmul.msk.f32.gmra.mxu1 %vm127_vm0, %v84_v14  ;;  %2250 = vmatmul.msk.f32.gmra.mxu2 %vm127_vm0, %v123_v13 }
  0xc8   :  { %v479_v18 = vpop.f32.mrf.mxu2 }
  0xc9   :  { %v2676_v21 = vadd.f32 %v479_v18, %v343_v17 }
  0xca   :  { %v348_v23 = vpop.f32.mrf.mxu1 }
  0xcb   :  { %v349_v31 = vadd.f32 %v348_v23, %v211_v26 }
  0xcd   :  { %2232 = vmatmul.msk.f32.gmra.mxu1 %vm127_vm0, %v85_v16  ;;  %2251 = vmatmul.msk.f32.gmra.mxu2 %vm127_vm0, %v124_v20 }
  0xd0   :  { %v482_v27 = vpop.f32.mrf.mxu2 }
  0xd1   :  { %v2684_v29 = vadd.f32 %v482_v27, %v346_v25 }
  0xd2   :  { %v351_v30 = vpop.f32.mrf.mxu1 }
  0xd3   :  { %v352_v22 = vadd.f32 %v351_v30, %v214_v33 }
  0xd5   :  { %2233 = vmatmul.msk.f32.gmra.mxu1 %vm127_vm0, %v86_v19  ;;  %2252 = vmatmul.msk.f32.gmra.mxu2 %vm127_vm0, %v125_v28 }
  0xd8   :  { %v485_v32 = vpop.f32.mrf.mxu2 }
  0xd9   :  { %v2692_v35 = vadd.f32 %v485_v32, %v349_v31 }
  0xda   :  { %v354_v36 = vpop.f32.mrf.mxu1 }
  0xdb   :  { %v355_v41 = vadd.f32 %v354_v36, %v217_v40 }
  0xdd   :  { %2253 = vmatmul.msk.f32.gmra.mxu2 %vm127_vm0, %v126_v34 }
  0xe0   :  { %v488_v37 = vpop.f32.mrf.mxu2 }
  0xe1   :  { %v2695_v38 = vadd.f32 %v488_v37, %v352_v22 }
  0xe2   :  { %v357_v39 = vpop.f32.mrf.mxu1 }
  0xe3   :  { %v358_v47 = vadd.f32 %v357_v39, %v2592_v44  ;;  %v23_v39 = vld [vmem:[%s4478_s1] sm:$0xff] }
  0xe8   :  { %v491_v42 = vpop.f32.mrf.mxu2 }
  0xe9   :  { %v543_v43 = vadd.f32 %v491_v42, %v355_v41 }
  0xea   :  { %v360_v45 = vpop.f32.mrf.mxu1 }
  0xeb   :  { %v361_v53 = vadd.f32 %v360_v45, %v2602_v48  ;;  %v24_v45 = vld [vmem:[%s4478_s1 + $0x8] sm:$0xff] }
  0xf0   :  { %v494_v49 = vpop.f32.mrf.mxu2 }
  0xf1   :  { %v544_v51 = vadd.f32 %v494_v49, %v358_v47  ;;  %v29_v47 = vld [vmem:[%s4478_s1 + $0x30] sm:$0xff]  ;;  %v30_v49 = vld [vmem:[%s4478_s1 + $0x38] sm:$0xff] }
  0xf2   :  { %v363_v24 = vpop.f32.mrf.mxu1 }
  0xf3   :  { %v364_v61 = vadd.f32 %v363_v24, %v2612_v52  ;;  %v32_v24 = vld [vmem:[%s4478_s1 + $0x48] sm:$0xff] }
  0xf8   :  { %v497_v55 = vpop.f32.mrf.mxu2 }
  0xf9   :  { %v545_v57 = vadd.f32 %v497_v55, %v361_v53  ;;  %v33_v53 = vld [vmem:[%s4478_s1 + $0x50] sm:$0xff]  ;;  %v34_v55 = vld [vmem:[%s4478_s1 + $0x58] sm:$0xff] }
  0xfa   :  { %v366_v59 = vpop.f32.mrf.mxu1 }
  0xfb   :  { %v367_v5 = vadd.f32 %v366_v59, %v2622_v56  ;;  %v36_v59 = vld [vmem:[%s4478_s1 + $0x68] sm:$0xff] }
 0x100   :  { %v500_v63 = vpop.f32.mrf.mxu2 }
 0x101   :  { %v546_v1 = vadd.f32 %v500_v63, %v364_v61  ;;  %v37_v61 = vld [vmem:[%s4478_s1 + $0x70] sm:$0xff]  ;;  %v38_v63 = vld [vmem:[%s4478_s1 + $0x78] sm:$0xff] }
 0x102   :  { %v369_v3 = vpop.f32.mrf.mxu1 }
 0x108   :  { %v503_v7 = vpop.f32.mrf.mxu2 }
 0x109   :  { %v547_v8 = vadd.f32 %v503_v7, %v367_v5  ;;  %v41_v5 = vld [vmem:[%s4478_s1 + $0x90] sm:$0xff]  ;;  %v42_v7 = vld [vmem:[%s4478_s1 + $0x98] sm:$0xff] }
 0x10a   :  { %v372_v10 = vpop.f32.mrf.mxu1 }
 0x110   :  { %v506_v9 = vpop.f32.mrf.mxu2 }
 0x112   :  { %v375_v44 = vpop.f32.mrf.mxu1 }
 0x113   :  { %v376_v31 = vadd.f32 %v375_v44, %v2652_v4  ;;  %v46_v44 = vld [vmem:[%s4478_s1 + $0xb8] sm:$0xff] }
 0x118   :  { %v509_v13 = vpop.f32.mrf.mxu2 }
 0x11a   :  { %v378_v14 = vpop.f32.mrf.mxu1 }
 0x11b   :  { %v379_v19 = vadd.f32 %v378_v14, %v2599_v46  ;;  %v48_v14 = vld [vmem:[%s4478_s1 + $0xc8] sm:$0xff] }
 0x120   :  { %v512_v15 = vpop.f32.mrf.mxu2 }
 0x121   :  { %v550_v36 = vadd.f32 %v512_v15, %v376_v31  ;;  %v49_v15 = vld [vmem:[%s4478_s1 + $0xd0] sm:$0xff]  ;;  %v58_v31 = vld [vmem:[%s4478_s1 + $0x118] sm:$0xff] }
 0x122   :  { %v381_v12 = vpop.f32.mrf.mxu1 }
 0x123   :  { %v382_v27 = vadd.f32 %v381_v12, %v2609_v50  ;;  %v50_v12 = vld [vmem:[%s4478_s1 + $0xd8] sm:$0xff] }
 0x128   :  { %v515_v48 = vpop.f32.mrf.mxu2 }
 0x129   :  { %v551_v32 = vadd.f32 %v515_v48, %v379_v19  ;;  %v51_v48 = vld [vmem:[%s4478_s1 + $0xe0] sm:$0xff] }
 0x12a   :  { %v384_v17 = vpop.f32.mrf.mxu1 }
 0x12b   :  { %v385_v56 = vadd.f32 %v384_v17, %v2619_v54  ;;  %v370_v54 = vadd.f32 %v369_v3, %v2632_v60  ;;  %v40_v3 = vld [vmem:[%s4478_s1 + $0x88] sm:$0xff] }
 0x12c   :  { %v52_v17 = vld [vmem:[%s4478_s1 + $0xe8] sm:$0xff] }
 0x12d   :  { %v548_v50 = vadd.f32 %v506_v9, %v370_v54  ;;  %v45_v9 = vld [vmem:[%s4478_s1 + $0xb0] sm:$0xff] }
 0x130   :  { %v518_v18 = vpop.f32.mrf.mxu2 }
 0x131   :  { %v552_v30 = vadd.f32 %v518_v18, %v382_v27  ;;  %v53_v18 = vld [vmem:[%s4478_s1 + $0xf0] sm:$0xff] }
 0x132   :  { %v387_v20 = vpop.f32.mrf.mxu1 }
 0x133   :  { %v388_v23 = vadd.f32 %v387_v20, %v2629_v58  ;;  %v373_v58 = vadd.f32 %v372_v10, %v2642_v0  ;;  %v44_v10 = vld [vmem:[%s4478_s1 + $0xa8] sm:$0xff]  ;;  %v54_v20 = vld [vmem:[%s4478_s1 + $0xf8] sm:$0xff] }
 0x135   :  { %v549_v22 = vadd.f32 %v509_v13, %v373_v58  ;;  %v47_v13 = vld [vmem:[%s4478_s1 + $0xc0] sm:$0xff] }
 0x138   :  { %v521_v16 = vpop.f32.mrf.mxu2 }
 0x139   :  { %v553_v28 = vadd.f32 %v521_v16, %v385_v56  ;;  %v55_v16 = vld [vmem:[%s4478_s1 + $0x100] sm:$0xff] }
 0x13a   :  { %v390_v52 = vpop.f32.mrf.mxu1 }
 0x140   :  { %v524_v25 = vpop.f32.mrf.mxu2 }
 0x141   :  { %v554_v26 = vadd.f32 %v524_v25, %v388_v23  ;;  %v56_v25 = vld [vmem:[%s4478_s1 + $0x108] sm:$0xff] }
 0x142   :  { %v393_v33 = vpop.f32.mrf.mxu1 }
 0x143   :  { %626 = vmatpush.msra.mxu3 %v554_v26  ;;  %v57_v26 = vld [vmem:[%s4478_s1 + $0x110] sm:$0xff] }
 0x145   :  { %627 = vmatpush.msra.mxu3 %v553_v28 }
 0x147   :  { %628 = vmatpush.msra.mxu3 %v552_v30 }
 0x148   :  { %v527_v34 = vpop.f32.mrf.mxu2 }
 0x149   :  { %629 = vmatpush.msra.mxu3 %v551_v32 }
 0x14a   :  { %v396_v37 = vpop.f32.mrf.mxu1 }
 0x14b   :  { %630 = vmatpush.msra.mxu3 %v550_v36  ;;  %v397_v41 = vadd.f32 %v396_v37, %v2659_v6  ;;  %v25_v6 = vld [vmem:[%s4478_s1 + $0x10] sm:$0xff] }
 0x14d   :  { %631 = vmatpush.msra.mxu3 %v549_v22 }
 0x14f   :  { %632 = vmatpush.msra.mxu3 %v548_v50  ;;  %v60_v50 = vld [vmem:[%s4478_s1 + $0x128] sm:$0xff] }
 0x150   :  { %v530_v46 = vpop.f32.mrf.mxu2 }
 0x151   :  { %633 = vmatpush.msra.mxu3 %v547_v8  ;;  %v43_v8 = vld [vmem:[%s4478_s1 + $0xa0] sm:$0xff] }
 0x152   :  { %v399_v0 = vpop.f32.mrf.mxu1 }
 0x153   :  { %634 = vmatpush.msra.mxu3 %v546_v1  ;;  %v400_v60 = vadd.f32 %v399_v0, %v2667_v11  ;;  %v39_v1 = vld [vmem:[%s4478_s1 + $0x80] sm:$0xff] }
 0x155   :  { %635 = vmatpush.msra.mxu3 %v545_v57  ;;  %v35_v57 = vld [vmem:[%s4478_s1 + $0x60] sm:$0xff] }
 0x157   :  { %636 = vmatpush.msra.mxu3 %v544_v51  ;;  %v31_v51 = vld [vmem:[%s4478_s1 + $0x40] sm:$0xff] }
 0x158   :  { %v533_v4 = vpop.f32.mrf.mxu2 }
 0x159   :  { %637 = vmatpush.msra.mxu3 %v543_v43  ;;  %v557_v43 = vadd.f32 %v533_v4, %v397_v41  ;;  %v63_v41 = vld [vmem:[%s4478_s1 + $0x140] sm:$0xff] }
 0x15b   :  { %638 = vmatpush.msra.mxu3 %v2695_v38  ;;  %v394_v38 = vadd.f32 %v393_v33, %v2649_v2  ;;  %v27_v2 = vld [vmem:[%s4478_s1 + $0x20] sm:$0xff] }
 0x15c   :  { %v59_v33 = vld [vmem:[%s4478_s1 + $0x120] sm:$0xff] }
 0x15d   :  { %639 = vmatpush.msra.mxu3 %v2692_v35  ;;  %v391_v35 = vadd.f32 %v390_v52, %v2639_v62  ;;  %v556_v11 = vadd.f32 %v530_v46, %v394_v38  ;;  %v26_v62 = vld [vmem:[%s4478_s1 + $0x18] sm:$0xff]  ;;  %v61_v46 = vld [vmem:[%s4478_s1 + $0x130] sm:$0xff] }
 0x15f   :  { %640 = vmatpush.msra.mxu3 %v2684_v29  ;;  %v555_v29 = vadd.f32 %v527_v34, %v391_v35 }
 0x160   :  { %v536_v40 = vpop.f32.mrf.mxu2 }
 0x161   :  { %v558_v42 = vadd.f32 %v536_v40, %v400_v60  ;;  %641 = vmatpush.msra.mxu3 %v2676_v21  ;;  %v28_v21 = vld [vmem:[%s4478_s1 + $0x28] sm:$0xff]  ;;  %v62_v40 = vld [vmem:[%s4478_s1 + $0x138] sm:$0xff] }
 0x162   :  { %642 = vmatmul.f32.vlgmr.msra.gmra.mxu3 %v23_v39 }
 0x163   :  { %721 = vmatpush.msrb.mxu0 %v558_v42 }
 0x165   :  { %722 = vmatpush.msrb.mxu0 %v557_v43 }
 0x167   :  { %723 = vmatpush.msrb.mxu0 %v556_v11  ;;  %v64_v11 = vld [vmem:[%s4478_s1 + $0x148] sm:$0xff] }
 0x169   :  { %724 = vmatpush.msrb.mxu0 %v555_v29 }
 0x16a   :  { %2254 = vmatmul.msk.f32.vlgmr.msrb.gmra.mxu0 %vm559_vm1, %v24_v45  ;;  %645 = vmatmul.f32.gmra.mxu3 %v25_v6  ;;  %v65_v45 = vld [vmem:[%s4478_s1 + $0x150] sm:$0x3] }
 0x172   :  { %2255 = vmatmul.msk.f32.gmra.mxu0 %vm559_vm1, %v26_v62  ;;  %648 = vmatmul.f32.gmra.mxu3 %v27_v2 }
 0x17a   :  { %2256 = vmatmul.msk.f32.gmra.mxu0 %vm559_vm1, %v28_v21  ;;  %651 = vmatmul.f32.gmra.mxu3 %v29_v47 }
 0x182   :  { %2257 = vmatmul.msk.f32.gmra.mxu0 %vm559_vm1, %v30_v49  ;;  %654 = vmatmul.f32.gmra.mxu3 %v31_v51  ;;  %v66_v49 = vld [vmem:[%s4478_s1 + $0x158] sm:$0x3]  ;;  %s2374_s1 = smov 34  }
 0x18a   :  { %2258 = vmatmul.msk.f32.gmra.mxu0 %vm559_vm1, %v32_v24  ;;  %657 = vmatmul.f32.gmra.mxu3 %v33_v53 }
 0x192   :  { %2259 = vmatmul.msk.f32.gmra.mxu0 %vm559_vm1, %v34_v55  ;;  %660 = vmatmul.f32.gmra.mxu3 %v35_v57 }
 0x19a   :  { %2260 = vmatmul.msk.f32.gmra.mxu0 %vm559_vm1, %v36_v59  ;;  %663 = vmatmul.f32.gmra.mxu3 %v37_v61 }
 0x1a2   :  { %2261 = vmatmul.msk.f32.gmra.mxu0 %vm559_vm1, %v38_v63  ;;  %666 = vmatmul.f32.gmra.mxu3 %v39_v1 }
 0x1aa   :  { %2262 = vmatmul.msk.f32.gmra.mxu0 %vm559_vm1, %v40_v3  ;;  %669 = vmatmul.f32.gmra.mxu3 %v41_v5 }
 0x1b2   :  { %2263 = vmatmul.msk.f32.gmra.mxu0 %vm559_vm1, %v42_v7  ;;  %672 = vmatmul.f32.gmra.mxu3 %v43_v8 }
 0x1ba   :  { %2264 = vmatmul.msk.f32.gmra.mxu0 %vm559_vm1, %v44_v10  ;;  %675 = vmatmul.f32.gmra.mxu3 %v45_v9 }
 0x1c2   :  { %2265 = vmatmul.msk.f32.gmra.mxu0 %vm559_vm1, %v46_v44  ;;  %678 = vmatmul.f32.gmra.mxu3 %v47_v13 }
 0x1ca   :  { %2266 = vmatmul.msk.f32.gmra.mxu0 %vm559_vm1, %v48_v14  ;;  %681 = vmatmul.f32.gmra.mxu3 %v49_v15 }
 0x1d2   :  { %2267 = vmatmul.msk.f32.gmra.mxu0 %vm559_vm1, %v50_v12  ;;  %684 = vmatmul.f32.gmra.mxu3 %v51_v48 }
 0x1da   :  { %2268 = vmatmul.msk.f32.gmra.mxu0 %vm559_vm1, %v52_v17  ;;  %687 = vmatmul.f32.gmra.mxu3 %v53_v18 }
 0x1e2   :  { %2269 = vmatmul.msk.f32.gmra.mxu0 %vm559_vm1, %v54_v20  ;;  %690 = vmatmul.f32.gmra.mxu3 %v55_v16 }
 0x1e5   :  { %v643_v52 = vpop.f32.mrf.mxu3 }
 0x1e7   :  { %v726_v23 = vpop.f32.mrf.mxu0 }
 0x1e8   :  { %v2834_v56 = vadd.f32 %v726_v23, %v643_v52 }
 0x1ea   :  { %4612 = vst [vmem:[#allocation2_spill] sm:$0xff] %v2834_v56  ;;  %836 = vrot.lane.b32.xlu0 %v2834_v56, %s2373_s9  ;;  %v2843_v27 = vmul.f32 %v2834_v56, %v2834_v56  ;;  %2270 = vmatmul.msk.f32.gmra.mxu0 %vm559_vm1, %v56_v25 }
 0x1eb   :  { %693 = vmatmul.f32.gmra.mxu3 %v57_v26 }
 0x1ec   :  { %1188 = vrot.lane.b32.xlu2 %v2843_v27, %s2373_s9  ;;  %v2850_v28 = vsub.f32 %v2834_v56, %v2843_v27 }
 0x1ed   :  { %v646_v19 = vpop.f32.mrf.mxu3 }
 0x1ee   :  { %1078 = vrot.lane.b32.xlu1 %v2850_v28, %s2373_s9 }
 0x1ef   :  { %v729_v30 = vpop.f32.mrf.mxu0 }
 0x1f0   :  { %v2857_v32 = vadd.f32 %v729_v30, %v646_v19 }
 0x1f2   :  { %4613 = vst [vmem:[#allocation3_spill] sm:$0xff] %v2857_v32  ;;  %838 = vrot.lane.b32.xlu0 %v2857_v32, %s2373_s9  ;;  %v2866_v34 = vmul.f32 %v2857_v32, %v2857_v32  ;;  %2271 = vmatmul.msk.f32.gmra.mxu0 %vm559_vm1, %v58_v31 }
 0x1f3   :  { %696 = vmatmul.f32.gmra.mxu3 %v59_v33 }
 0x1f4   :  { %v2871_v58 = vsub.f32 %v2857_v32, %v2866_v34 }
 0x1f5   :  { %v649_v36 = vpop.f32.mrf.mxu3 }
 0x1f6   :  { %1080 = vrot.lane.b32.xlu2 %v2871_v58, %s2373_s9 }
 0x1f7   :  { %v732_v54 = vpop.f32.mrf.mxu0 }
 0x1f8   :  { %v2875_v22 = vadd.f32 %v732_v54, %v649_v36 }
 0x1fa   :  { %4614 = vst [vmem:[#allocation4_spill] sm:$0xff] %v2875_v22  ;;  %1190 = vrot.lane.b32.xlu0 %v2866_v34, %s2373_s9  ;;  %840 = vrot.lane.b32.xlu1 %v2875_v22, %s2373_s9  ;;  %v2890_v37 = vmul.f32 %v2875_v22, %v2875_v22 }
 0x1fb   :  { %2272 = vmatmul.msk.f32.gmra.mxu0 %vm559_vm1, %v60_v50  ;;  %699 = vmatmul.f32.gmra.mxu3 %v61_v46 }
 0x1fc   :  { %v2898_v39 = vsub.f32 %v2875_v22, %v2890_v37 }
 0x1fd   :  { %v652_v4 = vpop.f32.mrf.mxu3 }
 0x1fe   :  { %1192 = vrot.lane.b32.xlu2 %v2890_v37, %s2373_s9 }
 0x1ff   :  { %v735_v0 = vpop.f32.mrf.mxu0 }
 0x200   :  { %v2894_v60 = vadd.f32 %v735_v0, %v652_v4 }
 0x202   :  { %4615 = vst [vmem:[#allocation5_spill] sm:$0xff] %v2894_v60  ;;  %1082 = vrot.lane.b32.xlu0 %v2898_v39, %s2373_s9  ;;  %842 = vrot.lane.b32.xlu1 %v2894_v60, %s2373_s9  ;;  %v2915_v35 = vmul.f32 %v2894_v60, %v2894_v60 }
 0x203   :  { %2273 = vmatmul.msk.f32.gmra.mxu0 %vm559_vm1, %v62_v40  ;;  %702 = vmatmul.f32.gmra.mxu3 %v63_v41 }
 0x204   :  { %v2938_v21 = vsub.f32 %v2894_v60, %v2915_v35 }
 0x205   :  { %v655_v42 = vpop.f32.mrf.mxu3 }
 0x207   :  { %v738_v38 = vpop.f32.mrf.mxu0 }
 0x208   :  { %v2911_v43 = vadd.f32 %v738_v38, %v655_v42 }
 0x20a   :  { %4616 = vst [vmem:[#allocation6_spill] sm:$0xff] %v2911_v43  ;;  %1194 = vrot.lane.b32.xlu1 %v2915_v35, %s2373_s9  ;;  %844 = vrot.lane.b32.xlu2 %v2911_v43, %s2373_s9  ;;  %v2926_v29 = vmul.f32 %v2911_v43, %v2911_v43 }
 0x20b   :  { %2274 = vmatmul.msk.f32.gmra.mxu0 %vm559_vm1, %v64_v11  ;;  %705 = vmatmul.f32.gmra.mxu3 %v65_v45 }
 0x20c   :  { %1196 = vrot.lane.b32.xlu0 %v2926_v29, %s2373_s9  ;;  %v2942_v47 = vsub.f32 %v2911_v43, %v2926_v29 }
 0x20d   :  { %v658_v6 = vpop.f32.mrf.mxu3 }
 0x20f   :  { %v741_v62 = vpop.f32.mrf.mxu0 }
 0x210   :  { %v2934_v2 = vadd.f32 %v741_v62, %v658_v6 }
 0x212   :  { %4617 = vst [vmem:[#allocation7_spill] sm:$0xff] %v2934_v2  ;;  %1084 = vrot.lane.b32.xlu1 %v2938_v21, %s2373_s9  ;;  %1086 = vrot.lane.b32.xlu2 %v2942_v47, %s2373_s9  ;;  %v2953_v51 = vmul.f32 %v2934_v2, %v2934_v2 }
 0x213   :  { %2275 = vmatmul.msk.f32.gmra.mxu0 %vm559_vm1, %v66_v49 }
 0x214   :  { %v2958_v24 = vsub.f32 %v2934_v2, %v2953_v51 }
 0x215   :  { %v661_v53 = vpop.f32.mrf.mxu3 }
 0x216   :  { %1088 = vrot.lane.b32.xlu0 %v2958_v24, %s2373_s9 }
 0x217   :  { %v744_v55 = vpop.f32.mrf.mxu0 }
 0x218   :  { %v2962_v57 = vadd.f32 %v744_v55, %v661_v53 }
 0x21a   :  { %4618 = vst [vmem:[#allocation8_spill] sm:$0xff] %v2962_v57  ;;  %846 = vrot.lane.b32.xlu2 %v2934_v2, %s2373_s9  ;;  %v2968_v59 = vmul.f32 %v2962_v57, %v2962_v57 }
 0x21c   :  { %1200 = vrot.lane.b32.xlu1 %v2968_v59, %s2373_s9  ;;  %v2980_v3 = vsub.f32 %v2962_v57, %v2968_v59 }
 0x21d   :  { %v664_v61 = vpop.f32.mrf.mxu3 }
 0x21e   :  { %848 = vrot.lane.b32.xlu0 %v2962_v57, %s2373_s9 }
 0x21f   :  { %v747_v63 = vpop.f32.mrf.mxu0 }
 0x220   :  { %v2974_v1 = vadd.f32 %v747_v63, %v664_v61 }
 0x222   :  { %1198 = vrot.lane.b32.xlu2 %v2953_v51, %s2373_s9  ;;  %v2986_v5 = vmul.f32 %v2974_v1, %v2974_v1 }
 0x224   :  { %1090 = vrot.lane.b32.xlu1 %v2980_v3, %s2373_s9  ;;  %v2994_v9 = vsub.f32 %v2974_v1, %v2986_v5 }
 0x225   :  { %v667_v7 = vpop.f32.mrf.mxu3 }
 0x226   :  { %1202 = vrot.lane.b32.xlu0 %v2986_v5, %s2373_s9 }
 0x227   :  { %v750_v8 = vpop.f32.mrf.mxu0 }
 0x228   :  { %v2990_v10 = vadd.f32 %v750_v8, %v667_v7 }
 0x22a   :  { %1092 = vrot.lane.b32.xlu2 %v2994_v9, %s2373_s9  ;;  %v3002_v44 = vmul.f32 %v2990_v10, %v2990_v10 }
 0x22c   :  { %850 = vrot.lane.b32.xlu1 %v2974_v1, %s2373_s9  ;;  %v3016_v48 = vsub.f32 %v2990_v10, %v3002_v44 }
 0x22d   :  { %v670_v13 = vpop.f32.mrf.mxu3 }
 0x22e   :  { %1204 = vrot.lane.b32.xlu0 %v3002_v44, %s2373_s9 }
 0x22f   :  { %v753_v14 = vpop.f32.mrf.mxu0 }
 0x230   :  { %v3006_v15 = vadd.f32 %v753_v14, %v670_v13 }
 0x232   :  { %852 = vrot.lane.b32.xlu2 %v2990_v10, %s2373_s9  ;;  %v3012_v12 = vmul.f32 %v3006_v15, %v3006_v15 }
 0x234   :  { %v3020_v17 = vsub.f32 %v3006_v15, %v3012_v12 }
 0x235   :  { %v673_v18 = vpop.f32.mrf.mxu3 }
 0x236   :  { %1094 = vrot.lane.b32.xlu0 %v3016_v48, %s2373_s9  ;;  %1096 = vrot.lane.b32.xlu1 %v3020_v17, %s2373_s9 }
 0x237   :  { %v756_v20 = vpop.f32.mrf.mxu0 }
 0x238   :  { %v3026_v16 = vadd.f32 %v756_v20, %v673_v18 }
 0x23a   :  { %v3030_v52 = vmul.f32 %v3026_v16, %v3026_v16 }
 0x23c   :  { %v3034_v23 = vsub.f32 %v3026_v16, %v3030_v52 }
 0x23d   :  { %v676_v25 = vpop.f32.mrf.mxu3 }
 0x23e   :  { %854 = vrot.lane.b32.xlu0 %v3006_v15, %s2373_s9  ;;  %856 = vrot.lane.b32.xlu1 %v3026_v16, %s2373_s9 }
 0x23f   :  { %1098 = vrot.lane.b32.xlu2 %v3034_v23, %s2373_s9  ;;  %v759_v26 = vpop.f32.mrf.mxu0 }
 0x240   :  { %v3042_v19 = vadd.f32 %v759_v26, %v676_v25 }
 0x242   :  { %4619 = vst [vmem:[#allocation9_spill] sm:$0xff] %v3042_v19  ;;  %v3079_v6 = vmul.f32 %v3042_v19, %v3042_v19 }
 0x244   :  { %v3102_v20 = vsub.f32 %v3042_v19, %v3079_v6 }
 0x245   :  { %v679_v30 = vpop.f32.mrf.mxu3 }
 0x246   :  { %v1189_v31 = vpop.permute.xlu2 %1188  ;;  %1206 = vrot.lane.b32.xlu0 %v3012_v12, %s2373_s9 }
 0x247   :  { %v3047_v33 = vadd.f32 %v1189_v31, %v2843_v27  ;;  %858 = vrot.lane.b32.xlu2 %v3042_v19, %s2373_s9  ;;  %v762_v36 = vpop.f32.mrf.mxu0 }
 0x248   :  { %v3051_v54 = vadd.f32 %v762_v36, %v679_v30 }
 0x249   :  { %vm1276_vm2 = vcmp.gt.f32.partialorder %v3047_v33, 1e-08  ;;  %vm1914_vm7 = vcmp.lt.f32.partialorder %v3047_v33, 1e-08 }
 0x24a   :  { %4620 = vst [vmem:[#allocation10_spill] sm:$0xff] %v3051_v54  ;;  %v1298_v50 = vsel %vm1276_vm2, %v3047_v33, 1.0  ;;  %v3059_v46 = vmul.f32 %v3051_v54, %v3051_v54 }
 0x24b   :  { %2285 = vrcp.f32 %v1298_v50 }
 0x24c   :  { %v3063_v27 = vsub.f32 %v3051_v54, %v3059_v46 }
 0x24d   :  { %v682_v4 = vpop.f32.mrf.mxu3 }
 0x24e   :  { %1208 = vrot.lane.b32.xlu0 %v3030_v52, %s2373_s9  ;;  %1102 = vrot.lane.b32.xlu1 %v3063_v27, %s2373_s9 }
 0x24f   :  { %1212 = vrot.lane.b32.xlu2 %v3059_v46, %s2373_s9  ;;  %v765_v0 = vpop.f32.mrf.mxu0 }
 0x250   :  { %v3071_v40 = vadd.f32 %v765_v0, %v682_v4  ;;  %v1081_v41 = vpop.permute.xlu2 %1080 }
 0x251   :  { %v2286_v42 = vpop.eup %2285 }
 0x252   :  { %4621 = vst [vmem:[#allocation11_spill] sm:$0xff] %v3071_v40  ;;  %v1386_v38 = vmul.f32 %v2286_v42, %v1298_v50  ;;  %v3075_v11 = vmul.f32 %v3071_v40, %v3071_v40 }
 0x254   :  { %v1408_v45 = vsub.f32 2.0, %v1386_v38  ;;  %v3083_v62 = vsub.f32 %v3071_v40, %v3075_v11 }
 0x255   :  { %v685_v53 = vpop.f32.mrf.mxu3 }
 0x256   :  { %v1430_v49 = vmul.f32 %v2286_v42, %v1408_v45  ;;  %1210 = vrot.lane.b32.xlu0 %v3079_v6, %s2373_s9  ;;  %862 = vrot.lane.b32.xlu1 %v3071_v40, %s2373_s9 }
 0x257   :  { %1104 = vrot.lane.b32.xlu2 %v3083_v62, %s2373_s9  ;;  %v768_v55 = vpop.f32.mrf.mxu0 }
 0x258   :  { %v1452_v61 = vmul.f32 %v1430_v49, %v1298_v50  ;;  %v1193_v63 = vpop.permute.xlu2 %1192  ;;  %v3095_v8 = vadd.f32 %v768_v55, %v685_v53  ;;  %v4626_v55 = vmov 0 }
 0x259   :  { %v3092_v7 = vadd.f32 %v1193_v63, %v2890_v37 }
 0x25a   :  { %v1474_v13 = vsub.f32 2.0, %v1452_v61  ;;  %v3116_v42 = vmul.f32 %v3095_v8, %v3095_v8 }
 0x25b   :  { %vm1278_vm3 = vcmp.gt.f32.partialorder %v3092_v7, 1e-08 }
 0x25c   :  { %v1300_v14 = vsel %vm1278_vm3, %v3092_v7, 1.0  ;;  %v837_v18 = vpop.permute.xlu0 %836  ;;  %v1496_v31 = vmul.f32 %v1474_v13, %v1430_v49  ;;  %v4623_v49 = vmov 0  ;;  %v4630_v13 = vmov 0 }
 0x25d   :  { %2287 = vrcp.f32 %v1300_v14  ;;  %v902_v25 = vmul.f32 %v837_v18, %v2834_v56  ;;  %v688_v37 = vpop.f32.mrf.mxu3  ;;  %v4652_v56 = vmov 0 }
 0x25e   :  { %1100 = vrot.lane.b32.xlu0 %v3102_v20, %s2373_s9  ;;  %1214 = vrot.lane.b32.xlu1 %v3075_v11, %s2373_s9 }
 0x25f   :  { %v1672_v26 = vmul.f32 2.0, %v902_v25  ;;  %864 = vrot.lane.b32.xlu2 %v3095_v8, %s2373_s9  ;;  %v771_v30 = vpop.f32.mrf.mxu0 }
 0x260   :  { %v1079_v36 = vpop.permute.xlu1 %1078  ;;  %v3138_v63 = vadd.f32 %v771_v30, %v688_v37 }
 0x261   :  { %v1144_v50 = vadd.f32 %v1079_v36, %v2850_v28  ;;  %v3112_v4 = vmul.f32 %v1672_v26, %v1496_v31  ;;  %v1145_v36 = vadd.f32 %v1081_v41, %v2871_v58  ;;  %v3158_v28 = vsub.f32 %v3095_v8, %v3116_v42 }
 0x262   :  { %4629 = vst [vmem:[#allocation15_spill] sm:$0xff] %v3138_v63 }
 0x263   :  { %4622 = vst [vmem:[#allocation12_spill] sm:$0xff] %v3112_v4  ;;  %v2288_v0 = vpop.eup %2287  ;;  %vm1320_vm4 = vcmp.gt.f32.partialorder %v1144_v50, 1e-08  ;;  %vm1848_vm5 = vcmp.lt.f32.partialorder %v1144_v50, 1e-08 }
 0x264   :  { %v1388_v38 = vmul.f32 %v2288_v0, %v1300_v14  ;;  %v839_v45 = vpop.permute.xlu0 %838  ;;  %v3118_v53 = vpop.permute.xlu2 %844  ;;  %vm3122_vm6 = vmand %vm1848_vm5, %vm1276_vm2  ;;  %4635 = vst [vmem:[#allocation19_spill] sm:$0xff] %v3158_v28  ;;  %vm1849_vm10 = vcmp.lt.f32.partialorder %v1145_v36, 1e-08  ;;  %vm1321_vm13 = vcmp.gt.f32.partialorder %v1145_v36, 1e-08 }
 0x265   :  { %v4624_v49 = vsel %vm3122_vm6, 4294967295, %v4623_v49  ;;  %vm3131_vm8 = vmand %vm1320_vm4, %vm1914_vm7  ;;  %v691_v26 = vpop.f32.mrf.mxu3  ;;  %vm1916_vm5 = vcmp.lt.f32.partialorder %v3092_v7, 1e-08 }
 0x266   :  { %4625 = vst [vmem:[#allocation13_spill] sm:$0xff] %v4624_v49  ;;  %v4627_v55 = vsel %vm3131_vm8, 4294967295, %v4626_v55  ;;  %v1410_v61 = vsub.f32 2.0, %v1388_v38  ;;  %860 = vrot.lane.b32.xlu0 %v3051_v54, %s2373_s9  ;;  %968 = vrot.lane.b32.xlu1 %v902_v25, %s2374_s1  ;;  %vm3143_vm9 = vmand %vm1320_vm4, %vm1276_vm2  ;;  %v3152_v25 = vmul.f32 %v3138_v63, %v3138_v63 }
 0x267   :  { %4628 = vst [vmem:[#allocation14_spill] sm:$0xff] %v4627_v55  ;;  %v4631_v13 = vsel %vm3143_vm9, 4294967295, %v4630_v13  ;;  %1216 = vrot.lane.b32.xlu2 %v3116_v42, %s2373_s9  ;;  %v774_v31 = vpop.f32.mrf.mxu0 }
 0x268   :  { %4632 = vst [vmem:[#allocation16_spill] sm:$0xff] %v4631_v13  ;;  %v1432_v18 = vmul.f32 %v2288_v0, %v1410_v61  ;;  %v3154_v37 = vadd.f32 %v774_v31, %v691_v26  ;;  %v3161_v0 = vsel %vm1320_vm4, %v1144_v50, 1.0  ;;  %v3164_v61 = vmul.f32 %v839_v45, %v2857_v32 }
 0x269   :  { %4633 = vst [vmem:[#allocation17_spill] sm:$0xff] %v3152_v25  ;;  %2289 = vrcp.f32 %v3161_v0  ;;  %v4637_v31 = vmov 0 }
 0x26a   :  { %v1454_v38 = vmul.f32 %v1432_v18, %v1300_v14  ;;  %4634 = vst [vmem:[#allocation18_spill] sm:$0xff] %v3154_v37 }
 0x26c   :  { %v1191_v33 = vpop.permute.xlu0 %1190  ;;  %v841_v30 = vpop.permute.xlu1 %840  ;;  %v1476_v13 = vsub.f32 2.0, %v1454_v38  ;;  %v3194_v38 = vsub.f32 %v3138_v63, %v3152_v25 }
 0x26d   :  { %v1255_v58 = vadd.f32 %v1191_v33, %v2866_v34  ;;  %v3168_v41 = vmul.f32 %v841_v30, %v2875_v22  ;;  %v1087_v14 = vpop.permute.xlu2 %1086  ;;  %v3179_v34 = vmul.f32 %v3154_v37, %v3154_v37  ;;  %v4645_v33 = vmov 0 }
 0x26e   :  { %1106 = vrot.lane.b32.xlu0 %v3158_v28, %s2373_s9  ;;  %1218 = vrot.lane.b32.xlu1 %v3152_v25, %s2373_s9  ;;  %v1498_v26 = vmul.f32 %v1476_v13, %v1432_v18  ;;  %v4640_v13 = vmov 0  ;;  %4644 = vst [vmem:[#allocation24_spill] sm:$0xff] %v3194_v38  ;;  %v3200_v30 = vsel %vm1321_vm13, %v1145_v36, 1.0  ;;  %v694_v49 = vpop.f32.mrf.mxu3  ;;  %v3244_v32 = vadd.f32 %v1087_v14, %v2942_v47 }
 0x26f   :  { %vm1277_vm11 = vcmp.gt.f32.partialorder %v1255_v58, 1e-08  ;;  %v1674_v50 = vmul.f32 2.0, %v3168_v41  ;;  %970 = vrot.lane.b32.xlu2 %v3164_v61, %s2374_s1  ;;  %4636 = vst [vmem:[#allocation20_spill] sm:$0xff] %v3179_v34  ;;  %vm1915_vm12 = vcmp.lt.f32.partialorder %v1255_v58, 1e-08 }
 0x270   :  { %v1299_v45 = vsel %vm1277_vm11, %v1255_v58, 1.0  ;;  %vm3182_vm14 = vmand %vm1849_vm10, %vm1277_vm11  ;;  %v3204_v58 = vsub.f32 %v3154_v37, %v3179_v34 }
 0x271   :  { %v4638_v31 = vsel %vm3182_vm14, 4294967295, %v4637_v31  ;;  %2291 = vrcp.f32 %v1299_v45  ;;  %vm3186_vm15 = vmand %vm1321_vm13, %vm1915_vm12  ;;  %v3190_v18 = vmul.f32 %v1674_v50, %v1498_v26  ;;  %v2290_v50 = vpop.eup %2289 }
 0x272   :  { %4639 = vst [vmem:[#allocation21_spill] sm:$0xff] %v4638_v31  ;;  %v4641_v13 = vsel %vm3186_vm15, 4294967295, %v4640_v13  ;;  %vm3196_vm0 = vmand %vm1321_vm13, %vm1277_vm11  ;;  %2293 = vrcp.f32 %v3200_v30  ;;  %v1540_v22 = vmul.f32 %v2290_v50, %v3161_v0  ;;  %vm1852_vm11 = vcmp.lt.f32.partialorder %v3244_v32, 1e-08 }
 0x273   :  { %4642 = vst [vmem:[#allocation22_spill] sm:$0xff] %v4641_v13  ;;  %v4646_v33 = vsel %vm3196_vm0, 4294967295, %v4645_v33 }
 0x274   :  { %4643 = vst [vmem:[#allocation23_spill] sm:$0xff] %v3190_v18  ;;  %v1083_v55 = vpop.permute.xlu0 %1082  ;;  %v843_v4 = vpop.permute.xlu1 %842 }
 0x275   :  { %4647 = vst [vmem:[#allocation25_spill] sm:$0xff] %v4646_v33  ;;  %v1146_v13 = vadd.f32 %v1083_v55, %v2898_v39  ;;  %v3207_v26 = vpop.permute.xlu2 %846  ;;  %v777_v39 = vpop.f32.mrf.mxu0  ;;  %v4649_v55 = vmov 0 }
 0x276   :  { %4648 = vst [vmem:[#allocation26_spill] sm:$0xff] %v3204_v58  ;;  %866 = vrot.lane.b32.xlu0 %v3138_v63, %s2373_s9  ;;  %1108 = vrot.lane.b32.xlu1 %v3194_v38, %s2373_s9  ;;  %v4655_v38 = vmov 0  ;;  %v3239_v63 = vadd.f32 %v777_v39, %v694_v49  ;;  %v905_v39 = vmul.f32 %v843_v4, %v2894_v60  ;;  %v4680_v60 = vmov 0 }
 0x277   :  { %v2292_v36 = vpop.eup %2291  ;;  %vm1322_vm1 = vcmp.gt.f32.partialorder %v1146_v13, 1e-08  ;;  %vm1850_vm2 = vcmp.lt.f32.partialorder %v1146_v13, 1e-08  ;;  %1110 = vrot.lane.b32.xlu2 %v3204_v58, %s2373_s9 }
 0x278   :  { %v1387_v33 = vmul.f32 %v2292_v36, %v1299_v45  ;;  %vm3218_vm4 = vmand %vm1850_vm2, %vm1278_vm3  ;;  %4658 = vst [vmem:[#allocation30_spill] sm:$0xff] %v3239_v63  ;;  %v3241_v25 = vpop.eup %2293  ;;  %vm4507_vm2 = vcmp.gt.f32.partialorder %v3244_v32, 1e-08 }
 0x279   :  { %v4650_v55 = vsel %vm3218_vm4, 4294967295, %v4649_v55  ;;  %vm3228_vm7 = vmand %vm1322_vm1, %vm1916_vm5  ;;  %v1541_v47 = vmul.f32 %v3241_v25, %v3200_v30 }
 0x27a   :  { %4651 = vst [vmem:[#allocation27_spill] sm:$0xff] %v4650_v55  ;;  %v4653_v56 = vsel %vm3228_vm7, 4294967295, %v4652_v56  ;;  %v1409_v58 = vsub.f32 2.0, %v1387_v33  ;;  %vm3235_vm10 = vmand %vm1322_vm1, %vm1278_vm3  ;;  %v1562_v55 = vsub.f32 2.0, %v1540_v22 }
 0x27b   :  { %4654 = vst [vmem:[#allocation28_spill] sm:$0xff] %v4653_v56  ;;  %v4656_v38 = vsel %vm3235_vm10, 4294967295, %v4655_v38 }
 0x27c   :  { %4657 = vst [vmem:[#allocation29_spill] sm:$0xff] %v4656_v38  ;;  %v1431_v28 = vmul.f32 %v2292_v36, %v1409_v58  ;;  %v1195_v18 = vpop.permute.xlu1 %1194  ;;  %v4662_v36 = vmov 0 }
 0x27d   :  { %v1257_v56 = vadd.f32 %v1195_v18, %v2915_v35  ;;  %v1199_v33 = vpop.permute.xlu2 %1198  ;;  %v3285_v18 = vmul.f32 %v3239_v63, %v3239_v63  ;;  %v780_v58 = vpop.f32.mrf.mxu0 }
 0x27e   :  { %v1453_v19 = vmul.f32 %v1431_v28, %v1299_v45  ;;  %v3248_v7 = vadd.f32 %v1199_v33, %v2953_v51  ;;  %v1197_v54 = vpop.permute.xlu0 %1196  ;;  %868 = vrot.lane.b32.xlu1 %v3154_v37, %s2373_s9  ;;  %1220 = vrot.lane.b32.xlu0 %v3179_v34, %s2373_s9  ;;  %v4659_v45 = vmov 0 }
 0x27f   :  { %vm4506_vm3 = vcmp.gt.f32.partialorder %v1257_v56, 1e-08  ;;  %v1258_v22 = vadd.f32 %v1197_v54, %v2926_v29  ;;  %870 = vrot.lane.b32.xlu2 %v3239_v63, %s2373_s9  ;;  %v1584_v29 = vmul.f32 %v2290_v50, %v1562_v55  ;;  %v1673_v54 = vmul.f32 2.0, %v3164_v61  ;;  %v697_v61 = vpop.f32.mrf.mxu3 }
 0x280   :  { %v3261_v35 = vsel %vm4506_vm3, %v1257_v56, 1.0  ;;  %vm4504_vm12 = vcmp.gt.f32.partialorder %v3248_v7, 1e-08  ;;  %v1475_v51 = vsub.f32 2.0, %v1453_v19  ;;  %v3280_v19 = vsel %vm1322_vm1, %v1146_v13, 1.0 }
 0x281   :  { %2295 = vrcp.f32 %v3261_v35  ;;  %v3268_v49 = vsel %vm4504_vm12, %v3248_v7, 1.0  ;;  %vm1280_vm13 = vcmp.gt.f32.partialorder %v1258_v22, 1e-08  ;;  %vm1918_vm1 = vcmp.lt.f32.partialorder %v1258_v22, 1e-08 }
 0x282   :  { %2297 = vrcp.f32 %v3268_v49  ;;  %v3273_v14 = vsel %vm1280_vm13, %v1258_v22, 1.0  ;;  %vm3275_vm5 = vmand %vm1852_vm11, %vm1280_vm13  ;;  %v1497_v50 = vmul.f32 %v1475_v51, %v1431_v28  ;;  %v1606_v33 = vmul.f32 %v1584_v29, %v3161_v0 }
 0x283   :  { %v4660_v45 = vsel %vm3275_vm5, 4294967295, %v4659_v45  ;;  %2299 = vrcp.f32 %v3273_v14  ;;  %vm3289_vm12 = vmand %vm4507_vm2, %vm1280_vm13  ;;  %v4666_v28 = vmov 0  ;;  %v3308_v4 = vadd.f32 %v780_v58, %v697_v61 }
 0x284   :  { %4661 = vst [vmem:[#allocation31_spill] sm:$0xff] %v4660_v45  ;;  %v4663_v36 = vsel %vm3289_vm12, 4294967295, %v4662_v36  ;;  %v1085_v55 = vpop.permute.xlu1 %1084  ;;  %v3296_v38 = vmul.f32 %v1673_v54, %v1497_v50  ;;  %vm3300_vm11 = vmand %vm4507_vm2, %vm1918_vm1  ;;  %2301 = vrcp.f32 %v3280_v19  ;;  %v1563_v22 = vsub.f32 2.0, %v1541_v47 }
 0x285   :  { %4664 = vst [vmem:[#allocation32_spill] sm:$0xff] %v4663_v36  ;;  %v1147_v13 = vadd.f32 %v1085_v55, %v2938_v21  ;;  %v4667_v28 = vsel %vm3300_vm11, 4294967295, %v4666_v28  ;;  %v3310_v0 = vpop.permute.xlu2 %1092  ;;  %vm4669_vm1 = vcmp.gt.f32.partialorder %v1257_v56, 1e-08  ;;  %vm1917_vm13 = vcmp.lt.f32.partialorder %v1257_v56, 1e-08 }
 0x286   :  { %4665 = vst [vmem:[#allocation33_spill] sm:$0xff] %v3296_v38  ;;  %974 = vrot.lane.b32.xlu1 %v905_v39, %s2374_s1  ;;  %972 = vrot.lane.b32.xlu0 %v3168_v41, %s2374_s1  ;;  %v4670_v41 = vmov 0  ;;  %v1628_v36 = vsub.f32 2.0, %v1606_v33  ;;  %v4674_v51 = vmov 0  ;;  %v3335_v31 = vmul.f32 %v3308_v4, %v3308_v4 }
 0x287   :  { %4668 = vst [vmem:[#allocation34_spill] sm:$0xff] %v4667_v28  ;;  %v2296_v21 = vpop.eup %2295  ;;  %vm1851_vm3 = vcmp.lt.f32.partialorder %v1147_v13, 1e-08  ;;  %1222 = vrot.lane.b32.xlu2 %v3285_v18, %s2373_s9  ;;  %vm4673_vm12 = vcmp.gt.f32.partialorder %v1147_v13, 1e-08  ;;  %v1585_v33 = vmul.f32 %v3241_v25, %v1563_v22  ;;  %v3348_v34 = vsub.f32 %v3239_v63, %v3285_v18  ;;  %v700_v22 = vpop.f32.mrf.mxu3 }
 0x288   :  { %v2298_v54 = vpop.eup %2297  ;;  %v1389_v50 = vmul.f32 %v2296_v21, %v3261_v35  ;;  %v1089_v55 = vpop.permute.xlu0 %1088  ;;  %vm3319_vm2 = vmand %vm1851_vm3, %vm4669_vm1  ;;  %4677 = vst [vmem:[#allocation37_spill] sm:$0xff] %v3335_v31  ;;  %v4685_v56 = vmov 0  ;;  %vm4688_vm7 = vcmp.gt.f32.partialorder %v1147_v13, 1e-08  ;;  %v1650_v25 = vmul.f32 %v1628_v36, %v1584_v29 }
 0x289   :  { %v4671_v41 = vsel %vm3319_vm2, 4294967295, %v4670_v41  ;;  %v2300_v47 = vpop.eup %2299  ;;  %v1391_v61 = vmul.f32 %v2298_v54, %v3268_v49  ;;  %v3325_v58 = vadd.f32 %v1089_v55, %v2958_v24  ;;  %vm3328_vm11 = vmand %vm4673_vm12, %vm1917_vm13  ;;  %4683 = vst [vmem:[#allocation39_spill] sm:$0xff] %v3348_v34  ;;  %vm4684_vm13 = vcmp.gt.f32.partialorder %v3248_v7, 1e-08 }
 0x28a   :  { %4672 = vst [vmem:[#allocation35_spill] sm:$0xff] %v4671_v41  ;;  %v4675_v51 = vsel %vm3328_vm11, 4294967295, %v4674_v51  ;;  %v1411_v28 = vsub.f32 2.0, %v1389_v50  ;;  %v1390_v38 = vmul.f32 %v2300_v47, %v3273_v14  ;;  %vm4678_vm3 = vmmov %vm4669_vm1  ;;  %v2302_v50 = vpop.eup %2301  ;;  %v4695_v29 = vmov 0 }
 0x28b   :  { %4676 = vst [vmem:[#allocation36_spill] sm:$0xff] %v4675_v51  ;;  %vm4679_vm1 = vmmov %vm4673_vm12  ;;  %v1413_v24 = vsub.f32 2.0, %v1391_v61  ;;  %vm1853_vm12 = vcmp.lt.f32.partialorder %v3325_v58, 1e-08  ;;  %vm4689_vm4 = vcmp.gt.f32.partialorder %v3325_v58, 1e-08  ;;  %v1542_v36 = vmul.f32 %v2302_v50, %v3280_v19 }
 0x28c   :  { %vm3339_vm10 = vmand %vm4679_vm1, %vm4678_vm3  ;;  %v1433_v55 = vmul.f32 %v2296_v21, %v1411_v28  ;;  %v1412_v51 = vsub.f32 2.0, %v1390_v38  ;;  %vm1919_vm1 = vcmp.lt.f32.partialorder %v3248_v7, 1e-08  ;;  %v4690_v38 = vmov 0 }
 0x28d   :  { %v4681_v60 = vsel %vm3339_vm10, 4294967295, %v4680_v60  ;;  %vm3352_vm3 = vmand %vm1853_vm12, %vm4684_vm13  ;;  %v1435_v61 = vmul.f32 %v2298_v54, %v1413_v24  ;;  %v3385_v54 = vmul.f32 %v3207_v26, %v2934_v2 }
 0x28e   :  { %4682 = vst [vmem:[#allocation38_spill] sm:$0xff] %v4681_v60  ;;  %v4686_v56 = vsel %vm3352_vm3, 4294967295, %v4685_v56  ;;  %v3358_v60 = vsel %vm4688_vm7, %v1147_v13, 1.0  ;;  %vm3362_vm0 = vmand %vm4689_vm4, %vm1919_vm1  ;;  %v1455_v28 = vmul.f32 %v1433_v55, %v3261_v35  ;;  %v1434_v21 = vmul.f32 %v2300_v47, %v1412_v51  ;;  %v1201_v63 = vpop.permute.xlu1 %1200  ;;  %1112 = vrot.lane.b32.xlu0 %v3348_v34, %s2373_s9  ;;  %1224 = vrot.lane.b32.xlu1 %v3335_v31, %s2373_s9  ;;  %v783_v13 = vpop.f32.mrf.mxu0 }
 0x28f   :  { %4687 = vst [vmem:[#allocation40_spill] sm:$0xff] %v4686_v56  ;;  %v4691_v38 = vsel %vm3362_vm0, 4294967295, %v4690_v38  ;;  %vm4693_vm7 = vmmov %vm4684_vm13  ;;  %v1457_v35 = vmul.f32 %v1435_v61, %v3268_v49  ;;  %v1260_v51 = vadd.f32 %v1201_v63, %v2968_v59  ;;  %1760 = vrot.lane.b32.xlu2 %v1650_v25, %s2374_s1  ;;  %2303 = vrcp.f32 %v3358_v60 }
 0x290   :  { %4692 = vst [vmem:[#allocation41_spill] sm:$0xff] %v4691_v38  ;;  %vm4694_vm12 = vmmov %vm4689_vm4  ;;  %v3388_v7 = vpop.permute.xlu0 %848  ;;  %v1607_v47 = vmul.f32 %v1585_v33, %v3200_v30  ;;  %v1477_v24 = vsub.f32 2.0, %v1455_v28  ;;  %v3391_v38 = vpop.permute.xlu2 %852  ;;  %v3395_v59 = vsub.f32 %v3308_v4, %v3335_v31  ;;  %v3397_v63 = vadd.f32 %v783_v13, %v700_v22 }
 0x291   :  { %vm3375_vm13 = vmand %vm4694_vm12, %vm4693_vm7  ;;  %vm4529_vm4 = vcmp.gt.f32.partialorder %v1260_v51, 1e-08  ;;  %v1456_v26 = vmul.f32 %v1434_v21, %v3273_v14  ;;  %v1479_v2 = vsub.f32 2.0, %v1457_v35  ;;  %v1564_v34 = vsub.f32 2.0, %v1542_v36 }
 0x292   :  { %v4696_v29 = vsel %vm3375_vm13, 4294967295, %v4695_v29  ;;  %v3401_v49 = vsel %vm4529_vm4, %v1260_v51, 1.0  ;;  %v1499_v25 = vmul.f32 %v1477_v24, %v1433_v55  ;;  %v906_v30 = vmul.f32 %v3118_v53, %v2911_v43 }
 0x293   :  { %4697 = vst [vmem:[#allocation42_spill] sm:$0xff] %v4696_v29  ;;  %v1675_v29 = vmul.f32 2.0, %v905_v39  ;;  %2305 = vrcp.f32 %v3401_v49  ;;  %v1629_v39 = vsub.f32 2.0, %v1607_v47  ;;  %v1677_v31 = vmul.f32 2.0, %v3385_v54 }
 0x294   :  { %v1501_v22 = vmul.f32 %v1479_v2, %v1435_v61  ;;  %v3415_v14 = vmul.f32 %v3397_v63, %v3397_v63  ;;  %v1478_v55 = vsub.f32 2.0, %v1456_v26  ;;  %v3422_v2 = vadd.f32 %v3310_v0, %v2994_v9 }
 0x295   :  { %v3406_v28 = vmul.f32 %v1675_v29, %v1499_v25  ;;  %v2304_v13 = vpop.eup %2303  ;;  %v1586_v29 = vmul.f32 %v2302_v50, %v1564_v34  ;;  %v1676_v35 = vmul.f32 2.0, %v906_v30  ;;  %v1651_v24 = vmul.f32 %v1629_v39, %v1585_v33 }
 0x296   :  { %v1091_v37 = vpop.permute.xlu1 %1090  ;;  %872 = vrot.lane.b32.xlu0 %v3308_v4, %s2373_s9  ;;  %1114 = vrot.lane.b32.xlu1 %v3395_v59, %s2373_s9  ;;  %v3426_v36 = vmul.f32 %v1677_v31, %v1501_v22  ;;  %v1543_v43 = vmul.f32 %v2304_v13, %v3358_v60  ;;  %vm4700_vm12 = vcmp.gt.f32.partialorder %v3244_v32, 1e-08  ;;  %vm1920_vm0 = vcmp.lt.f32.partialorder %v1260_v51, 1e-08 }
 0x297   :  { %4698 = vst [vmem:[#allocation43_spill] sm:$0xff] %v3406_v28  ;;  %v1150_v61 = vadd.f32 %v1091_v37, %v2980_v3  ;;  %976 = vrot.lane.b32.xlu2 %v906_v30, %s2374_s1  ;;  %v3435_v3 = vsel %vm4700_vm12, %v3244_v32, 1.0  ;;  %v4701_v37 = vmov 0  ;;  %v1500_v34 = vmul.f32 %v1478_v55, %v1434_v21  ;;  %v703_v55 = vpop.f32.mrf.mxu3 }
 0x298   :  { %4699 = vst [vmem:[#allocation44_spill] sm:$0xff] %v3426_v36  ;;  %v1203_v47 = vpop.permute.xlu0 %1202  ;;  %v1608_v31 = vmul.f32 %v1586_v29, %v3280_v19  ;;  %v4705_v32 = vmov 0  ;;  %vm4709_vm1 = vcmp.gt.f32.partialorder %v1260_v51, 1e-08  ;;  %v4711_v21 = vmov 0 }
 0x299   :  { %v2306_v25 = vpop.eup %2305  ;;  %vm1854_vm7 = vcmp.lt.f32.partialorder %v1150_v61, 1e-08  ;;  %v1261_v26 = vadd.f32 %v1203_v47, %v2986_v5  ;;  %v3430_v53 = vpop.permute.xlu2 %1098  ;;  %v3446_v5 = vsub.f32 %v3397_v63, %v3415_v14  ;;  %vm4704_vm12 = vcmp.gt.f32.partialorder %v1150_v61, 1e-08 }
 0x29a   :  { %v1392_v9 = vmul.f32 %v2306_v25, %v3401_v49  ;;  %vm3439_vm13 = vmand %vm1854_vm7, %vm4529_vm4  ;;  %vm1855_vm7 = vcmp.lt.f32.partialorder %v3422_v2, 1e-08  ;;  %vm4708_vm4 = vcmp.gt.f32.partialorder %v3325_v58, 1e-08  ;;  %v1565_v19 = vsub.f32 2.0, %v1543_v43 }
 0x29b   :  { %v4702_v37 = vsel %vm3439_vm13, 4294967295, %v4701_v37  ;;  %vm1283_vm15 = vcmp.gt.f32.partialorder %v1261_v26, 1e-08  ;;  %vm3450_vm14 = vmand %vm4704_vm12, %vm1920_vm0  ;;  %v3458_v0 = vsel %vm4708_vm4, %v3325_v58, 1.0  ;;  %v4715_v58 = vmov 0 }
 0x29c   :  { %4703 = vst [vmem:[#allocation45_spill] sm:$0xff] %v4702_v37  ;;  %v4706_v32 = vsel %vm3450_vm14, 4294967295, %v4705_v32  ;;  %v1414_v33 = vsub.f32 2.0, %v1392_v9  ;;  %v1305_v50 = vsel %vm1283_vm15, %v1261_v26, 1.0  ;;  %vm4710_vm10 = vmmov %vm4704_vm12  ;;  %v3482_v43 = vmul.f32 %v1676_v35, %v1500_v34 }
 0x29d   :  { %4707 = vst [vmem:[#allocation46_spill] sm:$0xff] %v4706_v32  ;;  %vm3463_vm11 = vmand %vm4710_vm10, %vm4709_vm1  ;;  %2307 = vrcp.f32 %v1305_v50  ;;  %vm4719_vm1 = vcmp.gt.f32.partialorder %v3422_v2, 1e-08  ;;  %v4720_v22 = vmov 0  ;;  %v4724_v35 = vmov 0 }
 0x29e   :  { %v4712_v21 = vsel %vm3463_vm11, 4294967295, %v4711_v21  ;;  %vm4714_vm0 = vmmov %vm4710_vm10  ;;  %2309 = vrcp.f32 %v3435_v3  ;;  %v1436_v51 = vmul.f32 %v2306_v25, %v1414_v33  ;;  %1762 = vrot.lane.b32.xlu0 %v1651_v24, %s2374_s1  ;;  %874 = vrot.lane.b32.xlu1 %v3397_v63, %s2373_s9  ;;  %4718 = vst [vmem:[#allocation49_spill] sm:$0xff] %v3482_v43  ;;  %vm1921_vm10 = vcmp.lt.f32.partialorder %v1261_v26, 1e-08  ;;  %v851_v32 = vpop.permute.xlu1 %850 }
 0x29f   :  { %4713 = vst [vmem:[#allocation47_spill] sm:$0xff] %v4712_v21  ;;  %v3468_v30 = vsel %vm4714_vm0, %v1150_v61, 1.0  ;;  %vm3474_vm4 = vmand %vm1855_vm7, %vm1283_vm15  ;;  %2311 = vrcp.f32 %v3458_v0  ;;  %1116 = vrot.lane.b32.xlu2 %v3446_v5, %s2373_s9  ;;  %v786_v61 = vpop.f32.mrf.mxu0  ;;  %v1630_v25 = vsub.f32 2.0, %v1608_v31  ;;  %v908_v9 = vmul.f32 %v3388_v7, %v2962_v57 }
 0x2a0   :  { %v4716_v58 = vsel %vm3474_vm4, 4294967295, %v4715_v58  ;;  %vm3487_vm12 = vmand %vm4719_vm1, %vm1283_vm15  ;;  %v1458_v47 = vmul.f32 %v1436_v51, %v3401_v49  ;;  %2313 = vrcp.f32 %v3468_v30  ;;  %v1205_v24 = vpop.permute.xlu0 %1204  ;;  %v1587_v39 = vmul.f32 %v2304_v13, %v1565_v19 }
 0x2a1   :  { %4717 = vst [vmem:[#allocation48_spill] sm:$0xff] %v4716_v58  ;;  %v4721_v22 = vsel %vm3487_vm12, 4294967295, %v4720_v22  ;;  %vm4723_vm7 = vmmov %vm4719_vm1  ;;  %v1262_v34 = vadd.f32 %v1205_v24, %v3002_v44  ;;  %v3508_v33 = vpop.permute.xlu2 %858  ;;  %v3510_v49 = vadd.f32 %v786_v61, %v703_v55  ;;  %v1652_v21 = vmul.f32 %v1630_v25, %v1586_v29  ;;  %v706_v29 = vpop.f32.mrf.mxu3 }
 0x2a2   :  { %4722 = vst [vmem:[#allocation50_spill] sm:$0xff] %v4721_v22  ;;  %vm3496_vm0 = vmand %vm4723_vm7, %vm1921_vm10  ;;  %v1480_v22 = vsub.f32 2.0, %v1458_v47  ;;  %v1678_v26 = vmul.f32 2.0, %v908_v9  ;;  %v1609_v7 = vmul.f32 %v1587_v39, %v3358_v60 }
 0x2a3   :  { %v4725_v35 = vsel %vm3496_vm0, 4294967295, %v4724_v35  ;;  %vm1284_vm15 = vcmp.gt.f32.partialorder %v1262_v34, 1e-08  ;;  %vm1922_vm12 = vcmp.lt.f32.partialorder %v1262_v34, 1e-08 }
 0x2a4   :  { %4726 = vst [vmem:[#allocation51_spill] sm:$0xff] %v4725_v35  ;;  %v2308_v35 = vpop.eup %2307  ;;  %v1306_v31 = vsel %vm1284_vm15, %v1262_v34, 1.0  ;;  %v1502_v43 = vmul.f32 %v1480_v22, %v1436_v51  ;;  %v1631_v47 = vsub.f32 2.0, %v1609_v7  ;;  %vm4731_vm0 = vcmp.gt.f32.partialorder %v3422_v2, 1e-08 }
 0x2a5   :  { %v2310_v36 = vpop.eup %2309  ;;  %v1393_v56 = vmul.f32 %v2308_v35, %v1305_v50  ;;  %2315 = vrcp.f32 %v1306_v31  ;;  %v3541_v7 = vsel %vm4731_vm0, %v3422_v2, 1.0 }
 0x2a6   :  { %v2312_v45 = vpop.eup %2311  ;;  %1764 = vrot.lane.b32.xlu1 %v1652_v21, %s2374_s1  ;;  %1226 = vrot.lane.b32.xlu0 %v3415_v14, %s2373_s9  ;;  %v1544_v13 = vmul.f32 %v2310_v36, %v3435_v3  ;;  %v3520_v55 = vmul.f32 %v1678_v26, %v1502_v43 }
 0x2a7   :  { %v2314_v44 = vpop.eup %2313  ;;  %v1415_v24 = vsub.f32 2.0, %v1393_v56  ;;  %876 = vrot.lane.b32.xlu2 %v3510_v49, %s2373_s9  ;;  %v789_v19 = vpop.f32.mrf.mxu0  ;;  %v1545_v60 = vmul.f32 %v2312_v45, %v3458_v0 }
 0x2a8   :  { %4727 = vst [vmem:[#allocation52_spill] sm:$0xff] %v3520_v55  ;;  %v1095_v22 = vpop.permute.xlu0 %1094  ;;  %v1546_v56 = vmul.f32 %v2314_v44, %v3468_v30  ;;  %v3528_v28 = vadd.f32 %v789_v19, %v706_v29  ;;  %v1566_v57 = vsub.f32 2.0, %v1544_v13  ;;  %v1653_v29 = vmul.f32 %v1631_v47, %v1587_v39 }
 0x2a9   :  { %v1437_v51 = vmul.f32 %v2308_v35, %v1415_v24  ;;  %v1152_v21 = vadd.f32 %v1095_v22, %v3016_v48  ;;  %v1213_v61 = vpop.permute.xlu2 %1212  ;;  %v1567_v26 = vsub.f32 2.0, %v1545_v60  ;;  %v4728_v48 = vmov 0  ;;  %v1097_v22 = vpop.permute.xlu1 %1096 }
 0x2aa   :  { %v1568_v13 = vsub.f32 2.0, %v1546_v56  ;;  %v4732_v19 = vmov 0  ;;  %v3554_v2 = vmul.f32 %v3528_v28, %v3528_v28  ;;  %v3573_v25 = vmul.f32 %v2310_v36, %v1566_v57 }
 0x2ab   :  { %v2316_v41 = vpop.eup %2315  ;;  %v1459_v43 = vmul.f32 %v1437_v51, %v1305_v50  ;;  %vm1328_vm10 = vcmp.gt.f32.partialorder %v1152_v21, 1e-08  ;;  %vm1856_vm1 = vcmp.lt.f32.partialorder %v1152_v21, 1e-08  ;;  %v909_v50 = vmul.f32 %v851_v32, %v2974_v1 }
 0x2ac   :  { %v1394_v35 = vmul.f32 %v2316_v41, %v1306_v31  ;;  %v3531_v24 = vsel %vm1328_vm10, %v1152_v21, 1.0  ;;  %vm3534_vm7 = vmand %vm1856_vm1, %vm1284_vm15  ;;  %v4735_v32 = vmov 0  ;;  %v1589_v34 = vmul.f32 %v2312_v45, %v1567_v26 }
 0x2ad   :  { %v4729_v48 = vsel %vm3534_vm7, 4294967295, %v4728_v48  ;;  %vm3545_vm5 = vmand %vm1328_vm10, %vm1922_vm12  ;;  %2317 = vrcp.f32 %v3531_v24  ;;  %v1481_v39 = vsub.f32 2.0, %v1459_v43  ;;  %v1679_v21 = vmul.f32 2.0, %v909_v50 }
 0x2ae   :  { %4730 = vst [vmem:[#allocation53_spill] sm:$0xff] %v4729_v48  ;;  %v4733_v19 = vsel %vm3545_vm5, 4294967295, %v4732_v19  ;;  %v1416_v60 = vsub.f32 2.0, %v1394_v35  ;;  %980 = vrot.lane.b32.xlu1 %v908_v9, %s2374_s1  ;;  %978 = vrot.lane.b32.xlu0 %v3385_v54, %s2374_s1  ;;  %vm3558_vm0 = vmand %vm1328_vm10, %vm1284_vm15  ;;  %2319 = vrcp.f32 %v3541_v7  ;;  %v3569_v54 = vmul.f32 %v3510_v49, %v3510_v49 }
 0x2af   :  { %4734 = vst [vmem:[#allocation54_spill] sm:$0xff] %v4733_v19  ;;  %v4736_v32 = vsel %vm3558_vm0, 4294967295, %v4735_v32  ;;  %1766 = vrot.lane.b32.xlu2 %v1653_v29, %s2374_s1  ;;  %v1590_v35 = vmul.f32 %v2314_v44, %v1568_v13  ;;  %v3577_v43 = vmul.f32 %v3391_v38, %v2990_v10  ;;  %v3588_v45 = vadd.f32 %v3430_v53, %v3034_v23 }
 0x2b0   :  { %4737 = vst [vmem:[#allocation55_spill] sm:$0xff] %v4736_v32  ;;  %v1438_v9 = vmul.f32 %v2316_v41, %v1416_v60  ;;  %v3565_v56 = vpop.permute.xlu0 %854  ;;  %v1503_v32 = vmul.f32 %v1481_v39, %v1437_v51  ;;  %v3580_v41 = vadd.f32 %v1213_v61, %v3059_v46  ;;  %v3584_v60 = vsub.f32 %v3528_v28, %v3554_v2 }
 0x2b1   :  { %v3571_v47 = vpop.permute.xlu2 %1104  ;;  %v3594_v57 = vsub.f32 %v3510_v49, %v3569_v54  ;;  %v1611_v38 = vmul.f32 %v1589_v34, %v3458_v0  ;;  %v1612_v46 = vmul.f32 %v1590_v35, %v3468_v30  ;;  %v1610_v51 = vmul.f32 %v3573_v25, %v3435_v3  ;;  %v857_v30 = vpop.permute.xlu1 %856 }
 0x2b2   :  { %v1460_v29 = vmul.f32 %v1438_v9, %v1306_v31  ;;  %v3590_v44 = vmul.f32 %v1679_v21, %v1503_v32  ;;  %v1680_v61 = vmul.f32 2.0, %v3577_v43  ;;  %v1153_v26 = vadd.f32 %v1097_v22, %v3020_v17 }
 0x2b3   :  { %v2318_v31 = vpop.eup %2317  ;;  %vm4547_vm12 = vcmp.gt.f32.partialorder %v3580_v41, 1e-08  ;;  %vm4548_vm15 = vcmp.gt.f32.partialorder %v3588_v45, 1e-08  ;;  %v1633_v32 = vsub.f32 2.0, %v1611_v38  ;;  %v1632_v38 = vsub.f32 2.0, %v1610_v51 }
 0x2b4   :  { %4738 = vst [vmem:[#allocation56_spill] sm:$0xff] %v3590_v44  ;;  %v1482_v36 = vsub.f32 2.0, %v1460_v29  ;;  %v2320_v53 = vpop.eup %2319  ;;  %v1548_v3 = vmul.f32 %v2318_v31, %v3531_v24  ;;  %v3619_v22 = vsel %vm4547_vm12, %v3580_v41, 1.0  ;;  %v1634_v29 = vsub.f32 2.0, %v1612_v46 }
 0x2b5   :  { %v1547_v17 = vmul.f32 %v2320_v53, %v3541_v7  ;;  %vm1329_vm10 = vcmp.gt.f32.partialorder %v1153_v26, 1e-08  ;;  %vm1857_vm1 = vcmp.lt.f32.partialorder %v1153_v26, 1e-08  ;;  %2321 = vrcp.f32 %v3619_v22 }
 0x2b6   :  { %1118 = vrot.lane.b32.xlu0 %v3594_v57, %s2373_s9  ;;  %1120 = vrot.lane.b32.xlu1 %v3584_v60, %s2373_s9  ;;  %v1504_v0 = vmul.f32 %v1482_v36, %v1438_v9  ;;  %v1655_v46 = vmul.f32 %v1633_v32, %v1589_v34  ;;  %v1656_v23 = vmul.f32 %v1634_v29, %v1590_v35  ;;  %v4746_v34 = vmov 0 }
 0x2b7   :  { %982 = vrot.lane.b32.xlu2 %v909_v50, %s2374_s1  ;;  %v3627_v50 = vsel %vm4548_vm15, %v3588_v45, 1.0  ;;  %v1569_v51 = vsub.f32 2.0, %v1547_v17  ;;  %v911_v58 = vmul.f32 %v3565_v56, %v3006_v15 }
 0x2b8   :  { %v1207_v13 = vpop.permute.xlu0 %1206  ;;  %v3613_v39 = vmul.f32 %v1680_v61, %v1504_v0  ;;  %v1570_v61 = vsub.f32 2.0, %v1548_v3  ;;  %v4740_v0 = vmov 0  ;;  %v4743_v3 = vmov 0 }
 0x2b9   :  { %v1263_v9 = vadd.f32 %v1207_v13, %v3012_v12  ;;  %v3622_v21 = vpop.permute.xlu2 %864  ;;  %v3642_v13 = vsel %vm1329_vm10, %v1153_v26, 1.0  ;;  %v3667_v26 = vmul.f32 %v2320_v53, %v1569_v51  ;;  %v1681_v55 = vmul.f32 2.0, %v911_v58 }
 0x2ba   :  { %4739 = vst [vmem:[#allocation57_spill] sm:$0xff] %v3613_v39  ;;  %v1592_v17 = vmul.f32 %v2318_v31, %v1570_v61 }
 0x2bb   :  { %vm1285_vm4 = vcmp.gt.f32.partialorder %v1263_v9, 1e-08  ;;  %vm1923_vm12 = vcmp.lt.f32.partialorder %v1263_v9, 1e-08  ;;  %v1613_v51 = vmul.f32 %v3667_v26, %v3541_v7 }
 0x2bc   :  { %v3634_v12 = vsel %vm1285_vm4, %v1263_v9, 1.0  ;;  %vm3637_vm0 = vmand %vm1857_vm1, %vm1285_vm4  ;;  %v1654_v9 = vmul.f32 %v1632_v38, %v3573_v25  ;;  %v4757_v38 = vmov 0 }
 0x2bd   :  { %v4741_v0 = vsel %vm3637_vm0, 4294967295, %v4740_v0  ;;  %2323 = vrcp.f32 %v3634_v12  ;;  %vm3646_vm15 = vmand %vm1329_vm10, %vm1923_vm12 }
 0x2be   :  { %4742 = vst [vmem:[#allocation58_spill] sm:$0xff] %v4741_v0  ;;  %v4744_v3 = vsel %vm3646_vm15, 4294967295, %v4743_v3  ;;  %2325 = vrcp.f32 %v3627_v50  ;;  %878 = vrot.lane.b32.xlu0 %v3528_v28, %s2373_s9  ;;  %1770 = vrot.lane.b32.xlu1 %v1655_v46, %s2374_s1  ;;  %vm3656_vm1 = vmand %vm1329_vm10, %vm1285_vm4  ;;  %v2322_v46 = vpop.eup %2321  ;;  %vm4749_vm4 = vcmp.gt.f32.partialorder %v3580_v41, 1e-08 }
 0x2bf   :  { %4745 = vst [vmem:[#allocation59_spill] sm:$0xff] %v4744_v3  ;;  %v4747_v34 = vsel %vm3656_vm1, 4294967295, %v4746_v34  ;;  %1772 = vrot.lane.b32.xlu2 %v1656_v23, %s2374_s1  ;;  %2327 = vrcp.f32 %v3642_v13  ;;  %v3672_v23 = vmul.f32 %v857_v30, %v3026_v16 }
 0x2c0   :  { %4748 = vst [vmem:[#allocation60_spill] sm:$0xff] %v4747_v34  ;;  %v1209_v35 = vpop.permute.xlu0 %1208  ;;  %v1103_v32 = vpop.permute.xlu1 %1102 }
 0x2c1   :  { %v1264_v29 = vadd.f32 %v1209_v35, %v3030_v52  ;;  %v3664_v36 = vadd.f32 %v1103_v32, %v3063_v27  ;;  %v1217_v44 = vpop.permute.xlu2 %1216  ;;  %v3680_v27 = vadd.f32 %v3571_v47, %v3083_v62  ;;  %v1398_v47 = vmul.f32 %v2322_v46, %v3619_v22 }
 0x2c2   :  { %v3675_v19 = vadd.f32 %v1217_v44, %v3116_v42  ;;  %v1614_v42 = vmul.f32 %v1592_v17, %v3531_v24  ;;  %v4753_v24 = vmov 0  ;;  %v4761_v35 = vmov 0 }
 0x2c3   :  { %v2324_v52 = vpop.eup %2323  ;;  %vm4554_vm12 = vcmp.gt.f32.partialorder %v1264_v29, 1e-08  ;;  %vm4557_vm10 = vcmp.gt.f32.partialorder %v3664_v36, 1e-08  ;;  %vm1860_vm5 = vcmp.lt.f32.partialorder %v3664_v36, 1e-08 }
 0x2c4   :  { %v2326_v25 = vpop.eup %2325  ;;  %v1395_v56 = vmul.f32 %v2324_v52, %v3634_v12  ;;  %v3686_v31 = vsel %vm4554_vm12, %v1264_v29, 1.0  ;;  %vm4555_vm7 = vcmp.gt.f32.partialorder %v3675_v19, 1e-08  ;;  %vm3692_vm1 = vmand %vm1860_vm5, %vm4749_vm4  ;;  %vm4752_vm12 = vcmp.lt.f32.partialorder %v3580_v41, 1e-08 }
 0x2c5   :  { %2329 = vrcp.f32 %v3686_v31  ;;  %v3701_v44 = vsel %vm4555_vm7, %v3675_v19, 1.0  ;;  %vm3707_vm15 = vmand %vm4557_vm10, %vm4752_vm12  ;;  %v2328_v53 = vpop.eup %2327  ;;  %vm1858_vm4 = vcmp.lt.f32.partialorder %v3588_v45, 1e-08  ;;  %vm4756_vm7 = vcmp.gt.f32.partialorder %v3580_v41, 1e-08 }
 0x2c6   :  { %v4754_v24 = vsel %vm3707_vm15, 4294967295, %v4753_v24  ;;  %v1417_v30 = vsub.f32 2.0, %v1395_v56  ;;  %1768 = vrot.lane.b32.xlu0 %v1654_v9, %s2374_s1  ;;  %986 = vrot.lane.b32.xlu1 %v911_v58, %s2374_s1  ;;  %vm3718_vm3 = vmand %vm4557_vm10, %vm4756_vm7  ;;  %v1550_v61 = vmul.f32 %v2326_v25, %v3627_v50  ;;  %2331 = vrcp.f32 %v3701_v44 }
 0x2c7   :  { %4755 = vst [vmem:[#allocation61_spill] sm:$0xff] %v4754_v24  ;;  %v4758_v38 = vsel %vm3718_vm3, 4294967295, %v4757_v38  ;;  %988 = vrot.lane.b32.xlu2 %v3672_v23, %s2374_s1  ;;  %vm4760_vm12 = vcmp.gt.f32.partialorder %v1264_v29, 1e-08  ;;  %v1636_v56 = vsub.f32 2.0, %v1614_v42  ;;  %v1549_v7 = vmul.f32 %v2328_v53, %v3642_v13 }
 0x2c8   :  { %4759 = vst [vmem:[#allocation62_spill] sm:$0xff] %v4758_v38  ;;  %vm3729_vm5 = vmand %vm1858_vm4, %vm4760_vm12  ;;  %v1439_v41 = vmul.f32 %v2324_v52, %v1417_v30  ;;  %v1211_v32 = vpop.permute.xlu0 %1210  ;;  %v863_v9 = vpop.permute.xlu1 %862  ;;  %vm4764_vm10 = vcmp.lt.f32.partialorder %v1264_v29, 1e-08  ;;  %vm4765_vm3 = vcmp.gt.f32.partialorder %v3588_v45, 1e-08  ;;  %v4766_v38 = vmov 0 }
 0x2c9   :  { %v4762_v35 = vsel %vm3729_vm5, 4294967295, %v4761_v35  ;;  %vm3737_vm15 = vmand %vm4765_vm3, %vm4764_vm10  ;;  %v1420_v24 = vsub.f32 2.0, %v1398_v47  ;;  %v3743_v39 = vadd.f32 %v1211_v32, %v3079_v6  ;;  %v3745_v48 = vpop.permute.xlu2 %970  ;;  %v4771_v52 = vmov 0 }
 0x2ca   :  { %4763 = vst [vmem:[#allocation63_spill] sm:$0xff] %v4762_v35  ;;  %v4767_v38 = vsel %vm3737_vm15, 4294967295, %v4766_v38  ;;  %vm4769_vm4 = vmmov %vm4760_vm12  ;;  %v1461_v42 = vmul.f32 %v1439_v41, %v3634_v12  ;;  %v1572_v34 = vsub.f32 2.0, %v1550_v61  ;;  %v1635_v6 = vsub.f32 2.0, %v1613_v51 }
 0x2cb   :  { %4768 = vst [vmem:[#allocation64_spill] sm:$0xff] %v4767_v38  ;;  %vm4770_vm12 = vmmov %vm4765_vm3  ;;  %v2330_v30 = vpop.eup %2329  ;;  %vm4774_vm3 = vcmp.gt.f32.partialorder %v3680_v27, 1e-08  ;;  %vm4570_vm10 = vcmp.gt.f32.partialorder %v3743_v39, 1e-08  ;;  %v1658_v32 = vmul.f32 %v1636_v56, %v1592_v17  ;;  %v1571_v38 = vsub.f32 2.0, %v1549_v7 }
 0x2cc   :  { %vm3750_vm7 = vmand %vm4770_vm12, %vm4769_vm4  ;;  %v3758_v47 = vsel %vm4774_vm3, %v3680_v27, 1.0  ;;  %v1396_v29 = vmul.f32 %v2330_v30, %v3686_v31  ;;  %v3765_v45 = vsel %vm4570_vm10, %v3743_v39, 1.0  ;;  %v2332_v12 = vpop.eup %2331  ;;  %v3767_v61 = vmul.f32 %v2322_v46, %v1420_v24 }
 0x2cd   :  { %v4772_v52 = vsel %vm3750_vm7, 4294967295, %v4771_v52  ;;  %2333 = vrcp.f32 %v3765_v45  ;;  %v3771_v3 = vmul.f32 %v863_v9, %v3071_v40  ;;  %v1400_v37 = vmul.f32 %v2332_v12, %v3701_v44  ;;  %v4804_v40 = vld [vmem:[#allocation19_spill] sm:$0xff] }
 0x2ce   :  { %4773 = vst [vmem:[#allocation65_spill] sm:$0xff] %v4772_v52  ;;  %v1483_v52 = vsub.f32 2.0, %v1461_v42  ;;  %v1418_v51 = vsub.f32 2.0, %v1396_v29  ;;  %984 = vrot.lane.b32.xlu0 %v3577_v43, %s2374_s1  ;;  %1776 = vrot.lane.b32.xlu1 %v1658_v32, %s2374_s1  ;;  %2335 = vrcp.f32 %v3758_v47  ;;  %v1657_v46 = vmul.f32 %v1635_v6, %v3667_v26 }
 0x2cf   :  { %994 = vrot.lane.b32.xlu2 %v3771_v3, %s2374_s1  ;;  %v3781_v24 = vmul.f32 %v2326_v25, %v1572_v34  ;;  %vm4775_vm4 = vcmp.gt.f32.partialorder %v3664_v36, 1e-08  ;;  %v1422_v56 = vsub.f32 2.0, %v1400_v37  ;;  %v3796_v25 = vmul.f32 %v2328_v53, %v1571_v38 }
 0x2d0   :  { %v1505_v17 = vmul.f32 %v1483_v52, %v1439_v41  ;;  %v1440_v9 = vmul.f32 %v2330_v30, %v1418_v51  ;;  %v3786_v58 = vsel %vm4775_vm4, %v3664_v36, 1.0  ;;  %v1101_v43 = vpop.permute.xlu0 %1100  ;;  %v1215_v7 = vpop.permute.xlu1 %1214  ;;  %v1464_v41 = vmul.f32 %v3767_v61, %v3619_v22 }
 0x2d1   :  { %v1155_v52 = vadd.f32 %v1101_v43, %v3102_v20  ;;  %v1267_v26 = vadd.f32 %v1215_v7, %v3075_v11  ;;  %v3794_v34 = vpop.permute.xlu2 %1110  ;;  %v1444_v36 = vmul.f32 %v2332_v12, %v1422_v56  ;;  %vm1925_vm12 = vcmp.lt.f32.partialorder %v3743_v39, 1e-08 }
 0x2d2   :  { %v3788_v42 = vmul.f32 %v1681_v55, %v1505_v17  ;;  %v1462_v30 = vmul.f32 %v1440_v9, %v3686_v31  ;;  %2337 = vrcp.f32 %v3786_v58  ;;  %vm4777_vm7 = vcmp.gt.f32.partialorder %v3743_v39, 1e-08 }
 0x2d3   :  { %v2334_v55 = vpop.eup %2333  ;;  %vm1331_vm3 = vcmp.gt.f32.partialorder %v1155_v52, 1e-08  ;;  %vm1859_vm4 = vcmp.lt.f32.partialorder %v1155_v52, 1e-08  ;;  %vm4571_vm10 = vcmp.gt.f32.partialorder %v1267_v26, 1e-08  ;;  %v1466_v11 = vmul.f32 %v1444_v36, %v3701_v44 }
 0x2d4   :  { %4776 = vst [vmem:[#allocation66_spill] sm:$0xff] %v3788_v42  ;;  %v1397_v20 = vmul.f32 %v2334_v55, %v3765_v45  ;;  %v3807_v22 = vsel %vm1331_vm3, %v1155_v52, 1.0  ;;  %v3810_v31 = vsel %vm4571_vm10, %v1267_v26, 1.0  ;;  %vm3814_vm15 = vmand %vm1859_vm4, %vm4777_vm7  ;;  %v4778_v53 = vmov 0  ;;  %v3818_v38 = vpop.eup %2335 }
 0x2d5   :  { %v4779_v53 = vsel %vm3814_vm15, 4294967295, %v4778_v53  ;;  %v3822_v6 = vmul.f32 %v3622_v21, %v3095_v8  ;;  %2339 = vrcp.f32 %v3807_v22  ;;  %v1616_v44 = vmul.f32 %v3781_v24, %v3627_v50  ;;  %vm3830_vm10 = vmand %vm1331_vm3, %vm1925_vm12 }
 0x2d6   :  { %v4780_v29 = vmov 0  ;;  %vm1861_vm7 = vcmp.lt.f32.partialorder %v3680_v27, 1e-08  ;;  %v1419_v32 = vsub.f32 2.0, %v1397_v20  ;;  %2341 = vrcp.f32 %v3810_v31  ;;  %1774 = vrot.lane.b32.xlu0 %v1657_v46, %s2374_s1  ;;  %v4795_v20 = vld [vmem:[#allocation10_spill] sm:$0xff] }
 0x2d7   :  { %v4781_v29 = vsel %vm3830_vm10, 4294967295, %v4780_v29  ;;  %v1484_v21 = vsub.f32 2.0, %v1462_v30  ;;  %vm4783_vm4 = vcmp.gt.f32.partialorder %v3743_v39, 1e-08  ;;  %v4784_v50 = vmov 0 }
 0x2d8   :  { %4782 = vst [vmem:[#allocation67_spill] sm:$0xff] %v4781_v29  ;;  %vm3840_vm0 = vmand %vm1331_vm3, %vm4783_vm4  ;;  %v1486_v12 = vsub.f32 2.0, %v1464_v41  ;;  %v1488_v51 = vsub.f32 2.0, %v1466_v11  ;;  %vm4787_vm12 = vcmp.gt.f32.partialorder %v1267_v26, 1e-08  ;;  %v4788_v17 = vmov 0  ;;  %v861_v46 = vpop.permute.xlu0 %860  ;;  %v3850_v7 = vpop.permute.xlu1 %968 }
 0x2d9   :  { %v4785_v50 = vsel %vm3840_vm0, 4294967295, %v4784_v50  ;;  %vm3845_vm11 = vmand %vm1861_vm7, %vm4787_vm12  ;;  %vm1927_vm10 = vcmp.lt.f32.partialorder %v1267_v26, 1e-08  ;;  %v1682_v56 = vmul.f32 2.0, %v3672_v23  ;;  %v1441_v43 = vmul.f32 %v2334_v55, %v1419_v32  ;;  %v2338_v30 = vpop.eup %2337  ;;  %v3862_v23 = vpop.permute.xlu2 %870 }
 0x2da   :  { %4786 = vst [vmem:[#allocation68_spill] sm:$0xff] %v4785_v50  ;;  %v4789_v17 = vsel %vm3845_vm11, 4294967295, %v4788_v17  ;;  %v1615_v39 = vmul.f32 %v3796_v25, %v3642_v13  ;;  %v1506_v52 = vmul.f32 %v1484_v21, %v1440_v9  ;;  %vm4791_vm3 = vcmp.gt.f32.partialorder %v3680_v27, 1e-08  ;;  %vm4796_vm7 = vmmov %vm4787_vm12  ;;  %v4801_v9 = vld [vmem:[#allocation9_spill] sm:$0xff] }
 0x2db   :  { %4790 = vst [vmem:[#allocation69_spill] sm:$0xff] %v4789_v17  ;;  %vm3856_vm4 = vmand %vm4791_vm3, %vm1927_vm10  ;;  %v4792_v41 = vmov 0  ;;  %v1686_v11 = vmul.f32 2.0, %v3822_v6  ;;  %v914_v37 = vmul.f32 %v861_v46, %v4795_v20  ;;  %v1510_v55 = vmul.f32 %v1488_v51, %v1444_v36  ;;  %v2340_v29 = vpop.eup %2339 }
 0x2dc   :  { %v4793_v41 = vsel %vm3856_vm4, 4294967295, %v4792_v41  ;;  %vm4797_vm12 = vmmov %vm4791_vm3  ;;  %v4798_v13 = vmov 0  ;;  %v913_v32 = vmul.f32 %v3508_v33, %v4801_v9  ;;  %v1463_v21 = vmul.f32 %v1441_v43, %v3765_v45  ;;  %v2342_v51 = vpop.eup %2341 }
 0x2dd   :  { %4794 = vst [vmem:[#allocation70_spill] sm:$0xff] %v4793_v41  ;;  %vm3867_vm0 = vmand %vm4797_vm12, %vm4796_vm7  ;;  %v1638_v41 = vsub.f32 2.0, %v1616_v44  ;;  %v3874_v50 = vmul.f32 %v1682_v56, %v1506_v52  ;;  %v1553_v46 = vmul.f32 %v3818_v38, %v3758_v47  ;;  %v1684_v36 = vmul.f32 2.0, %v914_v37  ;;  %992 = vrot.lane.b32.xlu1 %v914_v37, %s2374_s1 }
 0x2de   :  { %v4799_v13 = vsel %vm3867_vm0, 4294967295, %v4798_v13  ;;  %v1508_v27 = vmul.f32 %v1486_v12, %v3767_v61  ;;  %v3880_v26 = vmul.f32 %v1686_v11, %v1510_v55  ;;  %v1637_v33 = vsub.f32 2.0, %v1615_v39  ;;  %990 = vrot.lane.b32.xlu0 %v913_v32, %s2374_s1 }
 0x2df   :  { %4800 = vst [vmem:[#allocation10_spill] sm:$0xff] %v4799_v13  ;;  %v1551_v13 = vmul.f32 %v2340_v29, %v3807_v22  ;;  %v1485_v44 = vsub.f32 2.0, %v1463_v21  ;;  %v1552_v56 = vmul.f32 %v2338_v30, %v3786_v58  ;;  %v1399_v52 = vmul.f32 %v2342_v51, %v3810_v31 }
 0x2e0   :  { %4802 = vst [vmem:[#allocation9_spill] sm:$0xff] %v3874_v50  ;;  %v3888_v42 = vmul.f32 %v1684_v36, %v1508_v27  ;;  %v1683_v37 = vmul.f32 2.0, %v913_v32  ;;  %v1660_v11 = vmul.f32 %v1638_v41, %v3781_v24  ;;  %v1575_v55 = vsub.f32 2.0, %v1553_v46  ;;  %v1107_v21 = vpop.permute.xlu0 %1106  ;;  %v1219_v45 = vpop.permute.xlu1 %1218 }
 0x2e1   :  { %4803 = vst [vmem:[#allocation71_spill] sm:$0xff] %v3880_v26  ;;  %v1573_v0 = vsub.f32 2.0, %v1551_v13  ;;  %v1507_v61 = vmul.f32 %v1485_v44, %v1441_v43  ;;  %v1421_v12 = vsub.f32 2.0, %v1399_v52  ;;  %v1659_v50 = vmul.f32 %v1637_v33, %v3796_v25  ;;  %v4805_v43 = vld [vmem:[#allocation17_spill] sm:$0xff]  ;;  %v1223_v52 = vpop.permute.xlu2 %1222 }
 0x2e2   :  { %v1574_v27 = vsub.f32 2.0, %v1552_v56  ;;  %v1158_v32 = vadd.f32 %v1107_v21, %v4804_v40  ;;  %v1269_v44 = vadd.f32 %v1219_v45, %v4805_v43  ;;  %v3901_v24 = vadd.f32 %v1223_v52, %v3285_v18 }
 0x2e3   :  { %v1595_v35 = vmul.f32 %v2340_v29, %v1573_v0  ;;  %v3896_v36 = vmul.f32 %v1683_v37, %v1507_v61  ;;  %v1443_v13 = vmul.f32 %v2342_v51, %v1421_v12  ;;  %vm1928_vm10 = vcmp.lt.f32.partialorder %v3675_v19, 1e-08  ;;  %v4815_v12 = vld [vmem:[#allocation15_spill] sm:$0xff] }
 0x2e4   :  { %vm1334_vm3 = vcmp.gt.f32.partialorder %v1158_v32, 1e-08  ;;  %vm1862_vm7 = vcmp.lt.f32.partialorder %v1158_v32, 1e-08  ;;  %vm4585_vm12 = vcmp.gt.f32.partialorder %v1269_v44, 1e-08  ;;  %v1596_v29 = vmul.f32 %v2338_v30, %v1574_v27 }
 0x2e5   :  { %v1617_v41 = vmul.f32 %v1595_v35, %v3807_v22  ;;  %v1465_v0 = vmul.f32 %v1443_v13, %v3810_v31  ;;  %1778 = vrot.lane.b32.xlu1 %v1659_v50, %s2374_s1  ;;  %v1356_v40 = vsel %vm1334_vm3, %v1158_v32, 1.0  ;;  %v1313_v18 = vsel %vm4585_vm12, %v1269_v44, 1.0  ;;  %vm3928_vm12 = vmand %vm1334_vm3, %vm1928_vm10 }
 0x2e6   :  { %vm4586_vm0 = vcmp.gt.f32.partialorder %v3901_v24, 1e-08  ;;  %vm4806_vm4 = vcmp.gt.f32.partialorder %v3675_v19, 1e-08  ;;  %v4807_v22 = vmov 0  ;;  %2343 = vrcp.f32 %v1356_v40  ;;  %1780 = vrot.lane.b32.xlu0 %v1660_v11, %s2374_s1 }
 0x2e7   :  { %v1639_v25 = vsub.f32 2.0, %v1617_v41  ;;  %vm3915_vm5 = vmand %vm1862_vm7, %vm4806_vm4  ;;  %v3922_v31 = vsel %vm4586_vm0, %v3901_v24, 1.0  ;;  %v1597_v50 = vmul.f32 %v3818_v38, %v1575_v55  ;;  %v4809_v51 = vmov 0  ;;  %v4816_v55 = vld [vmem:[#allocation24_spill] sm:$0xff] }
 0x2e8   :  { %v4808_v22 = vsel %vm3915_vm5, 4294967295, %v4807_v22  ;;  %v4810_v51 = vsel %vm3928_vm12, 4294967295, %v4809_v51  ;;  %2345 = vrcp.f32 %v1313_v18  ;;  %vm3939_vm7 = vmand %vm1334_vm3, %vm4806_vm4  ;;  %v4812_v38 = vmov 0  ;;  %v867_v37 = vpop.permute.xlu0 %866  ;;  %v1109_v61 = vpop.permute.xlu1 %1108 }
 0x2e9   :  { %4811 = vst [vmem:[#allocation19_spill] sm:$0xff] %v4810_v51  ;;  %v1661_v33 = vmul.f32 %v1639_v25, %v1595_v35  ;;  %v4813_v38 = vsel %vm3939_vm7, 4294967295, %v4812_v38  ;;  %v1487_v30 = vsub.f32 2.0, %v1465_v0  ;;  %2347 = vrcp.f32 %v3922_v31  ;;  %v1761_v26 = vpop.permute.xlu2 %1760 }
 0x2ea   :  { %4814 = vst [vmem:[#allocation17_spill] sm:$0xff] %v4813_v38  ;;  %v1685_v56 = vmul.f32 2.0, %v3771_v3  ;;  %v917_v11 = vmul.f32 %v867_v37, %v4815_v12  ;;  %v1159_v21 = vadd.f32 %v1109_v61, %v4816_v55  ;;  %v1618_v19 = vmul.f32 %v1596_v29, %v3786_v58 }
 0x2eb   :  { %1782 = vrot.lane.b32.xlu2 %v1661_v33, %s2374_s1  ;;  %v1509_v35 = vmul.f32 %v1487_v30, %v1443_v13  ;;  %v1619_v27 = vmul.f32 %v1597_v50, %v3758_v47  ;;  %vm4818_vm4 = vcmp.gt.f32.partialorder %v1269_v44, 1e-08  ;;  %vm1929_vm7 = vcmp.lt.f32.partialorder %v1269_v44, 1e-08  ;;  %v4823_v30 = vld [vmem:[#allocation26_spill] sm:$0xff] }
 0x2ec   :  { %v2344_v43 = vpop.eup %2343  ;;  %vm1335_vm10 = vcmp.gt.f32.partialorder %v1159_v21, 1e-08  ;;  %vm1863_vm3 = vcmp.lt.f32.partialorder %v1159_v21, 1e-08  ;;  %v1640_v25 = vsub.f32 2.0, %v1618_v19  ;;  %v4821_v33 = vmov 0 }
 0x2ed   :  { %v3950_v32 = vmul.f32 %v1685_v56, %v1509_v35  ;;  %998 = vrot.lane.b32.xlu1 %v917_v11, %s2374_s1  ;;  %v1554_v52 = vmul.f32 %v2344_v43, %v1356_v40  ;;  %v1357_v41 = vsel %vm1335_vm10, %v1159_v21, 1.0  ;;  %vm3955_vm0 = vmand %vm1863_vm3, %vm4818_vm4  ;;  %v1160_v56 = vadd.f32 %v3794_v34, %v4823_v30  ;;  %v4827_v34 = vld [vmem:[#allocation18_spill] sm:$0xff]  ;;  %v4828_v30 = vld [vmem:[#allocation20_spill] sm:$0xff] }
 0x2ee   :  { %v2346_v3 = vpop.eup %2345  ;;  %2349 = vrcp.f32 %v1357_v41  ;;  %vm3963_vm12 = vmand %vm1335_vm10, %vm1929_vm7  ;;  %996 = vrot.lane.b32.xlu0 %v3822_v6, %s2374_s1  ;;  %v1641_v35 = vsub.f32 2.0, %v1619_v27  ;;  %v4825_v55 = vmov 0  ;;  %v1662_v38 = vmul.f32 %v1640_v25, %v1596_v29 }
 0x2ef   :  { %4817 = vst [vmem:[#allocation15_spill] sm:$0xff] %v3950_v32  ;;  %v2348_v58 = vpop.eup %2347  ;;  %v1401_v0 = vmul.f32 %v2346_v3, %v1313_v18  ;;  %v4822_v33 = vsel %vm3963_vm12, 4294967295, %v4821_v33  ;;  %v1576_v37 = vsub.f32 2.0, %v1554_v52  ;;  %vm4824_vm3 = vmmov %vm4818_vm4  ;;  %vm4832_vm5 = vcmp.gt.f32.partialorder %v1160_v56, 1e-08 }
 0x2f0   :  { %v1403_v61 = vmul.f32 %v2348_v58, %v3922_v31  ;;  %vm3974_vm4 = vmand %vm1335_vm10, %vm4824_vm3  ;;  %v869_v45 = vpop.permute.xlu1 %868  ;;  %v1221_v46 = vpop.permute.xlu0 %1220  ;;  %v1663_v44 = vmul.f32 %v1641_v35, %v1597_v50  ;;  %vm1864_vm10 = vcmp.lt.f32.partialorder %v1160_v56, 1e-08 }
 0x2f1   :  { %v4826_v55 = vsel %vm3974_vm4, 4294967295, %v4825_v55  ;;  %v1423_v19 = vsub.f32 2.0, %v1401_v0  ;;  %v1598_v39 = vmul.f32 %v2344_v43, %v1576_v37  ;;  %v3979_v52 = vmul.f32 %v869_v45, %v4827_v34  ;;  %v4829_v45 = vld [vmem:[#allocation30_spill] sm:$0xff]  ;;  %vm4836_vm12 = vmmov %vm4832_vm5 }
 0x2f2   :  { %v1425_v47 = vsub.f32 2.0, %v1403_v61  ;;  %v1270_v17 = vadd.f32 %v1221_v46, %v4828_v30  ;;  %v919_v43 = vmul.f32 %v3862_v23, %v4829_v45  ;;  %v4837_v23 = vmov 0 }
 0x2f3   :  { %v1445_v32 = vmul.f32 %v2346_v3, %v1423_v19  ;;  %v1620_v21 = vmul.f32 %v1598_v39, %v1356_v40  ;;  %1000 = vrot.lane.b32.xlu2 %v3979_v52, %s2374_s1  ;;  %v4830_v40 = vmov 0 }
 0x2f4   :  { %v1447_v6 = vmul.f32 %v2348_v58, %v1425_v47  ;;  %v2350_v27 = vpop.eup %2349  ;;  %vm1292_vm3 = vcmp.gt.f32.partialorder %v1270_v17, 1e-08  ;;  %vm1930_vm11 = vcmp.lt.f32.partialorder %v1270_v17, 1e-08  ;;  %v1687_v58 = vmul.f32 2.0, %v917_v11 }
 0x2f5   :  { %v1467_v51 = vmul.f32 %v1445_v32, %v1313_v18  ;;  %1784 = vrot.lane.b32.xlu1 %v1662_v38, %s2374_s1  ;;  %v1555_v29 = vmul.f32 %v2350_v27, %v1357_v41  ;;  %v1314_v50 = vsel %vm1292_vm3, %v1270_v17, 1.0  ;;  %vm3990_vm7 = vmand %vm1864_vm10, %vm1292_vm3  ;;  %v1642_v18 = vsub.f32 2.0, %v1620_v21 }
 0x2f6   :  { %v1469_v46 = vmul.f32 %v1447_v6, %v3922_v31  ;;  %v4831_v40 = vsel %vm3990_vm7, 4294967295, %v4830_v40  ;;  %2351 = vrcp.f32 %v1314_v50  ;;  %vm3995_vm4 = vmand %vm4832_vm5, %vm1930_vm11  ;;  %v4833_v38 = vmov 0  ;;  %1786 = vrot.lane.b32.xlu0 %v1663_v44, %s2374_s1 }
 0x2f7   :  { %v1489_v3 = vsub.f32 2.0, %v1467_v51  ;;  %v4834_v38 = vsel %vm3995_vm4, 4294967295, %v4833_v38  ;;  %v1577_v47 = vsub.f32 2.0, %v1555_v29  ;;  %vm4002_vm15 = vmand %vm4836_vm12, %vm1292_vm3  ;;  %v1689_v25 = vmul.f32 2.0, %v919_v43 }
 0x2f8   :  { %4835 = vst [vmem:[#allocation24_spill] sm:$0xff] %v4834_v38  ;;  %v4838_v23 = vsel %vm4002_vm15, 4294967295, %v4837_v23  ;;  %v1491_v31 = vsub.f32 2.0, %v1469_v46  ;;  %v4006_v37 = vpop.permute.xlu1 %974  ;;  %v4008_v51 = vpop.permute.xlu0 %972  ;;  %v1664_v19 = vmul.f32 %v1642_v18, %v1598_v39  ;;  %vm4840_vm11 = vmmov %vm4832_vm5  ;;  %vm4845_vm3 = vcmp.gt.f32.partialorder %v3901_v24, 1e-08 }
 0x2f9   :  { %4839 = vst [vmem:[#allocation26_spill] sm:$0xff] %v4838_v23  ;;  %v1511_v0 = vmul.f32 %v1489_v3, %v1445_v32  ;;  %v1599_v61 = vmul.f32 %v2350_v27, %v1577_v47  ;;  %v4013_v17 = vsel %vm4840_vm11, %v1160_v56, 1.0  ;;  %v4022_v39 = vpop.permute.xlu2 %976  ;;  %vm1931_vm15 = vcmp.lt.f32.partialorder %v3901_v24, 1e-08  ;;  %v4857_v24 = vld [vmem:[#allocation3_spill] sm:$0xff] }
 0x2fa   :  { %v1513_v35 = vmul.f32 %v1491_v31, %v1447_v6  ;;  %2353 = vrcp.f32 %v4013_v17  ;;  %v4842_v6 = vld [vmem:[#allocation2_spill] sm:$0xff]  ;;  %v4843_v31 = vld [vmem:[#allocation39_spill] sm:$0xff] }
 0x2fb   :  { %v4010_v30 = vmul.f32 %v1687_v58, %v1511_v0  ;;  %v1621_v44 = vmul.f32 %v1599_v61, %v1357_v41  ;;  %1788 = vrot.lane.b32.xlu2 %v1664_v19, %s2374_s1  ;;  %v1034_v56 = vsub.f32 %v4842_v6, %v3850_v7  ;;  %v4844_v0 = vld [vmem:[#allocation37_spill] sm:$0xff]  ;;  %v4853_v6 = vmov 0 }
 0x2fc   :  { %v4015_v21 = vmul.f32 %v1689_v25, %v1513_v35  ;;  %v2352_v29 = vpop.eup %2351 }
 0x2fd   :  { %v1402_v32 = vmul.f32 %v2352_v29, %v1314_v50  ;;  %v1643_v46 = vsub.f32 2.0, %v1621_v44  ;;  %v1716_v35 = vmul.f32 2.0, %v1034_v56  ;;  %v1688_v56 = vmul.f32 2.0, %v3979_v52 }
 0x2fe   :  { %4841 = vst [vmem:[#allocation18_spill] sm:$0xff] %v4015_v21  ;;  %1002 = vrot.lane.b32.xlu0 %v919_v43, %s2374_s1 }
 0x2ff   :  { %v1424_v27 = vsub.f32 2.0, %v1402_v32  ;;  %v1665_v41 = vmul.f32 %v1643_v46, %v1599_v61  ;;  %v1826_v7 = vmul.f32 %v1761_v26, %v1716_v35  ;;  %v4846_v61 = vmov 0 }
 0x300   :  { %v1113_v3 = vpop.permute.xlu0 %1112  ;;  %v1225_v47 = vpop.permute.xlu1 %1224 }
 0x301   :  { %v1446_v18 = vmul.f32 %v2352_v29, %v1424_v27  ;;  %1790 = vrot.lane.b32.xlu1 %v1665_v41, %s2374_s1  ;;  %v1161_v58 = vadd.f32 %v1113_v3, %v4843_v31  ;;  %v1272_v25 = vadd.f32 %v1225_v47, %v4844_v0  ;;  %v2354_v44 = vpop.eup %2353  ;;  %v4849_v29 = vmov 0  ;;  %v1117_v27 = vpop.permute.xlu2 %1116 }
 0x302   :  { %v1556_v46 = vmul.f32 %v2354_v44, %v4013_v17 }
 0x303   :  { %v1468_v19 = vmul.f32 %v1446_v18, %v1314_v50  ;;  %vm1337_vm5 = vcmp.gt.f32.partialorder %v1161_v58, 1e-08  ;;  %vm1865_vm12 = vcmp.lt.f32.partialorder %v1161_v58, 1e-08  ;;  %vm1294_vm10 = vcmp.gt.f32.partialorder %v1272_v25, 1e-08 }
 0x304   :  { %v4031_v32 = vsel %vm1337_vm5, %v1161_v58, 1.0  ;;  %v1316_v43 = vsel %vm1294_vm10, %v1272_v25, 1.0  ;;  %vm4036_vm11 = vmand %vm1865_vm12, %vm4845_vm3  ;;  %v1035_v58 = vsub.f32 %v4857_v24, %v3745_v48  ;;  %v4860_v48 = vmov 0 }
 0x305   :  { %v4847_v61 = vsel %vm4036_vm11, 4294967295, %v4846_v61  ;;  %2355 = vrcp.f32 %v4031_v32  ;;  %v1490_v50 = vsub.f32 2.0, %v1468_v19  ;;  %vm4046_vm4 = vmand %vm1337_vm5, %vm1931_vm15  ;;  %v1578_v19 = vsub.f32 2.0, %v1556_v46 }
 0x306   :  { %4848 = vst [vmem:[#allocation20_spill] sm:$0xff] %v4847_v61  ;;  %v4850_v29 = vsel %vm4046_vm4, 4294967295, %v4849_v29  ;;  %2357 = vrcp.f32 %v1316_v43  ;;  %1980 = vrot.lane.b32.xlu0 %v1826_v7, %s2375_s25  ;;  %vm4852_vm12 = vmmov %vm4845_vm3 }
 0x307   :  { %4851 = vst [vmem:[#allocation30_spill] sm:$0xff] %v4850_v29  ;;  %vm4055_vm3 = vmand %vm1337_vm5, %vm4852_vm12  ;;  %v1512_v41 = vmul.f32 %v1490_v50, %v1446_v18 }
 0x308   :  { %v4854_v6 = vsel %vm4055_vm3, 4294967295, %v4853_v6  ;;  %v873_v3 = vpop.permute.xlu0 %872  ;;  %v1115_v47 = vpop.permute.xlu1 %1114  ;;  %vm1932_vm3 = vcmp.lt.f32.partialorder %v1272_v25, 1e-08  ;;  %v4864_v25 = vld [vmem:[#allocation4_spill] sm:$0xff] }
 0x309   :  { %4855 = vst [vmem:[#allocation2_spill] sm:$0xff] %v4854_v6  ;;  %v920_v31 = vmul.f32 %v873_v3, %v3308_v4  ;;  %v1162_v0 = vadd.f32 %v1115_v47, %v3395_v59  ;;  %v4062_v35 = vmul.f32 %v1688_v56, %v1512_v41  ;;  %v1600_v56 = vmul.f32 %v2354_v44, %v1578_v19  ;;  %v877_v11 = vpop.permute.xlu2 %876 }
 0x30a   :  { %v4862_v41 = vmov 0  ;;  %v1717_v3 = vmul.f32 2.0, %v1035_v58  ;;  %v1036_v44 = vsub.f32 %v4864_v25, %v4008_v51  ;;  %v4100_v51 = vmul.f32 %v877_v11, %v3510_v49 }
 0x30b   :  { %4856 = vst [vmem:[#allocation39_spill] sm:$0xff] %v4062_v35  ;;  %v2356_v7 = vpop.eup %2355  ;;  %vm1338_vm15 = vcmp.gt.f32.partialorder %v1162_v0, 1e-08  ;;  %vm1866_vm5 = vcmp.lt.f32.partialorder %v1162_v0, 1e-08  ;;  %1004 = vrot.lane.b32.xlu2 %v920_v31, %s2374_s1  ;;  %v1622_v61 = vmul.f32 %v1600_v56, %v4013_v17 }
 0x30c   :  { %v2358_v52 = vpop.eup %2357  ;;  %v4067_v26 = vsel %vm1338_vm15, %v1162_v0, 1.0  ;;  %vm4070_vm12 = vmand %vm1866_vm5, %vm1294_vm10  ;;  %v1557_v46 = vmul.f32 %v2356_v7, %v4031_v32 }
 0x30d   :  { %v1404_v50 = vmul.f32 %v2358_v52, %v1316_v43  ;;  %2359 = vrcp.f32 %v4067_v26  ;;  %vm4078_vm4 = vmand %vm1338_vm15, %vm1932_vm3 }
 0x30e   :  { %v4861_v48 = vsel %vm4078_vm4, 4294967295, %v4860_v48  ;;  %vm4084_vm5 = vmand %vm1338_vm15, %vm1294_vm10  ;;  %v1579_v21 = vsub.f32 2.0, %v1557_v46  ;;  %v1718_v46 = vmul.f32 2.0, %v1036_v44 }
 0x30f   :  { %v4863_v41 = vsel %vm4084_vm5, 4294967295, %v4862_v41  ;;  %v1426_v47 = vsub.f32 2.0, %v1404_v50 }
 0x310   :  { %v1763_v0 = vpop.permute.xlu0 %1762  ;;  %v875_v24 = vpop.permute.xlu1 %874 }
 0x311   :  { %v1448_v59 = vmul.f32 %v2358_v52, %v1426_v47  ;;  %v1827_v6 = vmul.f32 %v1763_v0, %v1717_v3  ;;  %v4089_v29 = vmul.f32 %v875_v24, %v3397_v63  ;;  %v1163_v52 = vadd.f32 %v1117_v27, %v3446_v5 }
 0x312   :  { %v1644_v3 = vsub.f32 2.0, %v1622_v61  ;;  %v1601_v47 = vmul.f32 %v2356_v7, %v1579_v21  ;;  %v1690_v0 = vmul.f32 2.0, %v920_v31  ;;  %v4865_v21 = vld [vmem:[#allocation5_spill] sm:$0xff]  ;;  %v1767_v31 = vpop.permute.xlu2 %1766  ;;  %v4998_v18 = vld [vmem:[#allocation39_spill] sm:$0xff] }
 0x313   :  { %v2360_v23 = vpop.eup %2359  ;;  %v1470_v19 = vmul.f32 %v1448_v59, %v1316_v43  ;;  %1006 = vrot.lane.b32.xlu2 %v4089_v29, %s2374_s1  ;;  %1982 = vrot.lane.b32.xlu1 %v1827_v6, %s2375_s25  ;;  %vm1867_vm10 = vcmp.lt.f32.partialorder %v1163_v52, 1e-08  ;;  %v1037_v61 = vsub.f32 %v4865_v21, %v4006_v37  ;;  %vm1339_vm11 = vcmp.gt.f32.partialorder %v1163_v52, 1e-08 }
 0x314   :  { %v1558_v50 = vmul.f32 %v2360_v23, %v4067_v26  ;;  %v1666_v5 = vmul.f32 %v1644_v3, %v1600_v56  ;;  %v1623_v27 = vmul.f32 %v1601_v47, %v4031_v32  ;;  %v4868_v37 = vmov 0 }
 0x315   :  { %v1492_v58 = vsub.f32 2.0, %v1470_v19  ;;  %v1719_v56 = vmul.f32 2.0, %v1037_v61  ;;  %v1361_v44 = vsel %vm1339_vm11, %v1163_v52, 1.0  ;;  %v4874_v61 = vld [vmem:[#allocation7_spill] sm:$0xff] }
 0x316   :  { %v1580_v6 = vsub.f32 2.0, %v1558_v50  ;;  %v1645_v32 = vsub.f32 2.0, %v1623_v27 }
 0x317   :  { %v1514_v17 = vmul.f32 %v1492_v58, %v1448_v59  ;;  %v4871_v59 = vmov 0  ;;  %v1829_v50 = vmul.f32 %v1767_v31, %v1719_v56 }
 0x318   :  { %v1765_v24 = vpop.permute.xlu1 %1764  ;;  %v1227_v38 = vpop.permute.xlu0 %1226  ;;  %v1602_v7 = vmul.f32 %v2360_v23, %v1580_v6  ;;  %v1667_v3 = vmul.f32 %v1645_v32, %v1601_v47 }
 0x319   :  { %v1828_v43 = vmul.f32 %v1765_v24, %v1718_v46  ;;  %v1273_v25 = vadd.f32 %v1227_v38, %v3415_v14  ;;  %v4103_v35 = vmul.f32 %v1690_v0, %v1514_v17 }
 0x31a   :  { %v1624_v46 = vmul.f32 %v1602_v7, %v4067_v26  ;;  %v4130_v23 = vpop.permute.xlu2 %982 }
 0x31b   :  { %vm1295_vm3 = vcmp.gt.f32.partialorder %v1273_v25, 1e-08  ;;  %1008 = vrot.lane.b32.xlu2 %v4100_v51, %s2374_s1  ;;  %1984 = vrot.lane.b32.xlu0 %v1828_v43, %s2375_s25  ;;  %vm1933_vm15 = vcmp.lt.f32.partialorder %v1273_v25, 1e-08 }
 0x31c   :  { %v1317_v38 = vsel %vm1295_vm3, %v1273_v25, 1.0  ;;  %1792 = vrot.lane.b32.xlu1 %v1666_v5, %s2374_s1  ;;  %vm4115_vm7 = vmand %vm1867_vm10, %vm1295_vm3  ;;  %v1646_v43 = vsub.f32 2.0, %v1624_v46 }
 0x31d   :  { %2361 = vrcp.f32 %v1317_v38  ;;  %vm4119_vm5 = vmand %vm1339_vm11, %vm1933_vm15 }
 0x31e   :  { %v4869_v37 = vsel %vm4119_vm5, 4294967295, %v4868_v37  ;;  %vm4123_vm4 = vmand %vm1339_vm11, %vm1295_vm3  ;;  %2363 = vrcp.f32 %v1361_v44  ;;  %v1668_v21 = vmul.f32 %v1646_v43, %v1602_v7 }
 0x31f   :  { %4870 = vst [vmem:[#allocation37_spill] sm:$0xff] %v4869_v37  ;;  %v4872_v59 = vsel %vm4123_vm4, 4294967295, %v4871_v59 }
 0x320   :  { %4873 = vst [vmem:[#allocation3_spill] sm:$0xff] %v4872_v59  ;;  %v981_v19 = vpop.permute.xlu1 %980  ;;  %v979_v58 = vpop.permute.xlu0 %978 }
 0x321   :  { %v1039_v31 = vsub.f32 %v4874_v61, %v979_v58 }
 0x322   :  { %v1773_v7 = vpop.permute.xlu2 %1772 }
 0x323   :  { %v2362_v0 = vpop.eup %2361  ;;  %1986 = vrot.lane.b32.xlu2 %v1829_v50, %s2375_s25  ;;  %v1721_v58 = vmul.f32 2.0, %v1039_v31 }
 0x324   :  { %v1405_v17 = vmul.f32 %v2362_v0, %v1317_v38  ;;  %1794 = vrot.lane.b32.xlu1 %v1667_v3, %s2374_s1  ;;  %v2364_v5 = vpop.eup %2363 }
 0x325   :  { %v1559_v32 = vmul.f32 %v2364_v5, %v1361_v44 }
 0x326   :  { %v1427_v24 = vsub.f32 2.0, %v1405_v17  ;;  %v4875_v17 = vld [vmem:[#allocation8_spill] sm:$0xff] }
 0x327   :  { %v1581_v3 = vsub.f32 2.0, %v1559_v32 }
 0x328   :  { %v1449_v25 = vmul.f32 %v2362_v0, %v1427_v24  ;;  %v1119_v6 = vpop.permute.xlu0 %1118  ;;  %v1121_v52 = vpop.permute.xlu1 %1120  ;;  %v1040_v24 = vsub.f32 %v4875_v17, %v981_v19 }
 0x329   :  { %v4133_v27 = vadd.f32 %v1119_v6, %v3594_v57  ;;  %v4136_v26 = vadd.f32 %v1121_v52, %v3584_v60 }
 0x32a   :  { %v1471_v47 = vmul.f32 %v1449_v25, %v1317_v38  ;;  %v1691_v38 = vmul.f32 2.0, %v4089_v29  ;;  %v1722_v31 = vmul.f32 2.0, %v1040_v24  ;;  %v989_v17 = vpop.permute.xlu2 %988 }
 0x32b   :  { %vm1340_vm11 = vcmp.gt.f32.partialorder %v4133_v27, 1e-08  ;;  %vm1341_vm10 = vcmp.gt.f32.partialorder %v4136_v26, 1e-08 }
 0x32c   :  { %v1362_v56 = vsel %vm1340_vm11, %v4133_v27, 1.0  ;;  %v1363_v57 = vsel %vm1341_vm10, %v4136_v26, 1.0  ;;  %1796 = vrot.lane.b32.xlu1 %v1668_v21, %s2374_s1  ;;  %v1493_v60 = vsub.f32 2.0, %v1471_v47  ;;  %v4877_v47 = vld [vmem:[#allocation6_spill] sm:$0xff] }
 0x32d   :  { %2365 = vrcp.f32 %v1362_v56  ;;  %v1038_v61 = vsub.f32 %v4877_v47, %v4022_v39  ;;  %v1832_v39 = vmul.f32 %v1773_v7, %v1722_v31 }
 0x32e   :  { %2367 = vrcp.f32 %v1363_v57  ;;  %v1515_v50 = vmul.f32 %v1493_v60, %v1449_v25  ;;  %v1603_v60 = vmul.f32 %v2364_v5, %v1581_v3 }
 0x330   :  { %v879_v46 = vpop.permute.xlu0 %878  ;;  %v1771_v0 = vpop.permute.xlu1 %1770  ;;  %v4153_v52 = vmul.f32 %v1691_v38, %v1515_v50  ;;  %v1625_v14 = vmul.f32 %v1603_v60, %v1361_v44 }
 0x331   :  { %v4151_v43 = vmul.f32 %v879_v46, %v3528_v28  ;;  %v1831_v6 = vmul.f32 %v1771_v0, %v1721_v58  ;;  %v1720_v58 = vmul.f32 2.0, %v1038_v61 }
 0x332   :  { %4876 = vst [vmem:[#allocation4_spill] sm:$0xff] %v4153_v52  ;;  %v1647_v52 = vsub.f32 2.0, %v1625_v14  ;;  %v995_v44 = vpop.permute.xlu2 %994  ;;  %v1041_v14 = vsub.f32 %v2974_v1, %v4130_v23 }
 0x333   :  { %v2366_v21 = vpop.eup %2365  ;;  %1010 = vrot.lane.b32.xlu2 %v4151_v43, %s2374_s1  ;;  %1990 = vrot.lane.b32.xlu0 %v1831_v6, %s2375_s25 }
 0x334   :  { %v2368_v19 = vpop.eup %2367  ;;  %v1560_v25 = vmul.f32 %v2366_v21, %v1362_v56 }
 0x335   :  { %v1561_v32 = vmul.f32 %v2368_v19, %v1363_v57 }
 0x336   :  { %v1582_v38 = vsub.f32 2.0, %v1560_v25 }
 0x337   :  { %v1583_v50 = vsub.f32 2.0, %v1561_v32 }
 0x338   :  { %v1769_v46 = vpop.permute.xlu0 %1768  ;;  %v1604_v0 = vmul.f32 %v2366_v21, %v1582_v38  ;;  %v987_v6 = vpop.permute.xlu1 %986  ;;  %v1669_v21 = vmul.f32 %v1647_v52, %v1603_v60  ;;  %v1044_v38 = vsub.f32 %v3026_v16, %v989_v17 }
 0x339   :  { %v1830_v47 = vmul.f32 %v1769_v46, %v1720_v58  ;;  %v1605_v59 = vmul.f32 %v2368_v19, %v1583_v50  ;;  %v1043_v52 = vsub.f32 %v3006_v15, %v987_v6 }
 0x33a   :  { %v1626_v37 = vmul.f32 %v1604_v0, %v1362_v56 }
 0x33b   :  { %1992 = vrot.lane.b32.xlu2 %v1832_v39, %s2375_s25  ;;  %1988 = vrot.lane.b32.xlu1 %v1830_v47, %s2375_s25  ;;  %v1627_v29 = vmul.f32 %v1605_v59, %v1363_v57  ;;  %v1725_v1 = vmul.f32 2.0, %v1043_v52 }
 0x33c   :  { %v1648_v24 = vsub.f32 2.0, %v1626_v37 }
 0x33d   :  { %v1649_v5 = vsub.f32 2.0, %v1627_v29 }
 0x33e   :  { %v1670_v3 = vmul.f32 %v1648_v24, %v1604_v0  ;;  %v1726_v0 = vmul.f32 2.0, %v1044_v38 }
 0x33f   :  { %v1671_v25 = vmul.f32 %v1649_v5, %v1605_v59  ;;  %v1723_v59 = vmul.f32 2.0, %v1041_v14  ;;  %v4878_v5 = vld [vmem:[#allocation11_spill] sm:$0xff] }
 0x340   :  { %v985_v61 = vpop.permute.xlu0 %984  ;;  %1800 = vrot.lane.b32.xlu0 %v1670_v3, %s2374_s1  ;;  %v1777_v56 = vpop.permute.xlu1 %1776  ;;  %v1047_v3 = vsub.f32 %v4878_v5, %v995_v44 }
 0x341   :  { %v1042_v7 = vsub.f32 %v2990_v10, %v985_v61 }
 0x343   :  { %v1724_v19 = vmul.f32 2.0, %v1042_v7  ;;  %1798 = vrot.lane.b32.xlu1 %v1669_v21, %s2374_s1  ;;  %1802 = vrot.lane.b32.xlu2 %v1671_v25, %s2374_s1 }
 0x345   :  { %v1834_v31 = vmul.f32 %v1777_v56, %v1724_v19  ;;  %v1783_v37 = vpop.permute.xlu2 %1782 }
 0x348   :  { %v1775_v57 = vpop.permute.xlu0 %1774  ;;  %1996 = vrot.lane.b32.xlu0 %v1834_v31, %s2375_s25  ;;  %v1729_v31 = vmul.f32 2.0, %v1047_v3  ;;  %v4891_v3 = vld [vmem:[#allocation21_spill] sm:$0xff] }
 0x349   :  { %v1833_v32 = vmul.f32 %v1775_v57, %v1723_v59  ;;  %vm4892_vm15 = vnez %v4891_v3  ;;  %v4908_v3 = vld [vmem:[#allocation52_spill] sm:$0xff] }
 0x34b   :  { %1230 = vrot.lane.b32.xlu1 %v3554_v2, %s2373_s9  ;;  %1228 = vrot.lane.b32.xlu2 %v3569_v54, %s2373_s9 }
 0x34d   :  { %v1001_v58 = vpop.permute.xlu2 %1000 }
 0x34f   :  { %v993_v10 = vpop.permute.xlu1 %992 }
 0x350   :  { %v991_v29 = vpop.permute.xlu0 %990  ;;  %v1046_v16 = vsub.f32 %v4795_v20, %v993_v10 }
 0x351   :  { %v1045_v60 = vsub.f32 %v4801_v9, %v991_v29 }
 0x352   :  { %v1728_v7 = vmul.f32 2.0, %v1046_v16 }
 0x353   :  { %1994 = vrot.lane.b32.xlu1 %v1833_v32, %s2375_s25  ;;  %v1727_v23 = vmul.f32 2.0, %v1045_v60  ;;  %v4880_v60 = vld [vmem:[#allocation12_spill] sm:$0xff] }
 0x354   :  { %v4881_v38 = vsel %vm3122_vm6, %v4880_v60, 1.0 }
 0x355   :  { %v1837_v47 = vmul.f32 %v1783_v37, %v1727_v23  ;;  %v1789_v15 = vpop.permute.xlu2 %1788 }
 0x357   :  { %v1779_v50 = vpop.permute.xlu1 %1778 }
 0x358   :  { %v1835_v46 = vmul.f32 %v1779_v50, %v1725_v1  ;;  %v1781_v39 = vpop.permute.xlu0 %1780 }
 0x359   :  { %v1836_v24 = vmul.f32 %v1781_v39, %v1726_v0 }
 0x35a   :  { %1998 = vrot.lane.b32.xlu2 %v1835_v46, %s2375_s25 }
 0x35b   :  { %2002 = vrot.lane.b32.xlu1 %v1837_v47, %s2375_s25  ;;  %2000 = vrot.lane.b32.xlu0 %v1836_v24, %s2375_s25  ;;  %v4885_v47 = vld [vmem:[#allocation43_spill] sm:$0xff] }
 0x35c   :  { %v4886_v24 = vsel %vm3319_vm2, %v4885_v47, 1.0 }
 0x35f   :  { %v999_v9 = vpop.permute.xlu1 %998 }
 0x360   :  { %v997_v17 = vpop.permute.xlu0 %996  ;;  %v1049_v20 = vsub.f32 %v4815_v12, %v999_v9 }
 0x361   :  { %v1048_v6 = vsub.f32 %v3095_v8, %v997_v17  ;;  %v4889_v17 = vld [vmem:[#allocation38_spill] sm:$0xff] }
 0x362   :  { %v1731_v37 = vmul.f32 2.0, %v1049_v20  ;;  %vm4890_vm6 = vnez %v4889_v17 }
 0x363   :  { %v1730_v61 = vmul.f32 2.0, %v1048_v6 }
 0x365   :  { %v1840_v21 = vmul.f32 %v1789_v15, %v1730_v61  ;;  %v1005_v25 = vpop.permute.xlu2 %1004  ;;  %v4887_v15 = vld [vmem:[#allocation36_spill] sm:$0xff]  ;;  %v4893_v61 = vld [vmem:[#allocation33_spill] sm:$0xff] }
 0x366   :  { %vm4888_vm3 = vnez %v4887_v15 }
 0x367   :  { %v1785_v19 = vpop.permute.xlu1 %1784  ;;  %2008 = vrot.lane.b32.xlu1 %v1840_v21, %s2375_s25  ;;  %v4895_v21 = vld [vmem:[#allocation22_spill] sm:$0xff] }
 0x368   :  { %v1838_v56 = vmul.f32 %v1785_v19, %v1728_v7  ;;  %v1787_v57 = vpop.permute.xlu0 %1786  ;;  %v4894_v7 = vsel %vm4892_vm15, %v4893_v61, 1.0 }
 0x369   :  { %v1839_v14 = vmul.f32 %v1787_v57, %v1729_v31  ;;  %v4897_v31 = vld [vmem:[#allocation25_spill] sm:$0xff] }
 0x36a   :  { %2004 = vrot.lane.b32.xlu2 %v1838_v56, %s2375_s25  ;;  %vm4898_vm2 = vnez %v4897_v31 }
 0x36b   :  { %2006 = vrot.lane.b32.xlu0 %v1839_v14, %s2375_s25  ;;  %v1050_v14 = vsub.f32 %v4827_v34, %v1001_v58  ;;  %v4905_v34 = vld [vmem:[#allocation29_spill] sm:$0xff] }
 0x36c   :  { %vm4906_vm15 = vnez %v4905_v34 }
 0x36d   :  { %v4190_v8 = vpop.permute.xlu2 %1006 }
 0x370   :  { %v1003_v44 = vpop.permute.xlu0 %1002 }
 0x373   :  { %v1791_v10 = vpop.permute.xlu1 %1790 }
 0x374   :  { %v1841_v59 = vmul.f32 %v1791_v10, %v1731_v37 }
 0x375   :  { %v4192_v52 = vpop.permute.xlu2 %1008 }
 0x376   :  { %2010 = vrot.lane.b32.xlu2 %v1841_v59, %s2375_s25  ;;  %v1732_v59 = vmul.f32 2.0, %v1050_v14 }
 0x378   :  { %v1981_v29 = vpop.permute.xlu0 %1980 }
 0x379   :  { %v2046_v23 = vsel %vm3131_vm8, %v1981_v29, %v4881_v38  ;;  %v2090_v12 = vmul.f32 %v1981_v29, %v4880_v60  ;;  %vm2134_vm8 = vcmask 138240   ;;  %v4899_v60 = vld [vmem:[#allocation27_spill] sm:$0xff] }
 0x37a   :  { %v4901_v38 = vld [vmem:[#allocation23_spill] sm:$0xff] }
 0x37b   :  { %v2112_v46 = vsel %vm3143_vm9, %v2090_v12, %v2046_v23  ;;  %vm4896_vm9 = vnez %v4895_v21  ;;  %v4903_v23 = vld [vmem:[#allocation28_spill] sm:$0xff] }
 0x37c   :  { %v2135_v20 = vsel %vm2134_vm8, %v2112_v46, 0.0  ;;  %v1051_v46 = vsub.f32 %v4829_v45, %v1003_v44 }
 0x37d   :  { %v1987_v0 = vpop.permute.xlu2 %1986 }
 0x37e   :  { %v2049_v9 = vsel %vm4888_vm3, %v1987_v0, %v4886_v24  ;;  %v2093_v16 = vmul.f32 %v1987_v0, %v4885_v47  ;;  %vm4900_vm3 = vnez %v4899_v60 }
 0x37f   :  { %v4902_v1 = vsel %vm4900_vm3, %v4901_v38, 1.0 }
 0x380   :  { %v2115_v6 = vsel %vm4890_vm6, %v2093_v16, %v2049_v9  ;;  %vm4904_vm6 = vnez %v4903_v23  ;;  %v1733_v16 = vmul.f32 2.0, %v1051_v46  ;;  %v4915_v23 = vld [vmem:[#allocation44_spill] sm:$0xff]  ;;  %v4923_v46 = vld [vmem:[#allocation49_spill] sm:$0xff] }
 0x381   :  { %v2140_v15 = vsel %vm2134_vm8, %v2115_v6, 0.0 }
 0x385   :  { %v1983_v5 = vpop.permute.xlu1 %1982 }
 0x386   :  { %v2047_v19 = vsel %vm4896_vm9, %v1983_v5, %v4894_v7  ;;  %v2091_v56 = vmul.f32 %v1983_v5, %v4893_v61  ;;  %v4909_v61 = vsel %vm3439_vm13, %v4908_v3, 1.0  ;;  %v1053_v5 = vsub.f32 %v3397_v63, %v4190_v8 }
 0x388   :  { %v2113_v57 = vsel %vm4898_vm2, %v2091_v56, %v2047_v19  ;;  %v4911_v56 = vld [vmem:[#allocation47_spill] sm:$0xff] }
 0x389   :  { %v2136_v37 = vsel %vm2134_vm8, %v2113_v57, 0.0  ;;  %vm4912_vm9 = vnez %v4911_v56  ;;  %v1052_v57 = vsub.f32 %v3308_v4, %v1005_v25  ;;  %v4917_v25 = vld [vmem:[#allocation41_spill] sm:$0xff] }
 0x38a   :  { %v2137_v10 = vadd.f32 %v2136_v37, %v2135_v20  ;;  %vm4918_vm13 = vnez %v4917_v25 }
 0x38b   :  { %v1734_v6 = vmul.f32 2.0, %v1052_v57 }
 0x38d   :  { %v1011_v29 = vpop.permute.xlu2 %1010  ;;  %v1985_v32 = vpop.permute.xlu0 %1984 }
 0x38e   :  { %v2048_v12 = vsel %vm4904_vm6, %v1985_v32, %v4902_v1  ;;  %v2092_v50 = vmul.f32 %v1985_v32, %v4901_v38  ;;  %v1793_v0 = vpop.permute.xlu1 %1792  ;;  %v4913_v1 = vld [vmem:[#allocation40_spill] sm:$0xff] }
 0x38f   :  { %v1842_v39 = vmul.f32 %v1793_v0, %v1732_v59 }
 0x390   :  { %v2114_v58 = vsel %vm4906_vm15, %v2092_v50, %v2048_v12 }
 0x391   :  { %v2138_v47 = vsel %vm2134_vm8, %v2114_v58, 0.0  ;;  %2012 = vrot.lane.b32.xlu0 %v1842_v39, %s2375_s25  ;;  %v1054_v39 = vsub.f32 %v3510_v49, %v4192_v52  ;;  %v4921_v58 = vld [vmem:[#allocation31_spill] sm:$0xff] }
 0x392   :  { %v2139_v24 = vadd.f32 %v2138_v47, %v2137_v10  ;;  %v1055_v10 = vsub.f32 %v3528_v28, %v1011_v29  ;;  %v4919_v28 = vld [vmem:[#allocation42_spill] sm:$0xff]  ;;  %vm4922_vm6 = vnez %v4921_v58 }
 0x393   :  { %vm4920_vm3 = vnez %v4919_v28  ;;  %v4924_v47 = vsel %vm4922_vm6, %v4923_v46, 1.0  ;;  %v1736_v7 = vmul.f32 2.0, %v1054_v39  ;;  %v1692_v28 = vmul.f32 2.0, %v4100_v51  ;;  %v4939_v39 = vld [vmem:[#allocation57_spill] sm:$0xff] }
 0x394   :  { %v2141_v9 = vadd.f32 %v2140_v15, %v2139_v24  ;;  %v1737_v59 = vmul.f32 2.0, %v1055_v10  ;;  %v4925_v24 = vld [vmem:[#allocation34_spill] sm:$0xff]  ;;  %v1735_v10 = vmul.f32 2.0, %v1053_v5 }
 0x395   :  { %v1993_v17 = vpop.permute.xlu2 %1992  ;;  %vm4926_vm15 = vnez %v4925_v24  ;;  %v4943_v24 = vld [vmem:[#allocation55_spill] sm:$0xff] }
 0x396   :  { %v2052_v21 = vsel %vm3450_vm14, %v1993_v17, %v4909_v61  ;;  %v2096_v19 = vmul.f32 %v1993_v17, %v4908_v3  ;;  %v1795_v45 = vpop.permute.xlu1 %1794  ;;  %vm4914_vm14 = vnez %v4913_v1  ;;  %v4927_v3 = vld [vmem:[#allocation32_spill] sm:$0xff] }
 0x397   :  { %v1843_v44 = vmul.f32 %v1795_v45, %v1733_v16  ;;  %v4916_v4 = vsel %vm4914_vm14, %v4915_v23, 1.0 }
 0x398   :  { %v2118_v31 = vsel %vm4912_vm9, %v2096_v19, %v2052_v21  ;;  %vm4928_vm9 = vnez %v4927_v3 }
 0x399   :  { %2014 = vrot.lane.b32.xlu1 %v1843_v44, %s2375_s25 }
 0x39d   :  { %v1803_v14 = vpop.permute.xlu2 %1802 }
 0x39e   :  { %v1797_v20 = vpop.permute.xlu1 %1796  ;;  %v1847_v0 = vmul.f32 %v1803_v14, %v1737_v59  ;;  %v4931_v14 = vld [vmem:[#allocation66_spill] sm:$0xff] }
 0x39f   :  { %v1844_v37 = vmul.f32 %v1797_v20, %v1734_v6  ;;  %v4929_v6 = vld [vmem:[#allocation58_spill] sm:$0xff] }
 0x3a0   :  { %vm4930_vm14 = vnez %v4929_v6  ;;  %v4956_v6 = vld [vmem:[#allocation51_spill] sm:$0xff] }
 0x3a1   :  { %2016 = vrot.lane.b32.xlu2 %v1844_v37, %s2375_s25  ;;  %v4932_v20 = vsel %vm4930_vm14, %v4931_v14, 1.0  ;;  %v4933_v37 = vld [vmem:[#allocation59_spill] sm:$0xff]  ;;  %vm4944_vm14 = vnez %v4943_v24 }
 0x3a5   :  { %v1229_v32 = vpop.permute.xlu2 %1228  ;;  %v1991_v60 = vpop.permute.xlu0 %1990 }
 0x3a6   :  { %v4252_v38 = vadd.f32 %v1229_v32, %v3569_v54  ;;  %v2051_v12 = vsel %vm4918_vm13, %v1991_v60, %v4916_v4  ;;  %v2095_v50 = vmul.f32 %v1991_v60, %v4915_v23  ;;  %vm4934_vm13 = vnez %v4933_v37  ;;  %v4935_v60 = vld [vmem:[#allocation60_spill] sm:$0xff]  ;;  %v4958_v37 = vld [vmem:[#allocation50_spill] sm:$0xff] }
 0x3a7   :  { %v2146_v32 = vsel %vm2134_vm8, %v2118_v31, 0.0 }
 0x3a8   :  { %vm1296_vm2 = vcmp.gt.f32.partialorder %v4252_v38, 1e-08  ;;  %v2117_v29 = vsel %vm4920_vm3, %v2095_v50, %v2051_v12  ;;  %vm4936_vm3 = vnez %v4935_v60 }
 0x3a9   :  { %v1318_v54 = vsel %vm1296_vm2, %v4252_v38, 1.0  ;;  %2022 = vrot.lane.b32.xlu2 %v1847_v0, %s2375_s25  ;;  %v2144_v52 = vsel %vm2134_vm8, %v2117_v29, 0.0  ;;  %v4937_v29 = vld [vmem:[#allocation53_spill] sm:$0xff] }
 0x3aa   :  { %2369 = vrcp.f32 %v1318_v54  ;;  %vm4938_vm6 = vnez %v4937_v29  ;;  %v4964_v29 = vld [vmem:[#allocation64_spill] sm:$0xff] }
 0x3ab   :  { %v4940_v31 = vsel %vm4938_vm6, %v4939_v39, 1.0 }
 0x3ad   :  { %v1989_v34 = vpop.permute.xlu1 %1988 }
 0x3ae   :  { %v2050_v15 = vsel %vm4926_vm15, %v1989_v34, %v4924_v47  ;;  %v2094_v16 = vmul.f32 %v1989_v34, %v4923_v46  ;;  %v4941_v34 = vld [vmem:[#allocation54_spill] sm:$0xff] }
 0x3af   :  { %vm4942_vm15 = vnez %v4941_v34 }
 0x3b0   :  { %v2370_v17 = vpop.eup %2369  ;;  %v2116_v61 = vsel %vm4928_vm9, %v2094_v16, %v2050_v15  ;;  %vm1868_vm9 = vcmp.lt.f32.partialorder %v4133_v27, 1e-08 }
 0x3b1   :  { %v1406_v21 = vmul.f32 %v2370_v17, %v1318_v54  ;;  %v2142_v49 = vsel %vm2134_vm8, %v2116_v61, 0.0 }
 0x3b2   :  { %v2143_v19 = vadd.f32 %v2142_v49, %v2141_v9  ;;  %v1801_v45 = vpop.permute.xlu0 %1800 }
 0x3b3   :  { %v1428_v56 = vsub.f32 2.0, %v1406_v21  ;;  %v1846_v57 = vmul.f32 %v1801_v45, %v1736_v7  ;;  %v4948_v7 = vld [vmem:[#allocation61_spill] sm:$0xff] }
 0x3b4   :  { %v1999_v44 = vpop.permute.xlu2 %1998  ;;  %v2145_v59 = vadd.f32 %v2144_v52, %v2143_v19  ;;  %vm4949_vm6 = vnez %v4948_v7  ;;  %v4950_v52 = vld [vmem:[#allocation62_spill] sm:$0xff] }
 0x3b5   :  { %v2055_v63 = vsel %vm4934_vm13, %v1999_v44, %v4932_v20  ;;  %v2099_v8 = vmul.f32 %v1999_v44, %v4931_v14  ;;  %2020 = vrot.lane.b32.xlu1 %v1846_v57, %s2375_s25  ;;  %v1799_v1 = vpop.permute.xlu1 %1798  ;;  %v1450_v23 = vmul.f32 %v2370_v17, %v1428_v56  ;;  %vm4313_vm13 = vmand %vm1868_vm9, %vm1296_vm2  ;;  %v4952_v44 = vld [vmem:[#allocation48_spill] sm:$0xff] }
 0x3b6   :  { %v1845_v4 = vmul.f32 %v1799_v1, %v1735_v10  ;;  %v2147_v25 = vadd.f32 %v2146_v32, %v2145_v59  ;;  %vm4953_vm9 = vnez %v4952_v44  ;;  %v4954_v56 = vld [vmem:[#allocation56_spill] sm:$0xff] }
 0x3b7   :  { %v2121_v9 = vsel %vm4936_vm3, %v2099_v8, %v2055_v63  ;;  %v1472_v12 = vmul.f32 %v1450_v23, %v1318_v54  ;;  %v4955_v57 = vsel %vm4953_vm9, %v4954_v56, 1.0  ;;  %vm4966_vm9 = vnez %v4779_v53 }
 0x3b8   :  { %2018 = vrot.lane.b32.xlu0 %v1845_v4, %s2375_s25  ;;  %v2152_v1 = vsel %vm2134_vm8, %v2121_v9, 0.0 }
 0x3b9   :  { %v1494_v50 = vsub.f32 2.0, %v1472_v12 }
 0x3ba   :  { %v1997_v0 = vpop.permute.xlu0 %1996 }
 0x3bb   :  { %v2054_v58 = vsel %vm4942_vm15, %v1997_v0, %v4940_v31  ;;  %v2098_v46 = vmul.f32 %v1997_v0, %v4939_v39  ;;  %v1516_v47 = vmul.f32 %v1494_v50, %v1450_v23  ;;  %vm4951_vm15 = vnez %v4950_v52  ;;  %v4960_v50 = vld [vmem:[#allocation63_spill] sm:$0xff]  ;;  %v4962_v0 = vld [vmem:[#allocation9_spill] sm:$0xff] }
 0x3bd   :  { %v2120_v54 = vsel %vm4944_vm14, %v2098_v46, %v2054_v58  ;;  %v1231_v15 = vpop.permute.xlu1 %1230  ;;  %v4306_v16 = vmul.f32 %v1692_v28, %v1516_v47  ;;  %vm4957_vm14 = vnez %v4956_v6  ;;  %v4968_v58 = vld [vmem:[#allocation67_spill] sm:$0xff] }
 0x3be   :  { %v4309_v51 = vadd.f32 %v1231_v15, %v3554_v2  ;;  %v4947_v2 = vsel %vm3692_vm1, %v3888_v42, 1.0  ;;  %vm4959_vm1 = vnez %v4958_v37  ;;  %v2150_v59 = vsel %vm2134_vm8, %v2120_v54, 0.0  ;;  %v4970_v54 = vld [vmem:[#allocation65_spill] sm:$0xff] }
 0x3bf   :  { %v1912_v5 = vsel %vm4313_vm13, %v4306_v16, 1.0  ;;  %vm2176_vm13 = vcmask 132096  }
 0x3c0   :  { %vm1297_vm3 = vcmp.gt.f32.partialorder %v4309_v51, 1e-08 }
 0x3c1   :  { %v1319_v3 = vsel %vm1297_vm3, %v4309_v51, 1.0 }
 0x3c2   :  { %2371 = vrcp.f32 %v1319_v3 }
 0x3c4   :  { %v2005_v61 = vpop.permute.xlu2 %2004 }
 0x3c5   :  { %v2058_v21 = vsel %vm4949_vm6, %v2005_v61, %v4947_v2  ;;  %v2102_v49 = vmul.f32 %v2005_v61, %v3888_v42  ;;  %v1995_v45 = vpop.permute.xlu1 %1994  ;;  %vm4961_vm6 = vnez %v4960_v50  ;;  %v4972_v61 = vsel %vm3955_vm0, %v4010_v30, 1.0 }
 0x3c6   :  { %v2053_v14 = vsel %vm4957_vm14, %v1995_v45, %v4955_v57  ;;  %v2097_v62 = vmul.f32 %v1995_v45, %v4954_v56  ;;  %v4963_v28 = vsel %vm4961_vm6, %v4962_v0, 1.0  ;;  %vm4969_vm14 = vnez %v4968_v58 }
 0x3c7   :  { %v2124_v19 = vsel %vm4951_vm15, %v2102_v49, %v2058_v21  ;;  %vm4965_vm15 = vnez %v4964_v29  ;;  %vm4973_vm6 = vnez %v4822_v33  ;;  %v4974_v21 = vld [vmem:[#allocation68_spill] sm:$0xff]  ;;  %v1693_v45 = vmul.f32 2.0, %v4151_v43 }
 0x3c8   :  { %v2372_v20 = vpop.eup %2371  ;;  %v2119_v63 = vsel %vm4959_vm1, %v2097_v62, %v2053_v14  ;;  %vm4971_vm1 = vnez %v4970_v54  ;;  %vm1869_vm0 = vcmp.lt.f32.partialorder %v4136_v26, 1e-08  ;;  %v2158_v33 = vsel %vm2134_vm8, %v2124_v19, 0.0  ;;  %v4980_v14 = vld [vmem:[#allocation71_spill] sm:$0xff]  ;;  %v5000_v54 = vld [vmem:[#allocation24_spill] sm:$0xff] }
 0x3c9   :  { %v1407_v8 = vmul.f32 %v2372_v20, %v1319_v3  ;;  %v2148_v42 = vsel %vm2134_vm8, %v2119_v63, 0.0  ;;  %v4984_v63 = vld [vmem:[#allocation17_spill] sm:$0xff] }
 0x3ca   :  { %v2149_v10 = vadd.f32 %v2148_v42, %v2147_v25  ;;  %v4967_v25 = vsel %vm4966_vm9, %v3896_v36, 1.0  ;;  %vm4976_vm9 = vnez %v4826_v55 }
 0x3cb   :  { %v1429_v32 = vsub.f32 2.0, %v1407_v8 }
 0x3cc   :  { %v2151_v60 = vadd.f32 %v2150_v59, %v2149_v10  ;;  %v4986_v10 = vld [vmem:[#allocation69_spill] sm:$0xff]  ;;  %v4988_v59 = vld [vmem:[#allocation15_spill] sm:$0xff] }
 0x3cd   :  { %v2001_v23 = vpop.permute.xlu0 %2000  ;;  %v2003_v4 = vpop.permute.xlu1 %2002  ;;  %v1451_v12 = vmul.f32 %v2372_v20, %v1429_v32  ;;  %v4982_v20 = vld [vmem:[#allocation19_spill] sm:$0xff] }
 0x3ce   :  { %v2056_v39 = vsel %vm4965_vm15, %v2001_v23, %v4963_v28  ;;  %v2100_v31 = vmul.f32 %v2001_v23, %v4962_v0  ;;  %v2153_v34 = vadd.f32 %v2152_v1, %v2151_v60  ;;  %v2057_v9 = vsel %vm4969_vm14, %v2003_v4, %v4967_v25  ;;  %vm4379_vm14 = vmand %vm1869_vm0, %vm1297_vm3  ;;  %v4990_v60 = vld [vmem:[#allocation70_spill] sm:$0xff] }
 0x3cf   :  { %v2101_v46 = vmul.f32 %v2003_v4, %v3896_v36  ;;  %v1473_v24 = vmul.f32 %v1451_v12, %v1319_v3  ;;  %vm4975_vm15 = vnez %v4974_v21  ;;  %vm4991_vm0 = vnez %v4990_v60  ;;  %v4992_v23 = vld [vmem:[#allocation10_spill] sm:$0xff] }
 0x3d0   :  { %v2011_v47 = vpop.permute.xlu2 %2010  ;;  %v2122_v15 = vsel %vm4971_vm1, %v2100_v31, %v2056_v39  ;;  %vm4979_vm1 = vnez %v4808_v22 }
 0x3d1   :  { %v2061_v2 = vsel %vm4973_vm6, %v2011_v47, %v4972_v61  ;;  %v2105_v53 = vmul.f32 %v2011_v47, %v4010_v30  ;;  %v2154_v7 = vsel %vm2134_vm8, %v2122_v15, 0.0  ;;  %v2123_v49 = vsel %vm4975_vm15, %v2101_v46, %v2057_v9 }
 0x3d2   :  { %v1495_v36 = vsub.f32 2.0, %v1473_v24  ;;  %v2155_v52 = vadd.f32 %v2154_v7, %v2153_v34  ;;  %v2156_v13 = vsel %vm2134_vm8, %v2123_v49, 0.0  ;;  %v4981_v62 = vsel %vm4979_vm1, %v4980_v14, 1.0 }
 0x3d3   :  { %v2127_v3 = vsel %vm4976_vm9, %v2105_v53, %v2061_v2  ;;  %vm4983_vm6 = vnez %v4982_v20  ;;  %vm4985_vm15 = vnez %v4984_v63  ;;  %vm4987_vm9 = vnez %v4986_v10  ;;  %v5004_v2 = vld [vmem:[#allocation26_spill] sm:$0xff]  ;;  %v5014_v20 = vld [vmem:[#allocation4_spill] sm:$0xff] }
 0x3d4   :  { %v1517_v44 = vmul.f32 %v1495_v36, %v1451_v12  ;;  %v2157_v56 = vadd.f32 %v2156_v13, %v2155_v52  ;;  %v4989_v32 = vsel %vm4987_vm9, %v4988_v59, 1.0  ;;  %v2164_v29 = vsel %vm2134_vm8, %v2127_v3, 0.0  ;;  %v5006_v36 = vld [vmem:[#allocation20_spill] sm:$0xff]  ;;  %v5008_v52 = vld [vmem:[#allocation18_spill] sm:$0xff] }
 0x3d5   :  { %v4994_v34 = vsel %vm4070_vm12, %v4103_v35, 1.0  ;;  %vm4995_vm1 = vnez %v4861_v48  ;;  %vm5001_vm12 = vnez %v5000_v54  ;;  %v5010_v3 = vld [vmem:[#allocation30_spill] sm:$0xff] }
 0x3d6   :  { %v1715_v30 = vmul.f32 %v1693_v45, %v1517_v44  ;;  %v2159_v57 = vadd.f32 %v2158_v33, %v2157_v56  ;;  %v5012_v13 = vld [vmem:[#allocation2_spill] sm:$0xff] }
 0x3d8   :  { %v1913_v55 = vsel %vm4379_vm14, %v1715_v30, 1.0  ;;  %vm4993_vm14 = vnez %v4992_v23 }
 0x3d9   :  { %v2009_v43 = vpop.permute.xlu1 %2008 }
 0x3da   :  { %v2060_v37 = vsel %vm4983_vm6, %v2009_v43, %v4981_v62  ;;  %v2104_v19 = vmul.f32 %v2009_v43, %v4980_v14  ;;  %vm4996_vm6 = vnez %v4863_v41 }
 0x3dc   :  { %v2126_v8 = vsel %vm4985_vm15, %v2104_v19, %v2060_v37  ;;  %vm1935_vm15 = vcmp.lt.f32.partialorder %v4309_v51, 1e-08  ;;  %v5015_v37 = vsel %vm4115_vm7, %v5014_v20, 1.0 }
 0x3dd   :  { %v2007_v42 = vpop.permute.xlu0 %2006  ;;  %v2162_v0 = vsel %vm2134_vm8, %v2126_v8, 0.0  ;;  %vm1957_vm9 = vmand %vm1341_vm10, %vm1935_vm15  ;;  %vm5011_vm15 = vnez %v5010_v3 }
 0x3de   :  { %v2059_v1 = vsel %vm4991_vm0, %v2007_v42, %v4989_v32  ;;  %v2103_v22 = vmul.f32 %v2007_v42, %v4988_v59  ;;  %vm4997_vm0 = vnez %v4831_v40 }
 0x3df   :  { %v4999_v24 = vsel %vm4997_vm0, %v4998_v18, 1.0  ;;  %vm2088_vm0 = vmand %vm1340_vm11, %vm1296_vm2 }
 0x3e0   :  { %v2125_v4 = vsel %vm4993_vm14, %v2103_v22, %v2059_v1  ;;  %vm4429_vm14 = vmand %vm1341_vm10, %vm1297_vm3  ;;  %vm5013_vm10 = vnez %v5012_v13  ;;  %vm1934_vm3 = vcmp.lt.f32.partialorder %v4252_v38, 1e-08 }
 0x3e1   :  { %v2160_v12 = vsel %vm2134_vm8, %v2125_v4, 0.0 }
 0x3e2   :  { %v2161_v50 = vadd.f32 %v2160_v12, %v2159_v57 }
 0x3e4   :  { %v2163_v28 = vadd.f32 %v2162_v0, %v2161_v50 }
 0x3e6   :  { %v2165_v39 = vadd.f32 %v2164_v29, %v2163_v28 }
 0x3fb   :  { %v2017_v31 = vpop.permute.xlu2 %2016 }
 0x3fc   :  { %v2064_v25 = vsel %vm4995_vm1, %v2017_v31, %v4994_v34  ;;  %v2108_v58 = vmul.f32 %v2017_v31, %v4103_v35  ;;  %vm5005_vm1 = vnez %v5004_v2 }
 0x3fe   :  { %v2130_v9 = vsel %vm4996_vm6, %v2108_v58, %v2064_v25  ;;  %vm5007_vm6 = vnez %v5006_v36 }
 0x3ff   :  { %v5009_v51 = vsel %vm5007_vm6, %v5008_v52, 1.0 }
 0x403   :  { %v2013_v46 = vpop.permute.xlu0 %2012  ;;  %v2023_v47 = vpop.permute.xlu2 %2022 }
 0x404   :  { %v2062_v48 = vsel %vm5001_vm12, %v2013_v46, %v4999_v24  ;;  %v2106_v15 = vmul.f32 %v2013_v46, %v4998_v18  ;;  %v2067_v35 = vsel %vm1957_vm9, %v2023_v47, %v1913_v55  ;;  %v2111_v61 = vmul.f32 %v2023_v47, %v1715_v30  ;;  %vm1956_vm9 = vmand %vm1340_vm11, %vm1934_vm3 }
 0x405   :  { %v2170_v30 = vsel %vm2134_vm8, %v2130_v9, 0.0 }
 0x406   :  { %v2128_v40 = vsel %vm5005_vm1, %v2106_v15, %v2062_v48  ;;  %v2133_v53 = vsel %vm4429_vm14, %v2111_v61, %v2067_v35 }
 0x407   :  { %v2166_v7 = vsel %vm2134_vm8, %v2128_v40, 0.0  ;;  %v2177_v10 = vsel %vm2176_vm13, %v2133_v53, 0.0 }
 0x408   :  { %v2167_v21 = vadd.f32 %v2166_v7, %v2165_v39 }
 0x40b   :  { %v2015_v49 = vpop.permute.xlu1 %2014 }
 0x40c   :  { %v2063_v26 = vsel %vm5011_vm15, %v2015_v49, %v5009_v51  ;;  %v2107_v45 = vmul.f32 %v2015_v49, %v5008_v52 }
 0x40e   :  { %v2129_v44 = vsel %vm5013_vm10, %v2107_v45, %v2063_v26 }
 0x40f   :  { %v2168_v56 = vsel %vm2134_vm8, %v2129_v44, 0.0 }
 0x410   :  { %v2169_v33 = vadd.f32 %v2168_v56, %v2167_v21 }
 0x412   :  { %v2171_v57 = vadd.f32 %v2170_v30, %v2169_v33 }
 0x427   :  { %v2021_v6 = vpop.permute.xlu1 %2020 }
 0x428   :  { %v2066_v55 = vsel %vm1956_vm9, %v2021_v6, %v1912_v5  ;;  %v2110_v43 = vmul.f32 %v2021_v6, %v4306_v16 }
 0x42a   :  { %v2132_v14 = vsel %vm2088_vm0, %v2110_v43, %v2066_v55  ;;  %v2019_v62 = vpop.permute.xlu0 %2018 }
 0x42b   :  { %v2065_v63 = vsel %vm4119_vm5, %v2019_v62, %v5015_v37  ;;  %v2109_v17 = vmul.f32 %v2019_v62, %v5014_v20  ;;  %v2174_v27 = vsel %vm2134_vm8, %v2132_v14, 0.0 }
 0x42d   :  { %v2131_v5 = vsel %vm4123_vm4, %v2109_v17, %v2065_v63 }
 0x42e   :  { %v2172_v16 = vsel %vm2134_vm8, %v2131_v5, 0.0 }
 0x42f   :  { %v2173_v38 = vadd.f32 %v2172_v16, %v2171_v57 }
 0x431   :  { %v2175_v42 = vadd.f32 %v2174_v27, %v2173_v38 }
 0x433   :  { %v2178_v59 = vadd.f32 %v2177_v10, %v2175_v42 }
 0x435   :  { %2179 = vadd.xlane.f32.xlu0 %v2178_v59 }
 0x4a8   :  { %v2180_v11 = vpop.xlane.xlu0 %2179 }
 0x4a9   :  { %v2181_v32 = vrot.slane %v2180_v11, 4 }
 0x4ab   :  { %v2182_v60 = vadd.f32 %v2181_v32, %v2180_v11 }
 0x4ad   :  { %v2183_v1 = vrot.slane %v2182_v60, 2 }
 0x4af   :  { %v2184_v22 = vadd.f32 %v2183_v1, %v2182_v60 }
 0x4b1   :  { %v2185_v23 = vrot.slane %v2184_v22, 1 }
 0x4b3   :  { %v2186_v4 = vadd.f32 %v2185_v23, %v2184_v22 }
 0x4b5   :  { %2280 = vpush %v2186_v4 }
 0x4e6   :  { %s2281_s26 = spop %2280 }
 0x4e7   :  { %v2188_v12 = vstv %s2281_s26 }
 0x4e8   :  { %2189 = vst [vmem:[%s4479_s4] sm:$0xff] %v2188_v12 }

</bundles_post_ra>
